<compile_context>
chip_gen: v5e
topology: v5e:2x2
jax: 0.10.0
libtpu: 0.0.40
codegen_flags: <defaults>
</compile_context>

<pallas_src>
import numpy as np
import jax
import jax.numpy as jnp
from jax.experimental import pallas as pl
from jax.experimental.pallas import tpu as pltpu


DIR_ORDER = ["l", "r", "u", "d", "nw", "ne", "sw", "se"]   # torch stack order
# Each edge window's tap set contains the corresponding corner window's tap set.
EDGE_BASE = {"l": "nw", "u": "nw", "r": "se", "d": "se"}


# -----------------------------------------------------------------------------
# Tap tables: each side-window conv (exactly as written in the PyTorch forward,
# i.e. its particular F.pad + VALID conv) is equivalent to taps on the
# symmetrically zero-padded image x_p, where weight index (wy, wx) multiplies
# x_p[i + iy, j + ix] for output pixel (i, j).  ('ne'/'sw' pair a weight slice
# with a shifted input window in the original module; reproduced exactly.)
# -----------------------------------------------------------------------------
def build_taps(k, r):
    taps = {}
    taps["l"]  = [((dy, dx),     (dy, dx))     for dy in range(k)     for dx in range(r + 1)]
    taps["r"]  = [((dy, dx + r), (dy, dx + r)) for dy in range(k)     for dx in range(r + 1)]
    taps["u"]  = [((dy, dx),     (dy, dx))     for dy in range(r + 1) for dx in range(k)]
    taps["d"]  = [((dy + r, dx), (dy + r, dx)) for dy in range(r + 1) for dx in range(k)]
    taps["nw"] = [((dy, dx),         (dy, dx))         for dy in range(r + 1) for dx in range(r + 1)]
    taps["ne"] = [((dy, dx + r),     (dy + r, dx))     for dy in range(r + 1) for dx in range(r + 1)]
    taps["sw"] = [((dy + r, dx),     (dy, dx + r))     for dy in range(r + 1) for dx in range(r + 1)]
    taps["se"] = [((dy + r, dx + r), (dy + r, dx + r)) for dy in range(r + 1) for dx in range(r + 1)]
    return taps


def build_kernel(w_np, *, H, W, k, r, B_tile, L, zero_halo_once):
    """Returns a Pallas kernel body with weights baked in as scalar constants."""
    C_out, C_in = w_np.shape[0], w_np.shape[1]
    # The subtract-x / add-x steps identify output channel co with input channel
    # co; only valid for a square weight (as in the torch module's usage here).
    assert C_out == C_in, "SideWindowFilter kernel requires in_channels == out_channels"
    Hp, Wp = H + 2 * r, W + 2 * r
    assert B_tile * Wp <= L

    taps = build_taps(k, r)
    w_sum = float(w_np.sum())

    # Per-direction scalar rescale (applied once, after the sum), over the FULL
    # tap/weight set of that direction (== torch sum of the sliced conv weight).
    scales = {}
    for name in DIR_ORDER:
        side_sum = sum(float(w_np[:, :, wy, wx].sum()) for (wy, wx), _ in taps[name])
        scales[name] = w_sum / side_sum

    # Reduced tap sets: edge windows are composed as corner-base + extra taps.
    reduced = {}
    for name in DIR_ORDER:
        if name in EDGE_BASE:
            base = set(taps[EDGE_BASE[name]])
            reduced[name] = [t for t in taps[name] if t not in base]
        else:
            reduced[name] = list(taps[name])

    # combo = ((wy, wx), (iy, ix)) -> which (reduced) direction sums it feeds.
    membership = {}
    for name in DIR_ORDER:
        for combo in reduced[name]:
            membership.setdefault(combo, []).append(name)
    # shift (iy, ix) -> distinct weight indices paired with it by any combo.
    widx_by_shift = {}
    for (widx, shift) in membership:
        widx_by_shift.setdefault(shift, []).append(widx)

    def kernel(x_ref, out_ref, pad_ref):
        # x_ref:   (B_tile, C, H, W)  unpadded images of this grid step
        # out_ref: (C, H, L)          lane-packed result slab (incl. halo/dead cols)
        # pad_ref: (C, Hp, L)         zero-padded, lane-packed scratch
        #
        # Halo width == r: shifted reads never leave an image's own Wp-wide slot,
        # and the interiors are fully rewritten each step, so zeroing only once
        # is safe (requires a sequential grid axis; see wrapper).
        if zero_halo_once:
            @pl.when(pl.program_id(0) == 0)
            def _init():
                pad_ref[...] = jnp.zeros_like(pad_ref)
        else:
            pad_ref[...] = jnp.zeros_like(pad_ref)

        for b in range(B_tile):
            off = b * Wp + r
            pad_ref[:, r:r + H, off:off + W] = x_ref[b]   # one (C,H,W) store per image

        for co in range(C_out):
            acc = {}                                   # direction -> running (H, L) sum
            for iy in range(k):
                # One row-shifted, full-lane-width view per input channel.
                rows = [pad_ref[ci, iy:iy + H, :] for ci in range(C_in)]
                for ix in range(k):
                    widxs = widx_by_shift.get((iy, ix))
                    if not widxs:
                        continue
                    if ix == r:
                        shifted = rows
                    else:
                        sh = (r - ix) % L              # positive lane rotation (XLU)
                        shifted = [pltpu.roll(v, sh, axis=1) for v in rows]
                    for (wy, wx) in widxs:
                        # Cross-channel partial, shared by every direction using it.
                        part = None
                        for ci in range(C_in):
                            term = float(w_np[co, ci, wy, wx]) * shifted[ci]
                            part = term if part is None else part + term
                        for name in membership[((wy, wx), (iy, ix))]:
                            acc[name] = part if name not in acc else acc[name] + part

            xc = pad_ref[co, r:r + H, :]               # original image, out coordinates
            best_raw = None
            best_abs = None
            for name in DIR_ORDER:                     # torch stack order; strict '<'
                s = acc[name]                          # keeps argmin first-min tie-break
                if name in EDGE_BASE:
                    s = s + acc[EDGE_BASE[name]]       # edge = corner base + extras
                raw = scales[name] * s                 # rescale once, after the sum
                av = jnp.abs(raw - xc)
                if best_raw is None:
                    best_raw, best_abs = raw, av
                else:
                    take = av < best_abs
                    best_raw = jnp.where(take, raw, best_raw)
                    best_abs = jnp.where(take, av, best_abs)
            # selected (scaled_conv - x) + x == selected scaled_conv
            out_ref[co, :, :] = best_raw

    return kernel


def _pick_batch_tile(B, Wp, target_lanes=128):
    """Largest divisor of B whose packed width fits within `target_lanes` lanes."""
    max_imgs = max(1, target_lanes // Wp)
    bt = 1
    for d in range(1, B + 1):
        if B % d == 0 and d <= max_imgs:
            bt = d
    return bt


def side_window_filter(x, w_ori, kernel_size, *, zero_halo_once=True):
    """x: (B, C, H, W) float32; w_ori: (C, C, k, k) float32 (conv_ori weight)."""
    B, C, H, W = x.shape
    k = kernel_size
    r = k // 2
    Hp, Wp = H + 2 * r, W + 2 * r

    w_np = np.asarray(jax.device_get(w_ori), dtype=np.float32)
    assert w_np.shape == (C, C, k, k)

    B_tile = _pick_batch_tile(B, Wp)
    T = B // B_tile
    L = ((B_tile * Wp + 127) // 128) * 128            # lane-dense packed width

    kernel = build_kernel(w_np, H=H, W=W, k=k, r=r, B_tile=B_tile, L=L,
                          zero_halo_once=zero_halo_once)

    # zero_halo_once relies on the scratch persisting across sequential grid
    # steps on a single core -> keep the grid axis "arbitrary".  For v7x 2-TC
    # scaling either shard the batch at the JAX level or pass
    # zero_halo_once=False to get a "parallel" axis (halo re-zeroed each step).
    sem = ("arbitrary",) if zero_halo_once else ("parallel",)

    out_slab = pl.pallas_call(
        kernel,
        out_shape=jax.ShapeDtypeStruct((T, C, H, L), jnp.float32),
        grid=(T,),
        in_specs=[pl.BlockSpec((B_tile, C, H, W), lambda t: (t, 0, 0, 0))],
        out_specs=pl.BlockSpec((None, C, H, L), lambda t: (t, 0, 0, 0)),
        scratch_shapes=[pltpu.VMEM((C, Hp, L), jnp.float32)],
        compiler_params=pltpu.CompilerParams(dimension_semantics=sem),
    )(x)

    # Unpack the lane-packed slab back to (B, C, H, W): drop dead lanes, split
    # per image, drop each image's halo columns.  Layout plumbing only.
    o = out_slab[:, :, :, :B_tile * Wp].reshape(T, C, H, B_tile, Wp)
    o = o[:, :, :, :, r:r + W]
    o = jnp.transpose(o, (0, 3, 1, 2, 4)).reshape(B, C, H, W)
    return o


# -----------------------------------------------------------------------------
# Pure-JAX reference mirroring the PyTorch forward literally (per-direction
# F.pad + VALID conv + rescale + argmin(|.|) gather). Sanity check only.
# -----------------------------------------------------------------------------
def reference(x, w_ori, kernel_size):
    r = kernel_size // 2
    dn = ("NCHW", "OIHW", "NCHW")

    def conv(xp, w):
        return jax.lax.conv_general_dilated(
            xp, w, (1, 1), "VALID", dimension_numbers=dn,
            precision=jax.lax.Precision.HIGHEST)

    def pad(a, left, right, top, bot):
        return jnp.pad(a, ((0, 0), (0, 0), (top, bot), (left, right)))

    w_sum = jnp.sum(w_ori)
    specs = [
        (r, 0, r, r, w_ori[:, :, :, :r + 1]),       # l
        (0, r, r, r, w_ori[:, :, :, r:]),           # r
        (r, r, r, 0, w_ori[:, :, :r + 1, :]),       # u
        (r, r, 0, r, w_ori[:, :, r:, :]),           # d
        (r, 0, r, 0, w_ori[:, :, :r + 1, :r + 1]),  # nw
        (r, 0, 0, r, w_ori[:, :, :r + 1, r:]),      # ne
        (0, r, r, 0, w_ori[:, :, r:, :r + 1]),      # sw
        (0, r, 0, r, w_ori[:, :, r:, r:]),          # se
    ]
    outs = []
    for (pl_, pr_, pt_, pb_, w) in specs:
        y = conv(pad(x, pl_, pr_, pt_, pb_), w)
        y = y * w_sum / jnp.sum(w) - x
        outs.append(y)
    st = jnp.stack(outs, axis=2)                       # (B, C, 8, H, W)
    idx = jnp.argmin(jnp.abs(st), axis=2, keepdims=True)
    sel = jnp.take_along_axis(st, idx, axis=2)[:, :, 0]
    return sel + x


if __name__ == "__main__":
    B, C, H, W = 2, 4, 16, 16
    kernel_size = 3  # must be odd (the torch assert has a typo; intent is odd k)

    key = jax.random.PRNGKey(0)
    kx, kw = jax.random.split(key)

    x = jax.random.normal(kx, (B, C, H, W), dtype=jnp.float32)
    # Deterministic conv_ori weight: box-filter-like with a small perturbation
    # (well-conditioned weight sums for the sum-ratio rescaling).
    w_ori = (1.0 + 0.05 * jax.random.normal(kw, (C, C, kernel_size, kernel_size),
                                            dtype=jnp.float32)) / (C * kernel_size * kernel_size)

    out = side_window_filter(x, w_ori, kernel_size)
    out = jax.block_until_ready(out)

    ref = jax.block_until_ready(reference(x, w_ori, kernel_size))
    diff = jnp.abs(out - ref)
    # Tolerant check: argmin over |.| can legitimately flip on near-ties, so
    # bound the fraction of disagreeing pixels rather than the max error.
    bad_frac = float(jnp.mean((diff > 1e-3).astype(jnp.float32)))
    if bad_frac < 0.01:
        print("KERNEL_OK")
    else:
        raise SystemExit(f"MISMATCH bad_frac={bad_frac} max={float(diff.max())}")
</pallas_src>

<mosaic_0001>
module attributes {stable_mosaic.version = 11 : i64} {
  func.func @kernel(%arg0: i32, %arg1: memref<2x4x16x16xf32, #tpu.memory_space<vmem>>, %arg2: memref<1x4x16x128xf32, #tpu.memory_space<vmem>>, %arg3: memref<4x18x128xf32, #tpu.memory_space<vmem>>) attributes {dimension_semantics = [#tpu.dimension_semantics<arbitrary>], iteration_bounds = array<i64: 1>, scalar_prefetch = 0 : i64, scratch_operands = 1 : i64, tpu.core_type = #tpu.core_type<tc>, window_params = [{transform_indices = @transform_0, window_bounds = array<i64: 2, 4, 16, 16>}, {transform_indices = @transform_1, window_bounds = array<i64: 1, 4, 16, 128>}]} {
    %c0_i32 = arith.constant 0 : i32
    %0 = arith.cmpi eq, %arg0, %c0_i32 : i32
    %1 = arith.extui %0 : i1 to i32
    %c0_i32_0 = arith.constant 0 : i32
    %2 = arith.cmpi ne, %1, %c0_i32_0 : i32
    scf.if %2 {
      %cst_579 = arith.constant 0.000000e+00 : f32
      %1257 = vector.broadcast %cst_579 : f32 to vector<4x18x128xf32>
      %c0_580 = arith.constant 0 : index
      %c0_581 = arith.constant 0 : index
      %c0_582 = arith.constant 0 : index
      %1258 = vector.load %arg3[%c0_580, %c0_581, %c0_582] : memref<4x18x128xf32, #tpu.memory_space<vmem>>, vector<4x18x128xf32>
      tpu.vector_store %arg3[%c0_580, %c0_581, %c0_582], %1257 {strides = array<i32>} : memref<4x18x128xf32, #tpu.memory_space<vmem>>, vector<4x18x128xf32>,
    } else {
    }
    %c0 = arith.constant 0 : index
    %c0_1 = arith.constant 0 : index
    %c0_2 = arith.constant 0 : index
    %c0_3 = arith.constant 0 : index
    %3 = vector.load %arg1[%c0, %c0_1, %c0_2, %c0_3] : memref<2x4x16x16xf32, #tpu.memory_space<vmem>>, vector<1x4x16x16xf32>
    %4 = vector.shape_cast %3 : vector<1x4x16x16xf32> to vector<4x16x16xf32>
    %c0_4 = arith.constant 0 : index
    %c1 = arith.constant 1 : index
    %c1_5 = arith.constant 1 : index
    %5 = vector.load %arg3[%c0_4, %c1, %c1_5] : memref<4x18x128xf32, #tpu.memory_space<vmem>>, vector<4x16x16xf32>
    tpu.vector_store %arg3[%c0_4, %c1, %c1_5], %4 {strides = array<i32>} : memref<4x18x128xf32, #tpu.memory_space<vmem>>, vector<4x16x16xf32>,
    %c1_6 = arith.constant 1 : index
    %c0_7 = arith.constant 0 : index
    %c0_8 = arith.constant 0 : index
    %c0_9 = arith.constant 0 : index
    %6 = vector.load %arg1[%c1_6, %c0_7, %c0_8, %c0_9] : memref<2x4x16x16xf32, #tpu.memory_space<vmem>>, vector<1x4x16x16xf32>
    %7 = vector.shape_cast %6 : vector<1x4x16x16xf32> to vector<4x16x16xf32>
    %c0_10 = arith.constant 0 : index
    %c1_11 = arith.constant 1 : index
    %c19 = arith.constant 19 : index
    %8 = vector.load %arg3[%c0_10, %c1_11, %c19] : memref<4x18x128xf32, #tpu.memory_space<vmem>>, vector<4x16x16xf32>
    tpu.vector_store %arg3[%c0_10, %c1_11, %c19], %7 {strides = array<i32>} : memref<4x18x128xf32, #tpu.memory_space<vmem>>, vector<4x16x16xf32>,
    %c0_12 = arith.constant 0 : index
    %c0_13 = arith.constant 0 : index
    %c0_14 = arith.constant 0 : index
    %9 = vector.load %arg3[%c0_12, %c0_13, %c0_14] : memref<4x18x128xf32, #tpu.memory_space<vmem>>, vector<1x16x128xf32>
    %10 = vector.shape_cast %9 : vector<1x16x128xf32> to vector<16x128xf32>
    %c1_15 = arith.constant 1 : index
    %c0_16 = arith.constant 0 : index
    %c0_17 = arith.constant 0 : index
    %11 = vector.load %arg3[%c1_15, %c0_16, %c0_17] : memref<4x18x128xf32, #tpu.memory_space<vmem>>, vector<1x16x128xf32>
    %12 = vector.shape_cast %11 : vector<1x16x128xf32> to vector<16x128xf32>
    %c2 = arith.constant 2 : index
    %c0_18 = arith.constant 0 : index
    %c0_19 = arith.constant 0 : index
    %13 = vector.load %arg3[%c2, %c0_18, %c0_19] : memref<4x18x128xf32, #tpu.memory_space<vmem>>, vector<1x16x128xf32>
    %14 = vector.shape_cast %13 : vector<1x16x128xf32> to vector<16x128xf32>
    %c3 = arith.constant 3 : index
    %c0_20 = arith.constant 0 : index
    %c0_21 = arith.constant 0 : index
    %15 = vector.load %arg3[%c3, %c0_20, %c0_21] : memref<4x18x128xf32, #tpu.memory_space<vmem>>, vector<1x16x128xf32>
    %16 = vector.shape_cast %15 : vector<1x16x128xf32> to vector<16x128xf32>
    %c1_i32 = arith.constant 1 : i32
    %17 = tpu.dynamic_rotate %10 by %c1_i32 dim 1 : vector<16x128xf32>, i32 -> vector<16x128xf32>
    %c1_i32_22 = arith.constant 1 : i32
    %18 = tpu.dynamic_rotate %12 by %c1_i32_22 dim 1 : vector<16x128xf32>, i32 -> vector<16x128xf32>
    %c1_i32_23 = arith.constant 1 : i32
    %19 = tpu.dynamic_rotate %14 by %c1_i32_23 dim 1 : vector<16x128xf32>, i32 -> vector<16x128xf32>
    %c1_i32_24 = arith.constant 1 : i32
    %20 = tpu.dynamic_rotate %16 by %c1_i32_24 dim 1 : vector<16x128xf32>, i32 -> vector<16x128xf32>
    %cst = arith.constant 0.0243854783 : f32
    %21 = vector.broadcast %cst : f32 to vector<16x128xf32>
    %22 = arith.mulf %21, %17 : vector<16x128xf32>
    %cst_25 = arith.constant 0.0307363942 : f32
    %23 = vector.broadcast %cst_25 : f32 to vector<16x128xf32>
    %24 = arith.mulf %23, %18 : vector<16x128xf32>
    %25 = arith.addf %22, %24 : vector<16x128xf32>
    %cst_26 = arith.constant 0.0264499187 : f32
    %26 = vector.broadcast %cst_26 : f32 to vector<16x128xf32>
    %27 = arith.mulf %26, %19 : vector<16x128xf32>
    %28 = arith.addf %25, %27 : vector<16x128xf32>
    %cst_27 = arith.constant 0.0300758388 : f32
    %29 = vector.broadcast %cst_27 : f32 to vector<16x128xf32>
    %30 = arith.mulf %29, %20 : vector<16x128xf32>
    %31 = arith.addf %28, %30 : vector<16x128xf32>
    %cst_28 = arith.constant 0.0249504428 : f32
    %32 = vector.broadcast %cst_28 : f32 to vector<16x128xf32>
    %33 = arith.mulf %32, %10 : vector<16x128xf32>
    %cst_29 = arith.constant 0.0275144819 : f32
    %34 = vector.broadcast %cst_29 : f32 to vector<16x128xf32>
    %35 = arith.mulf %34, %12 : vector<16x128xf32>
    %36 = arith.addf %33, %35 : vector<16x128xf32>
    %cst_30 = arith.constant 0.025057273 : f32
    %37 = vector.broadcast %cst_30 : f32 to vector<16x128xf32>
    %38 = arith.mulf %37, %14 : vector<16x128xf32>
    %39 = arith.addf %36, %38 : vector<16x128xf32>
    %cst_31 = arith.constant 0.0272092912 : f32
    %40 = vector.broadcast %cst_31 : f32 to vector<16x128xf32>
    %41 = arith.mulf %40, %16 : vector<16x128xf32>
    %42 = arith.addf %39, %41 : vector<16x128xf32>
    %43 = arith.addf %31, %42 : vector<16x128xf32>
    %cst_32 = arith.constant 0.0272867363 : f32
    %44 = vector.broadcast %cst_32 : f32 to vector<16x128xf32>
    %45 = arith.mulf %44, %10 : vector<16x128xf32>
    %cst_33 = arith.constant 0.0259706937 : f32
    %46 = vector.broadcast %cst_33 : f32 to vector<16x128xf32>
    %47 = arith.mulf %46, %12 : vector<16x128xf32>
    %48 = arith.addf %45, %47 : vector<16x128xf32>
    %cst_34 = arith.constant 0.0273305476 : f32
    %49 = vector.broadcast %cst_34 : f32 to vector<16x128xf32>
    %50 = arith.mulf %49, %14 : vector<16x128xf32>
    %51 = arith.addf %48, %50 : vector<16x128xf32>
    %cst_35 = arith.constant 0.0268772393 : f32
    %52 = vector.broadcast %cst_35 : f32 to vector<16x128xf32>
    %53 = arith.mulf %52, %16 : vector<16x128xf32>
    %54 = arith.addf %51, %53 : vector<16x128xf32>
    %c127_i32 = arith.constant 127 : i32
    %55 = tpu.dynamic_rotate %10 by %c127_i32 dim 1 : vector<16x128xf32>, i32 -> vector<16x128xf32>
    %c127_i32_36 = arith.constant 127 : i32
    %56 = tpu.dynamic_rotate %12 by %c127_i32_36 dim 1 : vector<16x128xf32>, i32 -> vector<16x128xf32>
    %c127_i32_37 = arith.constant 127 : i32
    %57 = tpu.dynamic_rotate %14 by %c127_i32_37 dim 1 : vector<16x128xf32>, i32 -> vector<16x128xf32>
    %c127_i32_38 = arith.constant 127 : i32
    %58 = tpu.dynamic_rotate %16 by %c127_i32_38 dim 1 : vector<16x128xf32>, i32 -> vector<16x128xf32>
    %cst_39 = arith.constant 0.0280632582 : f32
    %59 = vector.broadcast %cst_39 : f32 to vector<16x128xf32>
    %60 = arith.mulf %59, %55 : vector<16x128xf32>
    %cst_40 = arith.constant 0.0291166827 : f32
    %61 = vector.broadcast %cst_40 : f32 to vector<16x128xf32>
    %62 = arith.mulf %61, %56 : vector<16x128xf32>
    %63 = arith.addf %60, %62 : vector<16x128xf32>
    %cst_41 = arith.constant 0.026241675 : f32
    %64 = vector.broadcast %cst_41 : f32 to vector<16x128xf32>
    %65 = arith.mulf %64, %57 : vector<16x128xf32>
    %66 = arith.addf %63, %65 : vector<16x128xf32>
    %cst_42 = arith.constant 0.0278526209 : f32
    %67 = vector.broadcast %cst_42 : f32 to vector<16x128xf32>
    %68 = arith.mulf %67, %58 : vector<16x128xf32>
    %69 = arith.addf %66, %68 : vector<16x128xf32>
    %70 = arith.addf %42, %69 : vector<16x128xf32>
    %cst_43 = arith.constant 0.0267194808 : f32
    %71 = vector.broadcast %cst_43 : f32 to vector<16x128xf32>
    %72 = arith.mulf %71, %55 : vector<16x128xf32>
    %cst_44 = arith.constant 0.0267379247 : f32
    %73 = vector.broadcast %cst_44 : f32 to vector<16x128xf32>
    %74 = arith.mulf %73, %56 : vector<16x128xf32>
    %75 = arith.addf %72, %74 : vector<16x128xf32>
    %cst_45 = arith.constant 0.0296254586 : f32
    %76 = vector.broadcast %cst_45 : f32 to vector<16x128xf32>
    %77 = arith.mulf %76, %57 : vector<16x128xf32>
    %78 = arith.addf %75, %77 : vector<16x128xf32>
    %cst_46 = arith.constant 0.0253227837 : f32
    %79 = vector.broadcast %cst_46 : f32 to vector<16x128xf32>
    %80 = arith.mulf %79, %58 : vector<16x128xf32>
    %81 = arith.addf %78, %80 : vector<16x128xf32>
    %82 = arith.addf %54, %81 : vector<16x128xf32>
    %c0_47 = arith.constant 0 : index
    %c1_48 = arith.constant 1 : index
    %c0_49 = arith.constant 0 : index
    %83 = vector.load %arg3[%c0_47, %c1_48, %c0_49] : memref<4x18x128xf32, #tpu.memory_space<vmem>>, vector<1x16x128xf32>
    %84 = vector.shape_cast %83 : vector<1x16x128xf32> to vector<16x128xf32>
    %c1_50 = arith.constant 1 : index
    %c1_51 = arith.constant 1 : index
    %c0_52 = arith.constant 0 : index
    %85 = vector.load %arg3[%c1_50, %c1_51, %c0_52] : memref<4x18x128xf32, #tpu.memory_space<vmem>>, vector<1x16x128xf32>
    %86 = vector.shape_cast %85 : vector<1x16x128xf32> to vector<16x128xf32>
    %c2_53 = arith.constant 2 : index
    %c1_54 = arith.constant 1 : index
    %c0_55 = arith.constant 0 : index
    %87 = vector.load %arg3[%c2_53, %c1_54, %c0_55] : memref<4x18x128xf32, #tpu.memory_space<vmem>>, vector<1x16x128xf32>
    %88 = vector.shape_cast %87 : vector<1x16x128xf32> to vector<16x128xf32>
    %c3_56 = arith.constant 3 : index
    %c1_57 = arith.constant 1 : index
    %c0_58 = arith.constant 0 : index
    %89 = vector.load %arg3[%c3_56, %c1_57, %c0_58] : memref<4x18x128xf32, #tpu.memory_space<vmem>>, vector<1x16x128xf32>
    %90 = vector.shape_cast %89 : vector<1x16x128xf32> to vector<16x128xf32>
    %c1_i32_59 = arith.constant 1 : i32
    %91 = tpu.dynamic_rotate %84 by %c1_i32_59 dim 1 : vector<16x128xf32>, i32 -> vector<16x128xf32>
    %c1_i32_60 = arith.constant 1 : i32
    %92 = tpu.dynamic_rotate %86 by %c1_i32_60 dim 1 : vector<16x128xf32>, i32 -> vector<16x128xf32>
    %c1_i32_61 = arith.constant 1 : i32
    %93 = tpu.dynamic_rotate %88 by %c1_i32_61 dim 1 : vector<16x128xf32>, i32 -> vector<16x128xf32>
    %c1_i32_62 = arith.constant 1 : i32
    %94 = tpu.dynamic_rotate %90 by %c1_i32_62 dim 1 : vector<16x128xf32>, i32 -> vector<16x128xf32>
    %cst_63 = arith.constant 0.0272867363 : f32
    %95 = vector.broadcast %cst_63 : f32 to vector<16x128xf32>
    %96 = arith.mulf %95, %91 : vector<16x128xf32>
    %cst_64 = arith.constant 0.0259706937 : f32
    %97 = vector.broadcast %cst_64 : f32 to vector<16x128xf32>
    %98 = arith.mulf %97, %92 : vector<16x128xf32>
    %99 = arith.addf %96, %98 : vector<16x128xf32>
    %cst_65 = arith.constant 0.0273305476 : f32
    %100 = vector.broadcast %cst_65 : f32 to vector<16x128xf32>
    %101 = arith.mulf %100, %93 : vector<16x128xf32>
    %102 = arith.addf %99, %101 : vector<16x128xf32>
    %cst_66 = arith.constant 0.0268772393 : f32
    %103 = vector.broadcast %cst_66 : f32 to vector<16x128xf32>
    %104 = arith.mulf %103, %94 : vector<16x128xf32>
    %105 = arith.addf %102, %104 : vector<16x128xf32>
    %106 = arith.addf %43, %105 : vector<16x128xf32>
    %cst_67 = arith.constant 0.0249504428 : f32
    %107 = vector.broadcast %cst_67 : f32 to vector<16x128xf32>
    %108 = arith.mulf %107, %91 : vector<16x128xf32>
    %cst_68 = arith.constant 0.0275144819 : f32
    %109 = vector.broadcast %cst_68 : f32 to vector<16x128xf32>
    %110 = arith.mulf %109, %92 : vector<16x128xf32>
    %111 = arith.addf %108, %110 : vector<16x128xf32>
    %cst_69 = arith.constant 0.025057273 : f32
    %112 = vector.broadcast %cst_69 : f32 to vector<16x128xf32>
    %113 = arith.mulf %112, %93 : vector<16x128xf32>
    %114 = arith.addf %111, %113 : vector<16x128xf32>
    %cst_70 = arith.constant 0.0272092912 : f32
    %115 = vector.broadcast %cst_70 : f32 to vector<16x128xf32>
    %116 = arith.mulf %115, %94 : vector<16x128xf32>
    %117 = arith.addf %114, %116 : vector<16x128xf32>
    %cst_71 = arith.constant 0.0267194808 : f32
    %118 = vector.broadcast %cst_71 : f32 to vector<16x128xf32>
    %119 = arith.mulf %118, %84 : vector<16x128xf32>
    %cst_72 = arith.constant 0.0267379247 : f32
    %120 = vector.broadcast %cst_72 : f32 to vector<16x128xf32>
    %121 = arith.mulf %120, %86 : vector<16x128xf32>
    %122 = arith.addf %119, %121 : vector<16x128xf32>
    %cst_73 = arith.constant 0.0296254586 : f32
    %123 = vector.broadcast %cst_73 : f32 to vector<16x128xf32>
    %124 = arith.mulf %123, %88 : vector<16x128xf32>
    %125 = arith.addf %122, %124 : vector<16x128xf32>
    %cst_74 = arith.constant 0.0253227837 : f32
    %126 = vector.broadcast %cst_74 : f32 to vector<16x128xf32>
    %127 = arith.mulf %126, %90 : vector<16x128xf32>
    %128 = arith.addf %125, %127 : vector<16x128xf32>
    %129 = arith.addf %106, %128 : vector<16x128xf32>
    %cst_75 = arith.constant 0.0280632582 : f32
    %130 = vector.broadcast %cst_75 : f32 to vector<16x128xf32>
    %131 = arith.mulf %130, %84 : vector<16x128xf32>
    %cst_76 = arith.constant 0.0291166827 : f32
    %132 = vector.broadcast %cst_76 : f32 to vector<16x128xf32>
    %133 = arith.mulf %132, %86 : vector<16x128xf32>
    %134 = arith.addf %131, %133 : vector<16x128xf32>
    %cst_77 = arith.constant 0.026241675 : f32
    %135 = vector.broadcast %cst_77 : f32 to vector<16x128xf32>
    %136 = arith.mulf %135, %88 : vector<16x128xf32>
    %137 = arith.addf %134, %136 : vector<16x128xf32>
    %cst_78 = arith.constant 0.0278526209 : f32
    %138 = vector.broadcast %cst_78 : f32 to vector<16x128xf32>
    %139 = arith.mulf %138, %90 : vector<16x128xf32>
    %140 = arith.addf %137, %139 : vector<16x128xf32>
    %141 = arith.addf %117, %140 : vector<16x128xf32>
    %cst_79 = arith.constant 0.0261830296 : f32
    %142 = vector.broadcast %cst_79 : f32 to vector<16x128xf32>
    %143 = arith.mulf %142, %84 : vector<16x128xf32>
    %cst_80 = arith.constant 0.0283927657 : f32
    %144 = vector.broadcast %cst_80 : f32 to vector<16x128xf32>
    %145 = arith.mulf %144, %86 : vector<16x128xf32>
    %146 = arith.addf %143, %145 : vector<16x128xf32>
    %cst_81 = arith.constant 2.616830e-02 : f32
    %147 = vector.broadcast %cst_81 : f32 to vector<16x128xf32>
    %148 = arith.mulf %147, %88 : vector<16x128xf32>
    %149 = arith.addf %146, %148 : vector<16x128xf32>
    %cst_82 = arith.constant 0.0290589333 : f32
    %150 = vector.broadcast %cst_82 : f32 to vector<16x128xf32>
    %151 = arith.mulf %150, %90 : vector<16x128xf32>
    %152 = arith.addf %149, %151 : vector<16x128xf32>
    %153 = arith.addf %82, %152 : vector<16x128xf32>
    %c127_i32_83 = arith.constant 127 : i32
    %154 = tpu.dynamic_rotate %84 by %c127_i32_83 dim 1 : vector<16x128xf32>, i32 -> vector<16x128xf32>
    %c127_i32_84 = arith.constant 127 : i32
    %155 = tpu.dynamic_rotate %86 by %c127_i32_84 dim 1 : vector<16x128xf32>, i32 -> vector<16x128xf32>
    %c127_i32_85 = arith.constant 127 : i32
    %156 = tpu.dynamic_rotate %88 by %c127_i32_85 dim 1 : vector<16x128xf32>, i32 -> vector<16x128xf32>
    %c127_i32_86 = arith.constant 127 : i32
    %157 = tpu.dynamic_rotate %90 by %c127_i32_86 dim 1 : vector<16x128xf32>, i32 -> vector<16x128xf32>
    %cst_87 = arith.constant 2.614090e-02 : f32
    %158 = vector.broadcast %cst_87 : f32 to vector<16x128xf32>
    %159 = arith.mulf %158, %154 : vector<16x128xf32>
    %cst_88 = arith.constant 0.0272597242 : f32
    %160 = vector.broadcast %cst_88 : f32 to vector<16x128xf32>
    %161 = arith.mulf %160, %155 : vector<16x128xf32>
    %162 = arith.addf %159, %161 : vector<16x128xf32>
    %cst_89 = arith.constant 0.0289058853 : f32
    %163 = vector.broadcast %cst_89 : f32 to vector<16x128xf32>
    %164 = arith.mulf %163, %156 : vector<16x128xf32>
    %165 = arith.addf %162, %164 : vector<16x128xf32>
    %cst_90 = arith.constant 0.0274839867 : f32
    %166 = vector.broadcast %cst_90 : f32 to vector<16x128xf32>
    %167 = arith.mulf %166, %157 : vector<16x128xf32>
    %168 = arith.addf %165, %167 : vector<16x128xf32>
    %169 = arith.addf %69, %168 : vector<16x128xf32>
    %170 = arith.addf %128, %168 : vector<16x128xf32>
    %cst_91 = arith.constant 0.0281905066 : f32
    %171 = vector.broadcast %cst_91 : f32 to vector<16x128xf32>
    %172 = arith.mulf %171, %154 : vector<16x128xf32>
    %cst_92 = arith.constant 0.0261245836 : f32
    %173 = vector.broadcast %cst_92 : f32 to vector<16x128xf32>
    %174 = arith.mulf %173, %155 : vector<16x128xf32>
    %175 = arith.addf %172, %174 : vector<16x128xf32>
    %cst_93 = arith.constant 0.0270232763 : f32
    %176 = vector.broadcast %cst_93 : f32 to vector<16x128xf32>
    %177 = arith.mulf %176, %156 : vector<16x128xf32>
    %178 = arith.addf %175, %177 : vector<16x128xf32>
    %cst_94 = arith.constant 0.0259737801 : f32
    %179 = vector.broadcast %cst_94 : f32 to vector<16x128xf32>
    %180 = arith.mulf %179, %157 : vector<16x128xf32>
    %181 = arith.addf %178, %180 : vector<16x128xf32>
    %182 = arith.addf %153, %181 : vector<16x128xf32>
    %c0_95 = arith.constant 0 : index
    %c2_96 = arith.constant 2 : index
    %c0_97 = arith.constant 0 : index
    %183 = vector.load %arg3[%c0_95, %c2_96, %c0_97] : memref<4x18x128xf32, #tpu.memory_space<vmem>>, vector<1x16x128xf32>
    %184 = vector.shape_cast %183 : vector<1x16x128xf32> to vector<16x128xf32>
    %c1_98 = arith.constant 1 : index
    %c2_99 = arith.constant 2 : index
    %c0_100 = arith.constant 0 : index
    %185 = vector.load %arg3[%c1_98, %c2_99, %c0_100] : memref<4x18x128xf32, #tpu.memory_space<vmem>>, vector<1x16x128xf32>
    %186 = vector.shape_cast %185 : vector<1x16x128xf32> to vector<16x128xf32>
    %c2_101 = arith.constant 2 : index
    %c2_102 = arith.constant 2 : index
    %c0_103 = arith.constant 0 : index
    %187 = vector.load %arg3[%c2_101, %c2_102, %c0_103] : memref<4x18x128xf32, #tpu.memory_space<vmem>>, vector<1x16x128xf32>
    %188 = vector.shape_cast %187 : vector<1x16x128xf32> to vector<16x128xf32>
    %c3_104 = arith.constant 3 : index
    %c2_105 = arith.constant 2 : index
    %c0_106 = arith.constant 0 : index
    %189 = vector.load %arg3[%c3_104, %c2_105, %c0_106] : memref<4x18x128xf32, #tpu.memory_space<vmem>>, vector<1x16x128xf32>
    %190 = vector.shape_cast %189 : vector<1x16x128xf32> to vector<16x128xf32>
    %c1_i32_107 = arith.constant 1 : i32
    %191 = tpu.dynamic_rotate %184 by %c1_i32_107 dim 1 : vector<16x128xf32>, i32 -> vector<16x128xf32>
    %c1_i32_108 = arith.constant 1 : i32
    %192 = tpu.dynamic_rotate %186 by %c1_i32_108 dim 1 : vector<16x128xf32>, i32 -> vector<16x128xf32>
    %c1_i32_109 = arith.constant 1 : i32
    %193 = tpu.dynamic_rotate %188 by %c1_i32_109 dim 1 : vector<16x128xf32>, i32 -> vector<16x128xf32>
    %c1_i32_110 = arith.constant 1 : i32
    %194 = tpu.dynamic_rotate %190 by %c1_i32_110 dim 1 : vector<16x128xf32>, i32 -> vector<16x128xf32>
    %cst_111 = arith.constant 0.0261830296 : f32
    %195 = vector.broadcast %cst_111 : f32 to vector<16x128xf32>
    %196 = arith.mulf %195, %191 : vector<16x128xf32>
    %cst_112 = arith.constant 0.0283927657 : f32
    %197 = vector.broadcast %cst_112 : f32 to vector<16x128xf32>
    %198 = arith.mulf %197, %192 : vector<16x128xf32>
    %199 = arith.addf %196, %198 : vector<16x128xf32>
    %cst_113 = arith.constant 2.616830e-02 : f32
    %200 = vector.broadcast %cst_113 : f32 to vector<16x128xf32>
    %201 = arith.mulf %200, %193 : vector<16x128xf32>
    %202 = arith.addf %199, %201 : vector<16x128xf32>
    %cst_114 = arith.constant 0.0290589333 : f32
    %203 = vector.broadcast %cst_114 : f32 to vector<16x128xf32>
    %204 = arith.mulf %203, %194 : vector<16x128xf32>
    %205 = arith.addf %202, %204 : vector<16x128xf32>
    %206 = arith.addf %105, %205 : vector<16x128xf32>
    %cst_115 = arith.constant 0.0267194808 : f32
    %207 = vector.broadcast %cst_115 : f32 to vector<16x128xf32>
    %208 = arith.mulf %207, %191 : vector<16x128xf32>
    %cst_116 = arith.constant 0.0267379247 : f32
    %209 = vector.broadcast %cst_116 : f32 to vector<16x128xf32>
    %210 = arith.mulf %209, %192 : vector<16x128xf32>
    %211 = arith.addf %208, %210 : vector<16x128xf32>
    %cst_117 = arith.constant 0.0296254586 : f32
    %212 = vector.broadcast %cst_117 : f32 to vector<16x128xf32>
    %213 = arith.mulf %212, %193 : vector<16x128xf32>
    %214 = arith.addf %211, %213 : vector<16x128xf32>
    %cst_118 = arith.constant 0.0253227837 : f32
    %215 = vector.broadcast %cst_118 : f32 to vector<16x128xf32>
    %216 = arith.mulf %215, %194 : vector<16x128xf32>
    %217 = arith.addf %214, %216 : vector<16x128xf32>
    %218 = arith.addf %141, %217 : vector<16x128xf32>
    %cst_119 = arith.constant 0.0281905066 : f32
    %219 = vector.broadcast %cst_119 : f32 to vector<16x128xf32>
    %220 = arith.mulf %219, %184 : vector<16x128xf32>
    %cst_120 = arith.constant 0.0261245836 : f32
    %221 = vector.broadcast %cst_120 : f32 to vector<16x128xf32>
    %222 = arith.mulf %221, %186 : vector<16x128xf32>
    %223 = arith.addf %220, %222 : vector<16x128xf32>
    %cst_121 = arith.constant 0.0270232763 : f32
    %224 = vector.broadcast %cst_121 : f32 to vector<16x128xf32>
    %225 = arith.mulf %224, %188 : vector<16x128xf32>
    %226 = arith.addf %223, %225 : vector<16x128xf32>
    %cst_122 = arith.constant 0.0259737801 : f32
    %227 = vector.broadcast %cst_122 : f32 to vector<16x128xf32>
    %228 = arith.mulf %227, %190 : vector<16x128xf32>
    %229 = arith.addf %226, %228 : vector<16x128xf32>
    %230 = arith.addf %205, %229 : vector<16x128xf32>
    %231 = arith.addf %170, %229 : vector<16x128xf32>
    %cst_123 = arith.constant 2.614090e-02 : f32
    %232 = vector.broadcast %cst_123 : f32 to vector<16x128xf32>
    %233 = arith.mulf %232, %184 : vector<16x128xf32>
    %cst_124 = arith.constant 0.0272597242 : f32
    %234 = vector.broadcast %cst_124 : f32 to vector<16x128xf32>
    %235 = arith.mulf %234, %186 : vector<16x128xf32>
    %236 = arith.addf %233, %235 : vector<16x128xf32>
    %cst_125 = arith.constant 0.0289058853 : f32
    %237 = vector.broadcast %cst_125 : f32 to vector<16x128xf32>
    %238 = arith.mulf %237, %188 : vector<16x128xf32>
    %239 = arith.addf %236, %238 : vector<16x128xf32>
    %cst_126 = arith.constant 0.0274839867 : f32
    %240 = vector.broadcast %cst_126 : f32 to vector<16x128xf32>
    %241 = arith.mulf %240, %190 : vector<16x128xf32>
    %242 = arith.addf %239, %241 : vector<16x128xf32>
    %243 = arith.addf %218, %242 : vector<16x128xf32>
    %c127_i32_127 = arith.constant 127 : i32
    %244 = tpu.dynamic_rotate %184 by %c127_i32_127 dim 1 : vector<16x128xf32>, i32 -> vector<16x128xf32>
    %c127_i32_128 = arith.constant 127 : i32
    %245 = tpu.dynamic_rotate %186 by %c127_i32_128 dim 1 : vector<16x128xf32>, i32 -> vector<16x128xf32>
    %c127_i32_129 = arith.constant 127 : i32
    %246 = tpu.dynamic_rotate %188 by %c127_i32_129 dim 1 : vector<16x128xf32>, i32 -> vector<16x128xf32>
    %c127_i32_130 = arith.constant 127 : i32
    %247 = tpu.dynamic_rotate %190 by %c127_i32_130 dim 1 : vector<16x128xf32>, i32 -> vector<16x128xf32>
    %cst_131 = arith.constant 0.02595759 : f32
    %248 = vector.broadcast %cst_131 : f32 to vector<16x128xf32>
    %249 = arith.mulf %248, %244 : vector<16x128xf32>
    %cst_132 = arith.constant 0.0276815891 : f32
    %250 = vector.broadcast %cst_132 : f32 to vector<16x128xf32>
    %251 = arith.mulf %250, %245 : vector<16x128xf32>
    %252 = arith.addf %249, %251 : vector<16x128xf32>
    %cst_133 = arith.constant 0.0288997665 : f32
    %253 = vector.broadcast %cst_133 : f32 to vector<16x128xf32>
    %254 = arith.mulf %253, %246 : vector<16x128xf32>
    %255 = arith.addf %252, %254 : vector<16x128xf32>
    %cst_134 = arith.constant 0.0267848913 : f32
    %256 = vector.broadcast %cst_134 : f32 to vector<16x128xf32>
    %257 = arith.mulf %256, %247 : vector<16x128xf32>
    %258 = arith.addf %255, %257 : vector<16x128xf32>
    %259 = arith.addf %231, %258 : vector<16x128xf32>
    %c0_135 = arith.constant 0 : index
    %c1_136 = arith.constant 1 : index
    %c0_137 = arith.constant 0 : index
    %260 = vector.load %arg3[%c0_135, %c1_136, %c0_137] : memref<4x18x128xf32, #tpu.memory_space<vmem>>, vector<1x16x128xf32>
    %261 = vector.shape_cast %260 : vector<1x16x128xf32> to vector<16x128xf32>
    %262 = arith.addf %230, %129 : vector<16x128xf32>
    %cst_138 = arith.constant 1.50293946 : f32
    %263 = vector.broadcast %cst_138 : f32 to vector<16x128xf32>
    %264 = arith.mulf %263, %262 : vector<16x128xf32>
    %265 = arith.subf %264, %261 : vector<16x128xf32>
    %266 = math.absf %265 : vector<16x128xf32>
    %267 = arith.addf %70, %259 : vector<16x128xf32>
    %cst_139 = arith.constant 1.50234187 : f32
    %268 = vector.broadcast %cst_139 : f32 to vector<16x128xf32>
    %269 = arith.mulf %268, %267 : vector<16x128xf32>
    %270 = arith.subf %269, %261 : vector<16x128xf32>
    %271 = math.absf %270 : vector<16x128xf32>
    %272 = arith.cmpf olt, %271, %266 : vector<16x128xf32>
    %273 = arith.select %272, %269, %264 : vector<16x128xi1>, vector<16x128xf32>
    %274 = arith.select %272, %271, %266 : vector<16x128xi1>, vector<16x128xf32>
    %275 = arith.addf %169, %129 : vector<16x128xf32>
    %cst_140 = arith.constant 1.49917042 : f32
    %276 = vector.broadcast %cst_140 : f32 to vector<16x128xf32>
    %277 = arith.mulf %276, %275 : vector<16x128xf32>
    %278 = arith.subf %277, %261 : vector<16x128xf32>
    %279 = math.absf %278 : vector<16x128xf32>
    %280 = arith.cmpf olt, %279, %274 : vector<16x128xf32>
    %281 = arith.select %280, %277, %273 : vector<16x128xi1>, vector<16x128xf32>
    %282 = arith.select %280, %279, %274 : vector<16x128xi1>, vector<16x128xf32>
    %283 = arith.addf %206, %259 : vector<16x128xf32>
    %cst_141 = arith.constant 1.50050712 : f32
    %284 = vector.broadcast %cst_141 : f32 to vector<16x128xf32>
    %285 = arith.mulf %284, %283 : vector<16x128xf32>
    %286 = arith.subf %285, %261 : vector<16x128xf32>
    %287 = math.absf %286 : vector<16x128xf32>
    %288 = arith.cmpf olt, %287, %282 : vector<16x128xf32>
    %289 = arith.select %288, %285, %281 : vector<16x128xi1>, vector<16x128xf32>
    %290 = arith.select %288, %287, %282 : vector<16x128xi1>, vector<16x128xf32>
    %cst_142 = arith.constant 2.25407195 : f32
    %291 = vector.broadcast %cst_142 : f32 to vector<16x128xf32>
    %292 = arith.mulf %291, %129 : vector<16x128xf32>
    %293 = arith.subf %292, %261 : vector<16x128xf32>
    %294 = math.absf %293 : vector<16x128xf32>
    %295 = arith.cmpf olt, %294, %290 : vector<16x128xf32>
    %296 = arith.select %295, %292, %289 : vector<16x128xi1>, vector<16x128xf32>
    %297 = arith.select %295, %294, %290 : vector<16x128xi1>, vector<16x128xf32>
    %cst_143 = arith.constant 2.25644946 : f32
    %298 = vector.broadcast %cst_143 : f32 to vector<16x128xf32>
    %299 = arith.mulf %298, %243 : vector<16x128xf32>
    %300 = arith.subf %299, %261 : vector<16x128xf32>
    %301 = math.absf %300 : vector<16x128xf32>
    %302 = arith.cmpf olt, %301, %297 : vector<16x128xf32>
    %303 = arith.select %302, %299, %296 : vector<16x128xi1>, vector<16x128xf32>
    %304 = arith.select %302, %301, %297 : vector<16x128xi1>, vector<16x128xf32>
    %cst_144 = arith.constant 2.25681973 : f32
    %305 = vector.broadcast %cst_144 : f32 to vector<16x128xf32>
    %306 = arith.mulf %305, %182 : vector<16x128xf32>
    %307 = arith.subf %306, %261 : vector<16x128xf32>
    %308 = math.absf %307 : vector<16x128xf32>
    %309 = arith.cmpf olt, %308, %304 : vector<16x128xf32>
    %310 = arith.select %309, %306, %303 : vector<16x128xi1>, vector<16x128xf32>
    %311 = arith.select %309, %308, %304 : vector<16x128xi1>, vector<16x128xf32>
    %cst_145 = arith.constant 2.24686861 : f32
    %312 = vector.broadcast %cst_145 : f32 to vector<16x128xf32>
    %313 = arith.mulf %312, %259 : vector<16x128xf32>
    %314 = arith.subf %313, %261 : vector<16x128xf32>
    %315 = math.absf %314 : vector<16x128xf32>
    %316 = arith.cmpf olt, %315, %311 : vector<16x128xf32>
    %317 = arith.select %316, %313, %310 : vector<16x128xi1>, vector<16x128xf32>
    %c0_146 = arith.constant 0 : index
    %c0_147 = arith.constant 0 : index
    %c0_148 = arith.constant 0 : index
    %c0_149 = arith.constant 0 : index
    %318 = vector.load %arg2[%c0_146, %c0_147, %c0_148, %c0_149] : memref<1x4x16x128xf32, #tpu.memory_space<vmem>>, vector<1x1x16x128xf32>
    %319 = vector.shape_cast %318 : vector<1x1x16x128xf32> to vector<16x128xf32>
    %320 = vector.shape_cast %317 : vector<16x128xf32> to vector<1x1x16x128xf32>
    tpu.vector_store %arg2[%c0_146, %c0_147, %c0_148, %c0_149], %320 {strides = array<i32>} : memref<1x4x16x128xf32, #tpu.memory_space<vmem>>, vector<1x1x16x128xf32>,
    %c0_150 = arith.constant 0 : index
    %c0_151 = arith.constant 0 : index
    %c0_152 = arith.constant 0 : index
    %321 = vector.load %arg3[%c0_150, %c0_151, %c0_152] : memref<4x18x128xf32, #tpu.memory_space<vmem>>, vector<1x16x128xf32>
    %322 = vector.shape_cast %321 : vector<1x16x128xf32> to vector<16x128xf32>
    %c1_153 = arith.constant 1 : index
    %c0_154 = arith.constant 0 : index
    %c0_155 = arith.constant 0 : index
    %323 = vector.load %arg3[%c1_153, %c0_154, %c0_155] : memref<4x18x128xf32, #tpu.memory_space<vmem>>, vector<1x16x128xf32>
    %324 = vector.shape_cast %323 : vector<1x16x128xf32> to vector<16x128xf32>
    %c2_156 = arith.constant 2 : index
    %c0_157 = arith.constant 0 : index
    %c0_158 = arith.constant 0 : index
    %325 = vector.load %arg3[%c2_156, %c0_157, %c0_158] : memref<4x18x128xf32, #tpu.memory_space<vmem>>, vector<1x16x128xf32>
    %326 = vector.shape_cast %325 : vector<1x16x128xf32> to vector<16x128xf32>
    %c3_159 = arith.constant 3 : index
    %c0_160 = arith.constant 0 : index
    %c0_161 = arith.constant 0 : index
    %327 = vector.load %arg3[%c3_159, %c0_160, %c0_161] : memref<4x18x128xf32, #tpu.memory_space<vmem>>, vector<1x16x128xf32>
    %328 = vector.shape_cast %327 : vector<1x16x128xf32> to vector<16x128xf32>
    %c1_i32_162 = arith.constant 1 : i32
    %329 = tpu.dynamic_rotate %322 by %c1_i32_162 dim 1 : vector<16x128xf32>, i32 -> vector<16x128xf32>
    %c1_i32_163 = arith.constant 1 : i32
    %330 = tpu.dynamic_rotate %324 by %c1_i32_163 dim 1 : vector<16x128xf32>, i32 -> vector<16x128xf32>
    %c1_i32_164 = arith.constant 1 : i32
    %331 = tpu.dynamic_rotate %326 by %c1_i32_164 dim 1 : vector<16x128xf32>, i32 -> vector<16x128xf32>
    %c1_i32_165 = arith.constant 1 : i32
    %332 = tpu.dynamic_rotate %328 by %c1_i32_165 dim 1 : vector<16x128xf32>, i32 -> vector<16x128xf32>
    %cst_166 = arith.constant 0.0244410578 : f32
    %333 = vector.broadcast %cst_166 : f32 to vector<16x128xf32>
    %334 = arith.mulf %333, %329 : vector<16x128xf32>
    %cst_167 = arith.constant 0.0264707338 : f32
    %335 = vector.broadcast %cst_167 : f32 to vector<16x128xf32>
    %336 = arith.mulf %335, %330 : vector<16x128xf32>
    %337 = arith.addf %334, %336 : vector<16x128xf32>
    %cst_168 = arith.constant 0.0280360971 : f32
    %338 = vector.broadcast %cst_168 : f32 to vector<16x128xf32>
    %339 = arith.mulf %338, %331 : vector<16x128xf32>
    %340 = arith.addf %337, %339 : vector<16x128xf32>
    %cst_169 = arith.constant 0.0290743876 : f32
    %341 = vector.broadcast %cst_169 : f32 to vector<16x128xf32>
    %342 = arith.mulf %341, %332 : vector<16x128xf32>
    %343 = arith.addf %340, %342 : vector<16x128xf32>
    %cst_170 = arith.constant 0.0254484788 : f32
    %344 = vector.broadcast %cst_170 : f32 to vector<16x128xf32>
    %345 = arith.mulf %344, %322 : vector<16x128xf32>
    %cst_171 = arith.constant 0.030439768 : f32
    %346 = vector.broadcast %cst_171 : f32 to vector<16x128xf32>
    %347 = arith.mulf %346, %324 : vector<16x128xf32>
    %348 = arith.addf %345, %347 : vector<16x128xf32>
    %cst_172 = arith.constant 0.025549721 : f32
    %349 = vector.broadcast %cst_172 : f32 to vector<16x128xf32>
    %350 = arith.mulf %349, %326 : vector<16x128xf32>
    %351 = arith.addf %348, %350 : vector<16x128xf32>
    %cst_173 = arith.constant 0.0301451087 : f32
    %352 = vector.broadcast %cst_173 : f32 to vector<16x128xf32>
    %353 = arith.mulf %352, %328 : vector<16x128xf32>
    %354 = arith.addf %351, %353 : vector<16x128xf32>
    %355 = arith.addf %343, %354 : vector<16x128xf32>
    %cst_174 = arith.constant 0.0253958907 : f32
    %356 = vector.broadcast %cst_174 : f32 to vector<16x128xf32>
    %357 = arith.mulf %356, %322 : vector<16x128xf32>
    %cst_175 = arith.constant 0.0276678912 : f32
    %358 = vector.broadcast %cst_175 : f32 to vector<16x128xf32>
    %359 = arith.mulf %358, %324 : vector<16x128xf32>
    %360 = arith.addf %357, %359 : vector<16x128xf32>
    %cst_176 = arith.constant 0.0284724664 : f32
    %361 = vector.broadcast %cst_176 : f32 to vector<16x128xf32>
    %362 = arith.mulf %361, %326 : vector<16x128xf32>
    %363 = arith.addf %360, %362 : vector<16x128xf32>
    %cst_177 = arith.constant 0.029749155 : f32
    %364 = vector.broadcast %cst_177 : f32 to vector<16x128xf32>
    %365 = arith.mulf %364, %328 : vector<16x128xf32>
    %366 = arith.addf %363, %365 : vector<16x128xf32>
    %c127_i32_178 = arith.constant 127 : i32
    %367 = tpu.dynamic_rotate %322 by %c127_i32_178 dim 1 : vector<16x128xf32>, i32 -> vector<16x128xf32>
    %c127_i32_179 = arith.constant 127 : i32
    %368 = tpu.dynamic_rotate %324 by %c127_i32_179 dim 1 : vector<16x128xf32>, i32 -> vector<16x128xf32>
    %c127_i32_180 = arith.constant 127 : i32
    %369 = tpu.dynamic_rotate %326 by %c127_i32_180 dim 1 : vector<16x128xf32>, i32 -> vector<16x128xf32>
    %c127_i32_181 = arith.constant 127 : i32
    %370 = tpu.dynamic_rotate %328 by %c127_i32_181 dim 1 : vector<16x128xf32>, i32 -> vector<16x128xf32>
    %cst_182 = arith.constant 0.0271252282 : f32
    %371 = vector.broadcast %cst_182 : f32 to vector<16x128xf32>
    %372 = arith.mulf %371, %367 : vector<16x128xf32>
    %cst_183 = arith.constant 0.0285509732 : f32
    %373 = vector.broadcast %cst_183 : f32 to vector<16x128xf32>
    %374 = arith.mulf %373, %368 : vector<16x128xf32>
    %375 = arith.addf %372, %374 : vector<16x128xf32>
    %cst_184 = arith.constant 0.0271191522 : f32
    %376 = vector.broadcast %cst_184 : f32 to vector<16x128xf32>
    %377 = arith.mulf %376, %369 : vector<16x128xf32>
    %378 = arith.addf %375, %377 : vector<16x128xf32>
    %cst_185 = arith.constant 0.028839631 : f32
    %379 = vector.broadcast %cst_185 : f32 to vector<16x128xf32>
    %380 = arith.mulf %379, %370 : vector<16x128xf32>
    %381 = arith.addf %378, %380 : vector<16x128xf32>
    %382 = arith.addf %354, %381 : vector<16x128xf32>
    %cst_186 = arith.constant 0.025015654 : f32
    %383 = vector.broadcast %cst_186 : f32 to vector<16x128xf32>
    %384 = arith.mulf %383, %367 : vector<16x128xf32>
    %cst_187 = arith.constant 0.0288431682 : f32
    %385 = vector.broadcast %cst_187 : f32 to vector<16x128xf32>
    %386 = arith.mulf %385, %368 : vector<16x128xf32>
    %387 = arith.addf %384, %386 : vector<16x128xf32>
    %cst_188 = arith.constant 0.0267376713 : f32
    %388 = vector.broadcast %cst_188 : f32 to vector<16x128xf32>
    %389 = arith.mulf %388, %369 : vector<16x128xf32>
    %390 = arith.addf %387, %389 : vector<16x128xf32>
    %cst_189 = arith.constant 0.0262103677 : f32
    %391 = vector.broadcast %cst_189 : f32 to vector<16x128xf32>
    %392 = arith.mulf %391, %370 : vector<16x128xf32>
    %393 = arith.addf %390, %392 : vector<16x128xf32>
    %394 = arith.addf %366, %393 : vector<16x128xf32>
    %c0_190 = arith.constant 0 : index
    %c1_191 = arith.constant 1 : index
    %c0_192 = arith.constant 0 : index
    %395 = vector.load %arg3[%c0_190, %c1_191, %c0_192] : memref<4x18x128xf32, #tpu.memory_space<vmem>>, vector<1x16x128xf32>
    %396 = vector.shape_cast %395 : vector<1x16x128xf32> to vector<16x128xf32>
    %c1_193 = arith.constant 1 : index
    %c1_194 = arith.constant 1 : index
    %c0_195 = arith.constant 0 : index
    %397 = vector.load %arg3[%c1_193, %c1_194, %c0_195] : memref<4x18x128xf32, #tpu.memory_space<vmem>>, vector<1x16x128xf32>
    %398 = vector.shape_cast %397 : vector<1x16x128xf32> to vector<16x128xf32>
    %c2_196 = arith.constant 2 : index
    %c1_197 = arith.constant 1 : index
    %c0_198 = arith.constant 0 : index
    %399 = vector.load %arg3[%c2_196, %c1_197, %c0_198] : memref<4x18x128xf32, #tpu.memory_space<vmem>>, vector<1x16x128xf32>
    %400 = vector.shape_cast %399 : vector<1x16x128xf32> to vector<16x128xf32>
    %c3_199 = arith.constant 3 : index
    %c1_200 = arith.constant 1 : index
    %c0_201 = arith.constant 0 : index
    %401 = vector.load %arg3[%c3_199, %c1_200, %c0_201] : memref<4x18x128xf32, #tpu.memory_space<vmem>>, vector<1x16x128xf32>
    %402 = vector.shape_cast %401 : vector<1x16x128xf32> to vector<16x128xf32>
    %c1_i32_202 = arith.constant 1 : i32
    %403 = tpu.dynamic_rotate %396 by %c1_i32_202 dim 1 : vector<16x128xf32>, i32 -> vector<16x128xf32>
    %c1_i32_203 = arith.constant 1 : i32
    %404 = tpu.dynamic_rotate %398 by %c1_i32_203 dim 1 : vector<16x128xf32>, i32 -> vector<16x128xf32>
    %c1_i32_204 = arith.constant 1 : i32
    %405 = tpu.dynamic_rotate %400 by %c1_i32_204 dim 1 : vector<16x128xf32>, i32 -> vector<16x128xf32>
    %c1_i32_205 = arith.constant 1 : i32
    %406 = tpu.dynamic_rotate %402 by %c1_i32_205 dim 1 : vector<16x128xf32>, i32 -> vector<16x128xf32>
    %cst_206 = arith.constant 0.0253958907 : f32
    %407 = vector.broadcast %cst_206 : f32 to vector<16x128xf32>
    %408 = arith.mulf %407, %403 : vector<16x128xf32>
    %cst_207 = arith.constant 0.0276678912 : f32
    %409 = vector.broadcast %cst_207 : f32 to vector<16x128xf32>
    %410 = arith.mulf %409, %404 : vector<16x128xf32>
    %411 = arith.addf %408, %410 : vector<16x128xf32>
    %cst_208 = arith.constant 0.0284724664 : f32
    %412 = vector.broadcast %cst_208 : f32 to vector<16x128xf32>
    %413 = arith.mulf %412, %405 : vector<16x128xf32>
    %414 = arith.addf %411, %413 : vector<16x128xf32>
    %cst_209 = arith.constant 0.029749155 : f32
    %415 = vector.broadcast %cst_209 : f32 to vector<16x128xf32>
    %416 = arith.mulf %415, %406 : vector<16x128xf32>
    %417 = arith.addf %414, %416 : vector<16x128xf32>
    %418 = arith.addf %355, %417 : vector<16x128xf32>
    %cst_210 = arith.constant 0.0254484788 : f32
    %419 = vector.broadcast %cst_210 : f32 to vector<16x128xf32>
    %420 = arith.mulf %419, %403 : vector<16x128xf32>
    %cst_211 = arith.constant 0.030439768 : f32
    %421 = vector.broadcast %cst_211 : f32 to vector<16x128xf32>
    %422 = arith.mulf %421, %404 : vector<16x128xf32>
    %423 = arith.addf %420, %422 : vector<16x128xf32>
    %cst_212 = arith.constant 0.025549721 : f32
    %424 = vector.broadcast %cst_212 : f32 to vector<16x128xf32>
    %425 = arith.mulf %424, %405 : vector<16x128xf32>
    %426 = arith.addf %423, %425 : vector<16x128xf32>
    %cst_213 = arith.constant 0.0301451087 : f32
    %427 = vector.broadcast %cst_213 : f32 to vector<16x128xf32>
    %428 = arith.mulf %427, %406 : vector<16x128xf32>
    %429 = arith.addf %426, %428 : vector<16x128xf32>
    %cst_214 = arith.constant 0.025015654 : f32
    %430 = vector.broadcast %cst_214 : f32 to vector<16x128xf32>
    %431 = arith.mulf %430, %396 : vector<16x128xf32>
    %cst_215 = arith.constant 0.0288431682 : f32
    %432 = vector.broadcast %cst_215 : f32 to vector<16x128xf32>
    %433 = arith.mulf %432, %398 : vector<16x128xf32>
    %434 = arith.addf %431, %433 : vector<16x128xf32>
    %cst_216 = arith.constant 0.0267376713 : f32
    %435 = vector.broadcast %cst_216 : f32 to vector<16x128xf32>
    %436 = arith.mulf %435, %400 : vector<16x128xf32>
    %437 = arith.addf %434, %436 : vector<16x128xf32>
    %cst_217 = arith.constant 0.0262103677 : f32
    %438 = vector.broadcast %cst_217 : f32 to vector<16x128xf32>
    %439 = arith.mulf %438, %402 : vector<16x128xf32>
    %440 = arith.addf %437, %439 : vector<16x128xf32>
    %441 = arith.addf %418, %440 : vector<16x128xf32>
    %cst_218 = arith.constant 0.0271252282 : f32
    %442 = vector.broadcast %cst_218 : f32 to vector<16x128xf32>
    %443 = arith.mulf %442, %396 : vector<16x128xf32>
    %cst_219 = arith.constant 0.0285509732 : f32
    %444 = vector.broadcast %cst_219 : f32 to vector<16x128xf32>
    %445 = arith.mulf %444, %398 : vector<16x128xf32>
    %446 = arith.addf %443, %445 : vector<16x128xf32>
    %cst_220 = arith.constant 0.0271191522 : f32
    %447 = vector.broadcast %cst_220 : f32 to vector<16x128xf32>
    %448 = arith.mulf %447, %400 : vector<16x128xf32>
    %449 = arith.addf %446, %448 : vector<16x128xf32>
    %cst_221 = arith.constant 0.028839631 : f32
    %450 = vector.broadcast %cst_221 : f32 to vector<16x128xf32>
    %451 = arith.mulf %450, %402 : vector<16x128xf32>
    %452 = arith.addf %449, %451 : vector<16x128xf32>
    %453 = arith.addf %429, %452 : vector<16x128xf32>
    %cst_222 = arith.constant 0.027396597 : f32
    %454 = vector.broadcast %cst_222 : f32 to vector<16x128xf32>
    %455 = arith.mulf %454, %396 : vector<16x128xf32>
    %cst_223 = arith.constant 0.0262053534 : f32
    %456 = vector.broadcast %cst_223 : f32 to vector<16x128xf32>
    %457 = arith.mulf %456, %398 : vector<16x128xf32>
    %458 = arith.addf %455, %457 : vector<16x128xf32>
    %cst_224 = arith.constant 0.0273489524 : f32
    %459 = vector.broadcast %cst_224 : f32 to vector<16x128xf32>
    %460 = arith.mulf %459, %400 : vector<16x128xf32>
    %461 = arith.addf %458, %460 : vector<16x128xf32>
    %cst_225 = arith.constant 0.0286759771 : f32
    %462 = vector.broadcast %cst_225 : f32 to vector<16x128xf32>
    %463 = arith.mulf %462, %402 : vector<16x128xf32>
    %464 = arith.addf %461, %463 : vector<16x128xf32>
    %465 = arith.addf %394, %464 : vector<16x128xf32>
    %c127_i32_226 = arith.constant 127 : i32
    %466 = tpu.dynamic_rotate %396 by %c127_i32_226 dim 1 : vector<16x128xf32>, i32 -> vector<16x128xf32>
    %c127_i32_227 = arith.constant 127 : i32
    %467 = tpu.dynamic_rotate %398 by %c127_i32_227 dim 1 : vector<16x128xf32>, i32 -> vector<16x128xf32>
    %c127_i32_228 = arith.constant 127 : i32
    %468 = tpu.dynamic_rotate %400 by %c127_i32_228 dim 1 : vector<16x128xf32>, i32 -> vector<16x128xf32>
    %c127_i32_229 = arith.constant 127 : i32
    %469 = tpu.dynamic_rotate %402 by %c127_i32_229 dim 1 : vector<16x128xf32>, i32 -> vector<16x128xf32>
    %cst_230 = arith.constant 0.0254851077 : f32
    %470 = vector.broadcast %cst_230 : f32 to vector<16x128xf32>
    %471 = arith.mulf %470, %466 : vector<16x128xf32>
    %cst_231 = arith.constant 0.029049946 : f32
    %472 = vector.broadcast %cst_231 : f32 to vector<16x128xf32>
    %473 = arith.mulf %472, %467 : vector<16x128xf32>
    %474 = arith.addf %471, %473 : vector<16x128xf32>
    %cst_232 = arith.constant 0.0291224252 : f32
    %475 = vector.broadcast %cst_232 : f32 to vector<16x128xf32>
    %476 = arith.mulf %475, %468 : vector<16x128xf32>
    %477 = arith.addf %474, %476 : vector<16x128xf32>
    %cst_233 = arith.constant 0.0286257695 : f32
    %478 = vector.broadcast %cst_233 : f32 to vector<16x128xf32>
    %479 = arith.mulf %478, %469 : vector<16x128xf32>
    %480 = arith.addf %477, %479 : vector<16x128xf32>
    %481 = arith.addf %381, %480 : vector<16x128xf32>
    %482 = arith.addf %440, %480 : vector<16x128xf32>
    %cst_234 = arith.constant 0.0267792083 : f32
    %483 = vector.broadcast %cst_234 : f32 to vector<16x128xf32>
    %484 = arith.mulf %483, %466 : vector<16x128xf32>
    %cst_235 = arith.constant 0.0287366509 : f32
    %485 = vector.broadcast %cst_235 : f32 to vector<16x128xf32>
    %486 = arith.mulf %485, %467 : vector<16x128xf32>
    %487 = arith.addf %484, %486 : vector<16x128xf32>
    %cst_236 = arith.constant 0.0278042592 : f32
    %488 = vector.broadcast %cst_236 : f32 to vector<16x128xf32>
    %489 = arith.mulf %488, %468 : vector<16x128xf32>
    %490 = arith.addf %487, %489 : vector<16x128xf32>
    %cst_237 = arith.constant 0.0260662436 : f32
    %491 = vector.broadcast %cst_237 : f32 to vector<16x128xf32>
    %492 = arith.mulf %491, %469 : vector<16x128xf32>
    %493 = arith.addf %490, %492 : vector<16x128xf32>
    %494 = arith.addf %465, %493 : vector<16x128xf32>
    %c0_238 = arith.constant 0 : index
    %c2_239 = arith.constant 2 : index
    %c0_240 = arith.constant 0 : index
    %495 = vector.load %arg3[%c0_238, %c2_239, %c0_240] : memref<4x18x128xf32, #tpu.memory_space<vmem>>, vector<1x16x128xf32>
    %496 = vector.shape_cast %495 : vector<1x16x128xf32> to vector<16x128xf32>
    %c1_241 = arith.constant 1 : index
    %c2_242 = arith.constant 2 : index
    %c0_243 = arith.constant 0 : index
    %497 = vector.load %arg3[%c1_241, %c2_242, %c0_243] : memref<4x18x128xf32, #tpu.memory_space<vmem>>, vector<1x16x128xf32>
    %498 = vector.shape_cast %497 : vector<1x16x128xf32> to vector<16x128xf32>
    %c2_244 = arith.constant 2 : index
    %c2_245 = arith.constant 2 : index
    %c0_246 = arith.constant 0 : index
    %499 = vector.load %arg3[%c2_244, %c2_245, %c0_246] : memref<4x18x128xf32, #tpu.memory_space<vmem>>, vector<1x16x128xf32>
    %500 = vector.shape_cast %499 : vector<1x16x128xf32> to vector<16x128xf32>
    %c3_247 = arith.constant 3 : index
    %c2_248 = arith.constant 2 : index
    %c0_249 = arith.constant 0 : index
    %501 = vector.load %arg3[%c3_247, %c2_248, %c0_249] : memref<4x18x128xf32, #tpu.memory_space<vmem>>, vector<1x16x128xf32>
    %502 = vector.shape_cast %501 : vector<1x16x128xf32> to vector<16x128xf32>
    %c1_i32_250 = arith.constant 1 : i32
    %503 = tpu.dynamic_rotate %496 by %c1_i32_250 dim 1 : vector<16x128xf32>, i32 -> vector<16x128xf32>
    %c1_i32_251 = arith.constant 1 : i32
    %504 = tpu.dynamic_rotate %498 by %c1_i32_251 dim 1 : vector<16x128xf32>, i32 -> vector<16x128xf32>
    %c1_i32_252 = arith.constant 1 : i32
    %505 = tpu.dynamic_rotate %500 by %c1_i32_252 dim 1 : vector<16x128xf32>, i32 -> vector<16x128xf32>
    %c1_i32_253 = arith.constant 1 : i32
    %506 = tpu.dynamic_rotate %502 by %c1_i32_253 dim 1 : vector<16x128xf32>, i32 -> vector<16x128xf32>
    %cst_254 = arith.constant 0.027396597 : f32
    %507 = vector.broadcast %cst_254 : f32 to vector<16x128xf32>
    %508 = arith.mulf %507, %503 : vector<16x128xf32>
    %cst_255 = arith.constant 0.0262053534 : f32
    %509 = vector.broadcast %cst_255 : f32 to vector<16x128xf32>
    %510 = arith.mulf %509, %504 : vector<16x128xf32>
    %511 = arith.addf %508, %510 : vector<16x128xf32>
    %cst_256 = arith.constant 0.0273489524 : f32
    %512 = vector.broadcast %cst_256 : f32 to vector<16x128xf32>
    %513 = arith.mulf %512, %505 : vector<16x128xf32>
    %514 = arith.addf %511, %513 : vector<16x128xf32>
    %cst_257 = arith.constant 0.0286759771 : f32
    %515 = vector.broadcast %cst_257 : f32 to vector<16x128xf32>
    %516 = arith.mulf %515, %506 : vector<16x128xf32>
    %517 = arith.addf %514, %516 : vector<16x128xf32>
    %518 = arith.addf %417, %517 : vector<16x128xf32>
    %cst_258 = arith.constant 0.025015654 : f32
    %519 = vector.broadcast %cst_258 : f32 to vector<16x128xf32>
    %520 = arith.mulf %519, %503 : vector<16x128xf32>
    %cst_259 = arith.constant 0.0288431682 : f32
    %521 = vector.broadcast %cst_259 : f32 to vector<16x128xf32>
    %522 = arith.mulf %521, %504 : vector<16x128xf32>
    %523 = arith.addf %520, %522 : vector<16x128xf32>
    %cst_260 = arith.constant 0.0267376713 : f32
    %524 = vector.broadcast %cst_260 : f32 to vector<16x128xf32>
    %525 = arith.mulf %524, %505 : vector<16x128xf32>
    %526 = arith.addf %523, %525 : vector<16x128xf32>
    %cst_261 = arith.constant 0.0262103677 : f32
    %527 = vector.broadcast %cst_261 : f32 to vector<16x128xf32>
    %528 = arith.mulf %527, %506 : vector<16x128xf32>
    %529 = arith.addf %526, %528 : vector<16x128xf32>
    %530 = arith.addf %453, %529 : vector<16x128xf32>
    %cst_262 = arith.constant 0.0267792083 : f32
    %531 = vector.broadcast %cst_262 : f32 to vector<16x128xf32>
    %532 = arith.mulf %531, %496 : vector<16x128xf32>
    %cst_263 = arith.constant 0.0287366509 : f32
    %533 = vector.broadcast %cst_263 : f32 to vector<16x128xf32>
    %534 = arith.mulf %533, %498 : vector<16x128xf32>
    %535 = arith.addf %532, %534 : vector<16x128xf32>
    %cst_264 = arith.constant 0.0278042592 : f32
    %536 = vector.broadcast %cst_264 : f32 to vector<16x128xf32>
    %537 = arith.mulf %536, %500 : vector<16x128xf32>
    %538 = arith.addf %535, %537 : vector<16x128xf32>
    %cst_265 = arith.constant 0.0260662436 : f32
    %539 = vector.broadcast %cst_265 : f32 to vector<16x128xf32>
    %540 = arith.mulf %539, %502 : vector<16x128xf32>
    %541 = arith.addf %538, %540 : vector<16x128xf32>
    %542 = arith.addf %517, %541 : vector<16x128xf32>
    %543 = arith.addf %482, %541 : vector<16x128xf32>
    %cst_266 = arith.constant 0.0254851077 : f32
    %544 = vector.broadcast %cst_266 : f32 to vector<16x128xf32>
    %545 = arith.mulf %544, %496 : vector<16x128xf32>
    %cst_267 = arith.constant 0.029049946 : f32
    %546 = vector.broadcast %cst_267 : f32 to vector<16x128xf32>
    %547 = arith.mulf %546, %498 : vector<16x128xf32>
    %548 = arith.addf %545, %547 : vector<16x128xf32>
    %cst_268 = arith.constant 0.0291224252 : f32
    %549 = vector.broadcast %cst_268 : f32 to vector<16x128xf32>
    %550 = arith.mulf %549, %500 : vector<16x128xf32>
    %551 = arith.addf %548, %550 : vector<16x128xf32>
    %cst_269 = arith.constant 0.0286257695 : f32
    %552 = vector.broadcast %cst_269 : f32 to vector<16x128xf32>
    %553 = arith.mulf %552, %502 : vector<16x128xf32>
    %554 = arith.addf %551, %553 : vector<16x128xf32>
    %555 = arith.addf %530, %554 : vector<16x128xf32>
    %c127_i32_270 = arith.constant 127 : i32
    %556 = tpu.dynamic_rotate %496 by %c127_i32_270 dim 1 : vector<16x128xf32>, i32 -> vector<16x128xf32>
    %c127_i32_271 = arith.constant 127 : i32
    %557 = tpu.dynamic_rotate %498 by %c127_i32_271 dim 1 : vector<16x128xf32>, i32 -> vector<16x128xf32>
    %c127_i32_272 = arith.constant 127 : i32
    %558 = tpu.dynamic_rotate %500 by %c127_i32_272 dim 1 : vector<16x128xf32>, i32 -> vector<16x128xf32>
    %c127_i32_273 = arith.constant 127 : i32
    %559 = tpu.dynamic_rotate %502 by %c127_i32_273 dim 1 : vector<16x128xf32>, i32 -> vector<16x128xf32>
    %cst_274 = arith.constant 0.0283236839 : f32
    %560 = vector.broadcast %cst_274 : f32 to vector<16x128xf32>
    %561 = arith.mulf %560, %556 : vector<16x128xf32>
    %cst_275 = arith.constant 0.0258700103 : f32
    %562 = vector.broadcast %cst_275 : f32 to vector<16x128xf32>
    %563 = arith.mulf %562, %557 : vector<16x128xf32>
    %564 = arith.addf %561, %563 : vector<16x128xf32>
    %cst_276 = arith.constant 0.0292446874 : f32
    %565 = vector.broadcast %cst_276 : f32 to vector<16x128xf32>
    %566 = arith.mulf %565, %558 : vector<16x128xf32>
    %567 = arith.addf %564, %566 : vector<16x128xf32>
    %cst_277 = arith.constant 0.0295418873 : f32
    %568 = vector.broadcast %cst_277 : f32 to vector<16x128xf32>
    %569 = arith.mulf %568, %559 : vector<16x128xf32>
    %570 = arith.addf %567, %569 : vector<16x128xf32>
    %571 = arith.addf %543, %570 : vector<16x128xf32>
    %c1_278 = arith.constant 1 : index
    %c1_279 = arith.constant 1 : index
    %c0_280 = arith.constant 0 : index
    %572 = vector.load %arg3[%c1_278, %c1_279, %c0_280] : memref<4x18x128xf32, #tpu.memory_space<vmem>>, vector<1x16x128xf32>
    %573 = vector.shape_cast %572 : vector<1x16x128xf32> to vector<16x128xf32>
    %574 = arith.addf %542, %441 : vector<16x128xf32>
    %cst_281 = arith.constant 1.50293946 : f32
    %575 = vector.broadcast %cst_281 : f32 to vector<16x128xf32>
    %576 = arith.mulf %575, %574 : vector<16x128xf32>
    %577 = arith.subf %576, %573 : vector<16x128xf32>
    %578 = math.absf %577 : vector<16x128xf32>
    %579 = arith.addf %382, %571 : vector<16x128xf32>
    %cst_282 = arith.constant 1.50234187 : f32
    %580 = vector.broadcast %cst_282 : f32 to vector<16x128xf32>
    %581 = arith.mulf %580, %579 : vector<16x128xf32>
    %582 = arith.subf %581, %573 : vector<16x128xf32>
    %583 = math.absf %582 : vector<16x128xf32>
    %584 = arith.cmpf olt, %583, %578 : vector<16x128xf32>
    %585 = arith.select %584, %581, %576 : vector<16x128xi1>, vector<16x128xf32>
    %586 = arith.select %584, %583, %578 : vector<16x128xi1>, vector<16x128xf32>
    %587 = arith.addf %481, %441 : vector<16x128xf32>
    %cst_283 = arith.constant 1.49917042 : f32
    %588 = vector.broadcast %cst_283 : f32 to vector<16x128xf32>
    %589 = arith.mulf %588, %587 : vector<16x128xf32>
    %590 = arith.subf %589, %573 : vector<16x128xf32>
    %591 = math.absf %590 : vector<16x128xf32>
    %592 = arith.cmpf olt, %591, %586 : vector<16x128xf32>
    %593 = arith.select %592, %589, %585 : vector<16x128xi1>, vector<16x128xf32>
    %594 = arith.select %592, %591, %586 : vector<16x128xi1>, vector<16x128xf32>
    %595 = arith.addf %518, %571 : vector<16x128xf32>
    %cst_284 = arith.constant 1.50050712 : f32
    %596 = vector.broadcast %cst_284 : f32 to vector<16x128xf32>
    %597 = arith.mulf %596, %595 : vector<16x128xf32>
    %598 = arith.subf %597, %573 : vector<16x128xf32>
    %599 = math.absf %598 : vector<16x128xf32>
    %600 = arith.cmpf olt, %599, %594 : vector<16x128xf32>
    %601 = arith.select %600, %597, %593 : vector<16x128xi1>, vector<16x128xf32>
    %602 = arith.select %600, %599, %594 : vector<16x128xi1>, vector<16x128xf32>
    %cst_285 = arith.constant 2.25407195 : f32
    %603 = vector.broadcast %cst_285 : f32 to vector<16x128xf32>
    %604 = arith.mulf %603, %441 : vector<16x128xf32>
    %605 = arith.subf %604, %573 : vector<16x128xf32>
    %606 = math.absf %605 : vector<16x128xf32>
    %607 = arith.cmpf olt, %606, %602 : vector<16x128xf32>
    %608 = arith.select %607, %604, %601 : vector<16x128xi1>, vector<16x128xf32>
    %609 = arith.select %607, %606, %602 : vector<16x128xi1>, vector<16x128xf32>
    %cst_286 = arith.constant 2.25644946 : f32
    %610 = vector.broadcast %cst_286 : f32 to vector<16x128xf32>
    %611 = arith.mulf %610, %555 : vector<16x128xf32>
    %612 = arith.subf %611, %573 : vector<16x128xf32>
    %613 = math.absf %612 : vector<16x128xf32>
    %614 = arith.cmpf olt, %613, %609 : vector<16x128xf32>
    %615 = arith.select %614, %611, %608 : vector<16x128xi1>, vector<16x128xf32>
    %616 = arith.select %614, %613, %609 : vector<16x128xi1>, vector<16x128xf32>
    %cst_287 = arith.constant 2.25681973 : f32
    %617 = vector.broadcast %cst_287 : f32 to vector<16x128xf32>
    %618 = arith.mulf %617, %494 : vector<16x128xf32>
    %619 = arith.subf %618, %573 : vector<16x128xf32>
    %620 = math.absf %619 : vector<16x128xf32>
    %621 = arith.cmpf olt, %620, %616 : vector<16x128xf32>
    %622 = arith.select %621, %618, %615 : vector<16x128xi1>, vector<16x128xf32>
    %623 = arith.select %621, %620, %616 : vector<16x128xi1>, vector<16x128xf32>
    %cst_288 = arith.constant 2.24686861 : f32
    %624 = vector.broadcast %cst_288 : f32 to vector<16x128xf32>
    %625 = arith.mulf %624, %571 : vector<16x128xf32>
    %626 = arith.subf %625, %573 : vector<16x128xf32>
    %627 = math.absf %626 : vector<16x128xf32>
    %628 = arith.cmpf olt, %627, %623 : vector<16x128xf32>
    %629 = arith.select %628, %625, %622 : vector<16x128xi1>, vector<16x128xf32>
    %c0_289 = arith.constant 0 : index
    %c1_290 = arith.constant 1 : index
    %c0_291 = arith.constant 0 : index
    %c0_292 = arith.constant 0 : index
    %630 = vector.load %arg2[%c0_289, %c1_290, %c0_291, %c0_292] : memref<1x4x16x128xf32, #tpu.memory_space<vmem>>, vector<1x1x16x128xf32>
    %631 = vector.shape_cast %630 : vector<1x1x16x128xf32> to vector<16x128xf32>
    %632 = vector.shape_cast %629 : vector<16x128xf32> to vector<1x1x16x128xf32>
    tpu.vector_store %arg2[%c0_289, %c1_290, %c0_291, %c0_292], %632 {strides = array<i32>} : memref<1x4x16x128xf32, #tpu.memory_space<vmem>>, vector<1x1x16x128xf32>,
    %c0_293 = arith.constant 0 : index
    %c0_294 = arith.constant 0 : index
    %c0_295 = arith.constant 0 : index
    %633 = vector.load %arg3[%c0_293, %c0_294, %c0_295] : memref<4x18x128xf32, #tpu.memory_space<vmem>>, vector<1x16x128xf32>
    %634 = vector.shape_cast %633 : vector<1x16x128xf32> to vector<16x128xf32>
    %c1_296 = arith.constant 1 : index
    %c0_297 = arith.constant 0 : index
    %c0_298 = arith.constant 0 : index
    %635 = vector.load %arg3[%c1_296, %c0_297, %c0_298] : memref<4x18x128xf32, #tpu.memory_space<vmem>>, vector<1x16x128xf32>
    %636 = vector.shape_cast %635 : vector<1x16x128xf32> to vector<16x128xf32>
    %c2_299 = arith.constant 2 : index
    %c0_300 = arith.constant 0 : index
    %c0_301 = arith.constant 0 : index
    %637 = vector.load %arg3[%c2_299, %c0_300, %c0_301] : memref<4x18x128xf32, #tpu.memory_space<vmem>>, vector<1x16x128xf32>
    %638 = vector.shape_cast %637 : vector<1x16x128xf32> to vector<16x128xf32>
    %c3_302 = arith.constant 3 : index
    %c0_303 = arith.constant 0 : index
    %c0_304 = arith.constant 0 : index
    %639 = vector.load %arg3[%c3_302, %c0_303, %c0_304] : memref<4x18x128xf32, #tpu.memory_space<vmem>>, vector<1x16x128xf32>
    %640 = vector.shape_cast %639 : vector<1x16x128xf32> to vector<16x128xf32>
    %c1_i32_305 = arith.constant 1 : i32
    %641 = tpu.dynamic_rotate %634 by %c1_i32_305 dim 1 : vector<16x128xf32>, i32 -> vector<16x128xf32>
    %c1_i32_306 = arith.constant 1 : i32
    %642 = tpu.dynamic_rotate %636 by %c1_i32_306 dim 1 : vector<16x128xf32>, i32 -> vector<16x128xf32>
    %c1_i32_307 = arith.constant 1 : i32
    %643 = tpu.dynamic_rotate %638 by %c1_i32_307 dim 1 : vector<16x128xf32>, i32 -> vector<16x128xf32>
    %c1_i32_308 = arith.constant 1 : i32
    %644 = tpu.dynamic_rotate %640 by %c1_i32_308 dim 1 : vector<16x128xf32>, i32 -> vector<16x128xf32>
    %cst_309 = arith.constant 0.0277721677 : f32
    %645 = vector.broadcast %cst_309 : f32 to vector<16x128xf32>
    %646 = arith.mulf %645, %641 : vector<16x128xf32>
    %cst_310 = arith.constant 0.0285654962 : f32
    %647 = vector.broadcast %cst_310 : f32 to vector<16x128xf32>
    %648 = arith.mulf %647, %642 : vector<16x128xf32>
    %649 = arith.addf %646, %648 : vector<16x128xf32>
    %cst_311 = arith.constant 0.02673731 : f32
    %650 = vector.broadcast %cst_311 : f32 to vector<16x128xf32>
    %651 = arith.mulf %650, %643 : vector<16x128xf32>
    %652 = arith.addf %649, %651 : vector<16x128xf32>
    %cst_312 = arith.constant 0.0289203618 : f32
    %653 = vector.broadcast %cst_312 : f32 to vector<16x128xf32>
    %654 = arith.mulf %653, %644 : vector<16x128xf32>
    %655 = arith.addf %652, %654 : vector<16x128xf32>
    %cst_313 = arith.constant 0.0276301112 : f32
    %656 = vector.broadcast %cst_313 : f32 to vector<16x128xf32>
    %657 = arith.mulf %656, %634 : vector<16x128xf32>
    %cst_314 = arith.constant 0.0264341533 : f32
    %658 = vector.broadcast %cst_314 : f32 to vector<16x128xf32>
    %659 = arith.mulf %658, %636 : vector<16x128xf32>
    %660 = arith.addf %657, %659 : vector<16x128xf32>
    %cst_315 = arith.constant 0.0279010739 : f32
    %661 = vector.broadcast %cst_315 : f32 to vector<16x128xf32>
    %662 = arith.mulf %661, %638 : vector<16x128xf32>
    %663 = arith.addf %660, %662 : vector<16x128xf32>
    %cst_316 = arith.constant 0.02847334 : f32
    %664 = vector.broadcast %cst_316 : f32 to vector<16x128xf32>
    %665 = arith.mulf %664, %640 : vector<16x128xf32>
    %666 = arith.addf %663, %665 : vector<16x128xf32>
    %667 = arith.addf %655, %666 : vector<16x128xf32>
    %cst_317 = arith.constant 0.0287581384 : f32
    %668 = vector.broadcast %cst_317 : f32 to vector<16x128xf32>
    %669 = arith.mulf %668, %634 : vector<16x128xf32>
    %cst_318 = arith.constant 0.0269687623 : f32
    %670 = vector.broadcast %cst_318 : f32 to vector<16x128xf32>
    %671 = arith.mulf %670, %636 : vector<16x128xf32>
    %672 = arith.addf %669, %671 : vector<16x128xf32>
    %cst_319 = arith.constant 0.0279035568 : f32
    %673 = vector.broadcast %cst_319 : f32 to vector<16x128xf32>
    %674 = arith.mulf %673, %638 : vector<16x128xf32>
    %675 = arith.addf %672, %674 : vector<16x128xf32>
    %cst_320 = arith.constant 0.0264755301 : f32
    %676 = vector.broadcast %cst_320 : f32 to vector<16x128xf32>
    %677 = arith.mulf %676, %640 : vector<16x128xf32>
    %678 = arith.addf %675, %677 : vector<16x128xf32>
    %c127_i32_321 = arith.constant 127 : i32
    %679 = tpu.dynamic_rotate %634 by %c127_i32_321 dim 1 : vector<16x128xf32>, i32 -> vector<16x128xf32>
    %c127_i32_322 = arith.constant 127 : i32
    %680 = tpu.dynamic_rotate %636 by %c127_i32_322 dim 1 : vector<16x128xf32>, i32 -> vector<16x128xf32>
    %c127_i32_323 = arith.constant 127 : i32
    %681 = tpu.dynamic_rotate %638 by %c127_i32_323 dim 1 : vector<16x128xf32>, i32 -> vector<16x128xf32>
    %c127_i32_324 = arith.constant 127 : i32
    %682 = tpu.dynamic_rotate %640 by %c127_i32_324 dim 1 : vector<16x128xf32>, i32 -> vector<16x128xf32>
    %cst_325 = arith.constant 0.0278024636 : f32
    %683 = vector.broadcast %cst_325 : f32 to vector<16x128xf32>
    %684 = arith.mulf %683, %679 : vector<16x128xf32>
    %cst_326 = arith.constant 0.0277693179 : f32
    %685 = vector.broadcast %cst_326 : f32 to vector<16x128xf32>
    %686 = arith.mulf %685, %680 : vector<16x128xf32>
    %687 = arith.addf %684, %686 : vector<16x128xf32>
    %cst_327 = arith.constant 2.787060e-02 : f32
    %688 = vector.broadcast %cst_327 : f32 to vector<16x128xf32>
    %689 = arith.mulf %688, %681 : vector<16x128xf32>
    %690 = arith.addf %687, %689 : vector<16x128xf32>
    %cst_328 = arith.constant 0.0286100842 : f32
    %691 = vector.broadcast %cst_328 : f32 to vector<16x128xf32>
    %692 = arith.mulf %691, %682 : vector<16x128xf32>
    %693 = arith.addf %690, %692 : vector<16x128xf32>
    %694 = arith.addf %666, %693 : vector<16x128xf32>
    %cst_329 = arith.constant 0.0285655092 : f32
    %695 = vector.broadcast %cst_329 : f32 to vector<16x128xf32>
    %696 = arith.mulf %695, %679 : vector<16x128xf32>
    %cst_330 = arith.constant 0.0297215916 : f32
    %697 = vector.broadcast %cst_330 : f32 to vector<16x128xf32>
    %698 = arith.mulf %697, %680 : vector<16x128xf32>
    %699 = arith.addf %696, %698 : vector<16x128xf32>
    %cst_331 = arith.constant 0.0275483131 : f32
    %700 = vector.broadcast %cst_331 : f32 to vector<16x128xf32>
    %701 = arith.mulf %700, %681 : vector<16x128xf32>
    %702 = arith.addf %699, %701 : vector<16x128xf32>
    %cst_332 = arith.constant 0.0283245109 : f32
    %703 = vector.broadcast %cst_332 : f32 to vector<16x128xf32>
    %704 = arith.mulf %703, %682 : vector<16x128xf32>
    %705 = arith.addf %702, %704 : vector<16x128xf32>
    %706 = arith.addf %678, %705 : vector<16x128xf32>
    %c0_333 = arith.constant 0 : index
    %c1_334 = arith.constant 1 : index
    %c0_335 = arith.constant 0 : index
    %707 = vector.load %arg3[%c0_333, %c1_334, %c0_335] : memref<4x18x128xf32, #tpu.memory_space<vmem>>, vector<1x16x128xf32>
    %708 = vector.shape_cast %707 : vector<1x16x128xf32> to vector<16x128xf32>
    %c1_336 = arith.constant 1 : index
    %c1_337 = arith.constant 1 : index
    %c0_338 = arith.constant 0 : index
    %709 = vector.load %arg3[%c1_336, %c1_337, %c0_338] : memref<4x18x128xf32, #tpu.memory_space<vmem>>, vector<1x16x128xf32>
    %710 = vector.shape_cast %709 : vector<1x16x128xf32> to vector<16x128xf32>
    %c2_339 = arith.constant 2 : index
    %c1_340 = arith.constant 1 : index
    %c0_341 = arith.constant 0 : index
    %711 = vector.load %arg3[%c2_339, %c1_340, %c0_341] : memref<4x18x128xf32, #tpu.memory_space<vmem>>, vector<1x16x128xf32>
    %712 = vector.shape_cast %711 : vector<1x16x128xf32> to vector<16x128xf32>
    %c3_342 = arith.constant 3 : index
    %c1_343 = arith.constant 1 : index
    %c0_344 = arith.constant 0 : index
    %713 = vector.load %arg3[%c3_342, %c1_343, %c0_344] : memref<4x18x128xf32, #tpu.memory_space<vmem>>, vector<1x16x128xf32>
    %714 = vector.shape_cast %713 : vector<1x16x128xf32> to vector<16x128xf32>
    %c1_i32_345 = arith.constant 1 : i32
    %715 = tpu.dynamic_rotate %708 by %c1_i32_345 dim 1 : vector<16x128xf32>, i32 -> vector<16x128xf32>
    %c1_i32_346 = arith.constant 1 : i32
    %716 = tpu.dynamic_rotate %710 by %c1_i32_346 dim 1 : vector<16x128xf32>, i32 -> vector<16x128xf32>
    %c1_i32_347 = arith.constant 1 : i32
    %717 = tpu.dynamic_rotate %712 by %c1_i32_347 dim 1 : vector<16x128xf32>, i32 -> vector<16x128xf32>
    %c1_i32_348 = arith.constant 1 : i32
    %718 = tpu.dynamic_rotate %714 by %c1_i32_348 dim 1 : vector<16x128xf32>, i32 -> vector<16x128xf32>
    %cst_349 = arith.constant 0.0287581384 : f32
    %719 = vector.broadcast %cst_349 : f32 to vector<16x128xf32>
    %720 = arith.mulf %719, %715 : vector<16x128xf32>
    %cst_350 = arith.constant 0.0269687623 : f32
    %721 = vector.broadcast %cst_350 : f32 to vector<16x128xf32>
    %722 = arith.mulf %721, %716 : vector<16x128xf32>
    %723 = arith.addf %720, %722 : vector<16x128xf32>
    %cst_351 = arith.constant 0.0279035568 : f32
    %724 = vector.broadcast %cst_351 : f32 to vector<16x128xf32>
    %725 = arith.mulf %724, %717 : vector<16x128xf32>
    %726 = arith.addf %723, %725 : vector<16x128xf32>
    %cst_352 = arith.constant 0.0264755301 : f32
    %727 = vector.broadcast %cst_352 : f32 to vector<16x128xf32>
    %728 = arith.mulf %727, %718 : vector<16x128xf32>
    %729 = arith.addf %726, %728 : vector<16x128xf32>
    %730 = arith.addf %667, %729 : vector<16x128xf32>
    %cst_353 = arith.constant 0.0276301112 : f32
    %731 = vector.broadcast %cst_353 : f32 to vector<16x128xf32>
    %732 = arith.mulf %731, %715 : vector<16x128xf32>
    %cst_354 = arith.constant 0.0264341533 : f32
    %733 = vector.broadcast %cst_354 : f32 to vector<16x128xf32>
    %734 = arith.mulf %733, %716 : vector<16x128xf32>
    %735 = arith.addf %732, %734 : vector<16x128xf32>
    %cst_355 = arith.constant 0.0279010739 : f32
    %736 = vector.broadcast %cst_355 : f32 to vector<16x128xf32>
    %737 = arith.mulf %736, %717 : vector<16x128xf32>
    %738 = arith.addf %735, %737 : vector<16x128xf32>
    %cst_356 = arith.constant 0.02847334 : f32
    %739 = vector.broadcast %cst_356 : f32 to vector<16x128xf32>
    %740 = arith.mulf %739, %718 : vector<16x128xf32>
    %741 = arith.addf %738, %740 : vector<16x128xf32>
    %cst_357 = arith.constant 0.0285655092 : f32
    %742 = vector.broadcast %cst_357 : f32 to vector<16x128xf32>
    %743 = arith.mulf %742, %708 : vector<16x128xf32>
    %cst_358 = arith.constant 0.0297215916 : f32
    %744 = vector.broadcast %cst_358 : f32 to vector<16x128xf32>
    %745 = arith.mulf %744, %710 : vector<16x128xf32>
    %746 = arith.addf %743, %745 : vector<16x128xf32>
    %cst_359 = arith.constant 0.0275483131 : f32
    %747 = vector.broadcast %cst_359 : f32 to vector<16x128xf32>
    %748 = arith.mulf %747, %712 : vector<16x128xf32>
    %749 = arith.addf %746, %748 : vector<16x128xf32>
    %cst_360 = arith.constant 0.0283245109 : f32
    %750 = vector.broadcast %cst_360 : f32 to vector<16x128xf32>
    %751 = arith.mulf %750, %714 : vector<16x128xf32>
    %752 = arith.addf %749, %751 : vector<16x128xf32>
    %753 = arith.addf %730, %752 : vector<16x128xf32>
    %cst_361 = arith.constant 0.0278024636 : f32
    %754 = vector.broadcast %cst_361 : f32 to vector<16x128xf32>
    %755 = arith.mulf %754, %708 : vector<16x128xf32>
    %cst_362 = arith.constant 0.0277693179 : f32
    %756 = vector.broadcast %cst_362 : f32 to vector<16x128xf32>
    %757 = arith.mulf %756, %710 : vector<16x128xf32>
    %758 = arith.addf %755, %757 : vector<16x128xf32>
    %cst_363 = arith.constant 2.787060e-02 : f32
    %759 = vector.broadcast %cst_363 : f32 to vector<16x128xf32>
    %760 = arith.mulf %759, %712 : vector<16x128xf32>
    %761 = arith.addf %758, %760 : vector<16x128xf32>
    %cst_364 = arith.constant 0.0286100842 : f32
    %762 = vector.broadcast %cst_364 : f32 to vector<16x128xf32>
    %763 = arith.mulf %762, %714 : vector<16x128xf32>
    %764 = arith.addf %761, %763 : vector<16x128xf32>
    %765 = arith.addf %741, %764 : vector<16x128xf32>
    %cst_365 = arith.constant 0.0272027124 : f32
    %766 = vector.broadcast %cst_365 : f32 to vector<16x128xf32>
    %767 = arith.mulf %766, %708 : vector<16x128xf32>
    %cst_366 = arith.constant 0.0293080769 : f32
    %768 = vector.broadcast %cst_366 : f32 to vector<16x128xf32>
    %769 = arith.mulf %768, %710 : vector<16x128xf32>
    %770 = arith.addf %767, %769 : vector<16x128xf32>
    %cst_367 = arith.constant 0.026846515 : f32
    %771 = vector.broadcast %cst_367 : f32 to vector<16x128xf32>
    %772 = arith.mulf %771, %712 : vector<16x128xf32>
    %773 = arith.addf %770, %772 : vector<16x128xf32>
    %cst_368 = arith.constant 0.0277048778 : f32
    %774 = vector.broadcast %cst_368 : f32 to vector<16x128xf32>
    %775 = arith.mulf %774, %714 : vector<16x128xf32>
    %776 = arith.addf %773, %775 : vector<16x128xf32>
    %777 = arith.addf %706, %776 : vector<16x128xf32>
    %c127_i32_369 = arith.constant 127 : i32
    %778 = tpu.dynamic_rotate %708 by %c127_i32_369 dim 1 : vector<16x128xf32>, i32 -> vector<16x128xf32>
    %c127_i32_370 = arith.constant 127 : i32
    %779 = tpu.dynamic_rotate %710 by %c127_i32_370 dim 1 : vector<16x128xf32>, i32 -> vector<16x128xf32>
    %c127_i32_371 = arith.constant 127 : i32
    %780 = tpu.dynamic_rotate %712 by %c127_i32_371 dim 1 : vector<16x128xf32>, i32 -> vector<16x128xf32>
    %c127_i32_372 = arith.constant 127 : i32
    %781 = tpu.dynamic_rotate %714 by %c127_i32_372 dim 1 : vector<16x128xf32>, i32 -> vector<16x128xf32>
    %cst_373 = arith.constant 0.0274874661 : f32
    %782 = vector.broadcast %cst_373 : f32 to vector<16x128xf32>
    %783 = arith.mulf %782, %778 : vector<16x128xf32>
    %cst_374 = arith.constant 0.025453575 : f32
    %784 = vector.broadcast %cst_374 : f32 to vector<16x128xf32>
    %785 = arith.mulf %784, %779 : vector<16x128xf32>
    %786 = arith.addf %783, %785 : vector<16x128xf32>
    %cst_375 = arith.constant 0.028734548 : f32
    %787 = vector.broadcast %cst_375 : f32 to vector<16x128xf32>
    %788 = arith.mulf %787, %780 : vector<16x128xf32>
    %789 = arith.addf %786, %788 : vector<16x128xf32>
    %cst_376 = arith.constant 0.0264851972 : f32
    %790 = vector.broadcast %cst_376 : f32 to vector<16x128xf32>
    %791 = arith.mulf %790, %781 : vector<16x128xf32>
    %792 = arith.addf %789, %791 : vector<16x128xf32>
    %793 = arith.addf %693, %792 : vector<16x128xf32>
    %794 = arith.addf %752, %792 : vector<16x128xf32>
    %cst_377 = arith.constant 0.0287753213 : f32
    %795 = vector.broadcast %cst_377 : f32 to vector<16x128xf32>
    %796 = arith.mulf %795, %778 : vector<16x128xf32>
    %cst_378 = arith.constant 0.026787309 : f32
    %797 = vector.broadcast %cst_378 : f32 to vector<16x128xf32>
    %798 = arith.mulf %797, %779 : vector<16x128xf32>
    %799 = arith.addf %796, %798 : vector<16x128xf32>
    %cst_379 = arith.constant 0.0280656144 : f32
    %800 = vector.broadcast %cst_379 : f32 to vector<16x128xf32>
    %801 = arith.mulf %800, %780 : vector<16x128xf32>
    %802 = arith.addf %799, %801 : vector<16x128xf32>
    %cst_380 = arith.constant 0.0286385845 : f32
    %803 = vector.broadcast %cst_380 : f32 to vector<16x128xf32>
    %804 = arith.mulf %803, %781 : vector<16x128xf32>
    %805 = arith.addf %802, %804 : vector<16x128xf32>
    %806 = arith.addf %777, %805 : vector<16x128xf32>
    %c0_381 = arith.constant 0 : index
    %c2_382 = arith.constant 2 : index
    %c0_383 = arith.constant 0 : index
    %807 = vector.load %arg3[%c0_381, %c2_382, %c0_383] : memref<4x18x128xf32, #tpu.memory_space<vmem>>, vector<1x16x128xf32>
    %808 = vector.shape_cast %807 : vector<1x16x128xf32> to vector<16x128xf32>
    %c1_384 = arith.constant 1 : index
    %c2_385 = arith.constant 2 : index
    %c0_386 = arith.constant 0 : index
    %809 = vector.load %arg3[%c1_384, %c2_385, %c0_386] : memref<4x18x128xf32, #tpu.memory_space<vmem>>, vector<1x16x128xf32>
    %810 = vector.shape_cast %809 : vector<1x16x128xf32> to vector<16x128xf32>
    %c2_387 = arith.constant 2 : index
    %c2_388 = arith.constant 2 : index
    %c0_389 = arith.constant 0 : index
    %811 = vector.load %arg3[%c2_387, %c2_388, %c0_389] : memref<4x18x128xf32, #tpu.memory_space<vmem>>, vector<1x16x128xf32>
    %812 = vector.shape_cast %811 : vector<1x16x128xf32> to vector<16x128xf32>
    %c3_390 = arith.constant 3 : index
    %c2_391 = arith.constant 2 : index
    %c0_392 = arith.constant 0 : index
    %813 = vector.load %arg3[%c3_390, %c2_391, %c0_392] : memref<4x18x128xf32, #tpu.memory_space<vmem>>, vector<1x16x128xf32>
    %814 = vector.shape_cast %813 : vector<1x16x128xf32> to vector<16x128xf32>
    %c1_i32_393 = arith.constant 1 : i32
    %815 = tpu.dynamic_rotate %808 by %c1_i32_393 dim 1 : vector<16x128xf32>, i32 -> vector<16x128xf32>
    %c1_i32_394 = arith.constant 1 : i32
    %816 = tpu.dynamic_rotate %810 by %c1_i32_394 dim 1 : vector<16x128xf32>, i32 -> vector<16x128xf32>
    %c1_i32_395 = arith.constant 1 : i32
    %817 = tpu.dynamic_rotate %812 by %c1_i32_395 dim 1 : vector<16x128xf32>, i32 -> vector<16x128xf32>
    %c1_i32_396 = arith.constant 1 : i32
    %818 = tpu.dynamic_rotate %814 by %c1_i32_396 dim 1 : vector<16x128xf32>, i32 -> vector<16x128xf32>
    %cst_397 = arith.constant 0.0272027124 : f32
    %819 = vector.broadcast %cst_397 : f32 to vector<16x128xf32>
    %820 = arith.mulf %819, %815 : vector<16x128xf32>
    %cst_398 = arith.constant 0.0293080769 : f32
    %821 = vector.broadcast %cst_398 : f32 to vector<16x128xf32>
    %822 = arith.mulf %821, %816 : vector<16x128xf32>
    %823 = arith.addf %820, %822 : vector<16x128xf32>
    %cst_399 = arith.constant 0.026846515 : f32
    %824 = vector.broadcast %cst_399 : f32 to vector<16x128xf32>
    %825 = arith.mulf %824, %817 : vector<16x128xf32>
    %826 = arith.addf %823, %825 : vector<16x128xf32>
    %cst_400 = arith.constant 0.0277048778 : f32
    %827 = vector.broadcast %cst_400 : f32 to vector<16x128xf32>
    %828 = arith.mulf %827, %818 : vector<16x128xf32>
    %829 = arith.addf %826, %828 : vector<16x128xf32>
    %830 = arith.addf %729, %829 : vector<16x128xf32>
    %cst_401 = arith.constant 0.0285655092 : f32
    %831 = vector.broadcast %cst_401 : f32 to vector<16x128xf32>
    %832 = arith.mulf %831, %815 : vector<16x128xf32>
    %cst_402 = arith.constant 0.0297215916 : f32
    %833 = vector.broadcast %cst_402 : f32 to vector<16x128xf32>
    %834 = arith.mulf %833, %816 : vector<16x128xf32>
    %835 = arith.addf %832, %834 : vector<16x128xf32>
    %cst_403 = arith.constant 0.0275483131 : f32
    %836 = vector.broadcast %cst_403 : f32 to vector<16x128xf32>
    %837 = arith.mulf %836, %817 : vector<16x128xf32>
    %838 = arith.addf %835, %837 : vector<16x128xf32>
    %cst_404 = arith.constant 0.0283245109 : f32
    %839 = vector.broadcast %cst_404 : f32 to vector<16x128xf32>
    %840 = arith.mulf %839, %818 : vector<16x128xf32>
    %841 = arith.addf %838, %840 : vector<16x128xf32>
    %842 = arith.addf %765, %841 : vector<16x128xf32>
    %cst_405 = arith.constant 0.0287753213 : f32
    %843 = vector.broadcast %cst_405 : f32 to vector<16x128xf32>
    %844 = arith.mulf %843, %808 : vector<16x128xf32>
    %cst_406 = arith.constant 0.026787309 : f32
    %845 = vector.broadcast %cst_406 : f32 to vector<16x128xf32>
    %846 = arith.mulf %845, %810 : vector<16x128xf32>
    %847 = arith.addf %844, %846 : vector<16x128xf32>
    %cst_407 = arith.constant 0.0280656144 : f32
    %848 = vector.broadcast %cst_407 : f32 to vector<16x128xf32>
    %849 = arith.mulf %848, %812 : vector<16x128xf32>
    %850 = arith.addf %847, %849 : vector<16x128xf32>
    %cst_408 = arith.constant 0.0286385845 : f32
    %851 = vector.broadcast %cst_408 : f32 to vector<16x128xf32>
    %852 = arith.mulf %851, %814 : vector<16x128xf32>
    %853 = arith.addf %850, %852 : vector<16x128xf32>
    %854 = arith.addf %829, %853 : vector<16x128xf32>
    %855 = arith.addf %794, %853 : vector<16x128xf32>
    %cst_409 = arith.constant 0.0274874661 : f32
    %856 = vector.broadcast %cst_409 : f32 to vector<16x128xf32>
    %857 = arith.mulf %856, %808 : vector<16x128xf32>
    %cst_410 = arith.constant 0.025453575 : f32
    %858 = vector.broadcast %cst_410 : f32 to vector<16x128xf32>
    %859 = arith.mulf %858, %810 : vector<16x128xf32>
    %860 = arith.addf %857, %859 : vector<16x128xf32>
    %cst_411 = arith.constant 0.028734548 : f32
    %861 = vector.broadcast %cst_411 : f32 to vector<16x128xf32>
    %862 = arith.mulf %861, %812 : vector<16x128xf32>
    %863 = arith.addf %860, %862 : vector<16x128xf32>
    %cst_412 = arith.constant 0.0264851972 : f32
    %864 = vector.broadcast %cst_412 : f32 to vector<16x128xf32>
    %865 = arith.mulf %864, %814 : vector<16x128xf32>
    %866 = arith.addf %863, %865 : vector<16x128xf32>
    %867 = arith.addf %842, %866 : vector<16x128xf32>
    %c127_i32_413 = arith.constant 127 : i32
    %868 = tpu.dynamic_rotate %808 by %c127_i32_413 dim 1 : vector<16x128xf32>, i32 -> vector<16x128xf32>
    %c127_i32_414 = arith.constant 127 : i32
    %869 = tpu.dynamic_rotate %810 by %c127_i32_414 dim 1 : vector<16x128xf32>, i32 -> vector<16x128xf32>
    %c127_i32_415 = arith.constant 127 : i32
    %870 = tpu.dynamic_rotate %812 by %c127_i32_415 dim 1 : vector<16x128xf32>, i32 -> vector<16x128xf32>
    %c127_i32_416 = arith.constant 127 : i32
    %871 = tpu.dynamic_rotate %814 by %c127_i32_416 dim 1 : vector<16x128xf32>, i32 -> vector<16x128xf32>
    %cst_417 = arith.constant 0.025511317 : f32
    %872 = vector.broadcast %cst_417 : f32 to vector<16x128xf32>
    %873 = arith.mulf %872, %868 : vector<16x128xf32>
    %cst_418 = arith.constant 0.0282918606 : f32
    %874 = vector.broadcast %cst_418 : f32 to vector<16x128xf32>
    %875 = arith.mulf %874, %869 : vector<16x128xf32>
    %876 = arith.addf %873, %875 : vector<16x128xf32>
    %cst_419 = arith.constant 0.0259692613 : f32
    %877 = vector.broadcast %cst_419 : f32 to vector<16x128xf32>
    %878 = arith.mulf %877, %870 : vector<16x128xf32>
    %879 = arith.addf %876, %878 : vector<16x128xf32>
    %cst_420 = arith.constant 0.0296107326 : f32
    %880 = vector.broadcast %cst_420 : f32 to vector<16x128xf32>
    %881 = arith.mulf %880, %871 : vector<16x128xf32>
    %882 = arith.addf %879, %881 : vector<16x128xf32>
    %883 = arith.addf %855, %882 : vector<16x128xf32>
    %c2_421 = arith.constant 2 : index
    %c1_422 = arith.constant 1 : index
    %c0_423 = arith.constant 0 : index
    %884 = vector.load %arg3[%c2_421, %c1_422, %c0_423] : memref<4x18x128xf32, #tpu.memory_space<vmem>>, vector<1x16x128xf32>
    %885 = vector.shape_cast %884 : vector<1x16x128xf32> to vector<16x128xf32>
    %886 = arith.addf %854, %753 : vector<16x128xf32>
    %cst_424 = arith.constant 1.50293946 : f32
    %887 = vector.broadcast %cst_424 : f32 to vector<16x128xf32>
    %888 = arith.mulf %887, %886 : vector<16x128xf32>
    %889 = arith.subf %888, %885 : vector<16x128xf32>
    %890 = math.absf %889 : vector<16x128xf32>
    %891 = arith.addf %694, %883 : vector<16x128xf32>
    %cst_425 = arith.constant 1.50234187 : f32
    %892 = vector.broadcast %cst_425 : f32 to vector<16x128xf32>
    %893 = arith.mulf %892, %891 : vector<16x128xf32>
    %894 = arith.subf %893, %885 : vector<16x128xf32>
    %895 = math.absf %894 : vector<16x128xf32>
    %896 = arith.cmpf olt, %895, %890 : vector<16x128xf32>
    %897 = arith.select %896, %893, %888 : vector<16x128xi1>, vector<16x128xf32>
    %898 = arith.select %896, %895, %890 : vector<16x128xi1>, vector<16x128xf32>
    %899 = arith.addf %793, %753 : vector<16x128xf32>
    %cst_426 = arith.constant 1.49917042 : f32
    %900 = vector.broadcast %cst_426 : f32 to vector<16x128xf32>
    %901 = arith.mulf %900, %899 : vector<16x128xf32>
    %902 = arith.subf %901, %885 : vector<16x128xf32>
    %903 = math.absf %902 : vector<16x128xf32>
    %904 = arith.cmpf olt, %903, %898 : vector<16x128xf32>
    %905 = arith.select %904, %901, %897 : vector<16x128xi1>, vector<16x128xf32>
    %906 = arith.select %904, %903, %898 : vector<16x128xi1>, vector<16x128xf32>
    %907 = arith.addf %830, %883 : vector<16x128xf32>
    %cst_427 = arith.constant 1.50050712 : f32
    %908 = vector.broadcast %cst_427 : f32 to vector<16x128xf32>
    %909 = arith.mulf %908, %907 : vector<16x128xf32>
    %910 = arith.subf %909, %885 : vector<16x128xf32>
    %911 = math.absf %910 : vector<16x128xf32>
    %912 = arith.cmpf olt, %911, %906 : vector<16x128xf32>
    %913 = arith.select %912, %909, %905 : vector<16x128xi1>, vector<16x128xf32>
    %914 = arith.select %912, %911, %906 : vector<16x128xi1>, vector<16x128xf32>
    %cst_428 = arith.constant 2.25407195 : f32
    %915 = vector.broadcast %cst_428 : f32 to vector<16x128xf32>
    %916 = arith.mulf %915, %753 : vector<16x128xf32>
    %917 = arith.subf %916, %885 : vector<16x128xf32>
    %918 = math.absf %917 : vector<16x128xf32>
    %919 = arith.cmpf olt, %918, %914 : vector<16x128xf32>
    %920 = arith.select %919, %916, %913 : vector<16x128xi1>, vector<16x128xf32>
    %921 = arith.select %919, %918, %914 : vector<16x128xi1>, vector<16x128xf32>
    %cst_429 = arith.constant 2.25644946 : f32
    %922 = vector.broadcast %cst_429 : f32 to vector<16x128xf32>
    %923 = arith.mulf %922, %867 : vector<16x128xf32>
    %924 = arith.subf %923, %885 : vector<16x128xf32>
    %925 = math.absf %924 : vector<16x128xf32>
    %926 = arith.cmpf olt, %925, %921 : vector<16x128xf32>
    %927 = arith.select %926, %923, %920 : vector<16x128xi1>, vector<16x128xf32>
    %928 = arith.select %926, %925, %921 : vector<16x128xi1>, vector<16x128xf32>
    %cst_430 = arith.constant 2.25681973 : f32
    %929 = vector.broadcast %cst_430 : f32 to vector<16x128xf32>
    %930 = arith.mulf %929, %806 : vector<16x128xf32>
    %931 = arith.subf %930, %885 : vector<16x128xf32>
    %932 = math.absf %931 : vector<16x128xf32>
    %933 = arith.cmpf olt, %932, %928 : vector<16x128xf32>
    %934 = arith.select %933, %930, %927 : vector<16x128xi1>, vector<16x128xf32>
    %935 = arith.select %933, %932, %928 : vector<16x128xi1>, vector<16x128xf32>
    %cst_431 = arith.constant 2.24686861 : f32
    %936 = vector.broadcast %cst_431 : f32 to vector<16x128xf32>
    %937 = arith.mulf %936, %883 : vector<16x128xf32>
    %938 = arith.subf %937, %885 : vector<16x128xf32>
    %939 = math.absf %938 : vector<16x128xf32>
    %940 = arith.cmpf olt, %939, %935 : vector<16x128xf32>
    %941 = arith.select %940, %937, %934 : vector<16x128xi1>, vector<16x128xf32>
    %c0_432 = arith.constant 0 : index
    %c2_433 = arith.constant 2 : index
    %c0_434 = arith.constant 0 : index
    %c0_435 = arith.constant 0 : index
    %942 = vector.load %arg2[%c0_432, %c2_433, %c0_434, %c0_435] : memref<1x4x16x128xf32, #tpu.memory_space<vmem>>, vector<1x1x16x128xf32>
    %943 = vector.shape_cast %942 : vector<1x1x16x128xf32> to vector<16x128xf32>
    %944 = vector.shape_cast %941 : vector<16x128xf32> to vector<1x1x16x128xf32>
    tpu.vector_store %arg2[%c0_432, %c2_433, %c0_434, %c0_435], %944 {strides = array<i32>} : memref<1x4x16x128xf32, #tpu.memory_space<vmem>>, vector<1x1x16x128xf32>,
    %c0_436 = arith.constant 0 : index
    %c0_437 = arith.constant 0 : index
    %c0_438 = arith.constant 0 : index
    %945 = vector.load %arg3[%c0_436, %c0_437, %c0_438] : memref<4x18x128xf32, #tpu.memory_space<vmem>>, vector<1x16x128xf32>
    %946 = vector.shape_cast %945 : vector<1x16x128xf32> to vector<16x128xf32>
    %c1_439 = arith.constant 1 : index
    %c0_440 = arith.constant 0 : index
    %c0_441 = arith.constant 0 : index
    %947 = vector.load %arg3[%c1_439, %c0_440, %c0_441] : memref<4x18x128xf32, #tpu.memory_space<vmem>>, vector<1x16x128xf32>
    %948 = vector.shape_cast %947 : vector<1x16x128xf32> to vector<16x128xf32>
    %c2_442 = arith.constant 2 : index
    %c0_443 = arith.constant 0 : index
    %c0_444 = arith.constant 0 : index
    %949 = vector.load %arg3[%c2_442, %c0_443, %c0_444] : memref<4x18x128xf32, #tpu.memory_space<vmem>>, vector<1x16x128xf32>
    %950 = vector.shape_cast %949 : vector<1x16x128xf32> to vector<16x128xf32>
    %c3_445 = arith.constant 3 : index
    %c0_446 = arith.constant 0 : index
    %c0_447 = arith.constant 0 : index
    %951 = vector.load %arg3[%c3_445, %c0_446, %c0_447] : memref<4x18x128xf32, #tpu.memory_space<vmem>>, vector<1x16x128xf32>
    %952 = vector.shape_cast %951 : vector<1x16x128xf32> to vector<16x128xf32>
    %c1_i32_448 = arith.constant 1 : i32
    %953 = tpu.dynamic_rotate %946 by %c1_i32_448 dim 1 : vector<16x128xf32>, i32 -> vector<16x128xf32>
    %c1_i32_449 = arith.constant 1 : i32
    %954 = tpu.dynamic_rotate %948 by %c1_i32_449 dim 1 : vector<16x128xf32>, i32 -> vector<16x128xf32>
    %c1_i32_450 = arith.constant 1 : i32
    %955 = tpu.dynamic_rotate %950 by %c1_i32_450 dim 1 : vector<16x128xf32>, i32 -> vector<16x128xf32>
    %c1_i32_451 = arith.constant 1 : i32
    %956 = tpu.dynamic_rotate %952 by %c1_i32_451 dim 1 : vector<16x128xf32>, i32 -> vector<16x128xf32>
    %cst_452 = arith.constant 0.0286605358 : f32
    %957 = vector.broadcast %cst_452 : f32 to vector<16x128xf32>
    %958 = arith.mulf %957, %953 : vector<16x128xf32>
    %cst_453 = arith.constant 0.0298382509 : f32
    %959 = vector.broadcast %cst_453 : f32 to vector<16x128xf32>
    %960 = arith.mulf %959, %954 : vector<16x128xf32>
    %961 = arith.addf %958, %960 : vector<16x128xf32>
    %cst_454 = arith.constant 0.0287894513 : f32
    %962 = vector.broadcast %cst_454 : f32 to vector<16x128xf32>
    %963 = arith.mulf %962, %955 : vector<16x128xf32>
    %964 = arith.addf %961, %963 : vector<16x128xf32>
    %cst_455 = arith.constant 0.029750606 : f32
    %965 = vector.broadcast %cst_455 : f32 to vector<16x128xf32>
    %966 = arith.mulf %965, %956 : vector<16x128xf32>
    %967 = arith.addf %964, %966 : vector<16x128xf32>
    %cst_456 = arith.constant 0.0261428338 : f32
    %968 = vector.broadcast %cst_456 : f32 to vector<16x128xf32>
    %969 = arith.mulf %968, %946 : vector<16x128xf32>
    %cst_457 = arith.constant 0.0273206905 : f32
    %970 = vector.broadcast %cst_457 : f32 to vector<16x128xf32>
    %971 = arith.mulf %970, %948 : vector<16x128xf32>
    %972 = arith.addf %969, %971 : vector<16x128xf32>
    %cst_458 = arith.constant 0.0279413834 : f32
    %973 = vector.broadcast %cst_458 : f32 to vector<16x128xf32>
    %974 = arith.mulf %973, %950 : vector<16x128xf32>
    %975 = arith.addf %972, %974 : vector<16x128xf32>
    %cst_459 = arith.constant 0.025739165 : f32
    %976 = vector.broadcast %cst_459 : f32 to vector<16x128xf32>
    %977 = arith.mulf %976, %952 : vector<16x128xf32>
    %978 = arith.addf %975, %977 : vector<16x128xf32>
    %979 = arith.addf %967, %978 : vector<16x128xf32>
    %cst_460 = arith.constant 0.0284087956 : f32
    %980 = vector.broadcast %cst_460 : f32 to vector<16x128xf32>
    %981 = arith.mulf %980, %946 : vector<16x128xf32>
    %cst_461 = arith.constant 0.0270011965 : f32
    %982 = vector.broadcast %cst_461 : f32 to vector<16x128xf32>
    %983 = arith.mulf %982, %948 : vector<16x128xf32>
    %984 = arith.addf %981, %983 : vector<16x128xf32>
    %cst_462 = arith.constant 0.0284739304 : f32
    %985 = vector.broadcast %cst_462 : f32 to vector<16x128xf32>
    %986 = arith.mulf %985, %950 : vector<16x128xf32>
    %987 = arith.addf %984, %986 : vector<16x128xf32>
    %cst_463 = arith.constant 0.0275107399 : f32
    %988 = vector.broadcast %cst_463 : f32 to vector<16x128xf32>
    %989 = arith.mulf %988, %952 : vector<16x128xf32>
    %990 = arith.addf %987, %989 : vector<16x128xf32>
    %c127_i32_464 = arith.constant 127 : i32
    %991 = tpu.dynamic_rotate %946 by %c127_i32_464 dim 1 : vector<16x128xf32>, i32 -> vector<16x128xf32>
    %c127_i32_465 = arith.constant 127 : i32
    %992 = tpu.dynamic_rotate %948 by %c127_i32_465 dim 1 : vector<16x128xf32>, i32 -> vector<16x128xf32>
    %c127_i32_466 = arith.constant 127 : i32
    %993 = tpu.dynamic_rotate %950 by %c127_i32_466 dim 1 : vector<16x128xf32>, i32 -> vector<16x128xf32>
    %c127_i32_467 = arith.constant 127 : i32
    %994 = tpu.dynamic_rotate %952 by %c127_i32_467 dim 1 : vector<16x128xf32>, i32 -> vector<16x128xf32>
    %cst_468 = arith.constant 0.0248804316 : f32
    %995 = vector.broadcast %cst_468 : f32 to vector<16x128xf32>
    %996 = arith.mulf %995, %991 : vector<16x128xf32>
    %cst_469 = arith.constant 0.0260511562 : f32
    %997 = vector.broadcast %cst_469 : f32 to vector<16x128xf32>
    %998 = arith.mulf %997, %992 : vector<16x128xf32>
    %999 = arith.addf %996, %998 : vector<16x128xf32>
    %cst_470 = arith.constant 0.0275909826 : f32
    %1000 = vector.broadcast %cst_470 : f32 to vector<16x128xf32>
    %1001 = arith.mulf %1000, %993 : vector<16x128xf32>
    %1002 = arith.addf %999, %1001 : vector<16x128xf32>
    %cst_471 = arith.constant 0.0284779761 : f32
    %1003 = vector.broadcast %cst_471 : f32 to vector<16x128xf32>
    %1004 = arith.mulf %1003, %994 : vector<16x128xf32>
    %1005 = arith.addf %1002, %1004 : vector<16x128xf32>
    %1006 = arith.addf %978, %1005 : vector<16x128xf32>
    %cst_472 = arith.constant 0.0264249444 : f32
    %1007 = vector.broadcast %cst_472 : f32 to vector<16x128xf32>
    %1008 = arith.mulf %1007, %991 : vector<16x128xf32>
    %cst_473 = arith.constant 0.0276375916 : f32
    %1009 = vector.broadcast %cst_473 : f32 to vector<16x128xf32>
    %1010 = arith.mulf %1009, %992 : vector<16x128xf32>
    %1011 = arith.addf %1008, %1010 : vector<16x128xf32>
    %cst_474 = arith.constant 0.0266822949 : f32
    %1012 = vector.broadcast %cst_474 : f32 to vector<16x128xf32>
    %1013 = arith.mulf %1012, %993 : vector<16x128xf32>
    %1014 = arith.addf %1011, %1013 : vector<16x128xf32>
    %cst_475 = arith.constant 0.0287336018 : f32
    %1015 = vector.broadcast %cst_475 : f32 to vector<16x128xf32>
    %1016 = arith.mulf %1015, %994 : vector<16x128xf32>
    %1017 = arith.addf %1014, %1016 : vector<16x128xf32>
    %1018 = arith.addf %990, %1017 : vector<16x128xf32>
    %c0_476 = arith.constant 0 : index
    %c1_477 = arith.constant 1 : index
    %c0_478 = arith.constant 0 : index
    %1019 = vector.load %arg3[%c0_476, %c1_477, %c0_478] : memref<4x18x128xf32, #tpu.memory_space<vmem>>, vector<1x16x128xf32>
    %1020 = vector.shape_cast %1019 : vector<1x16x128xf32> to vector<16x128xf32>
    %c1_479 = arith.constant 1 : index
    %c1_480 = arith.constant 1 : index
    %c0_481 = arith.constant 0 : index
    %1021 = vector.load %arg3[%c1_479, %c1_480, %c0_481] : memref<4x18x128xf32, #tpu.memory_space<vmem>>, vector<1x16x128xf32>
    %1022 = vector.shape_cast %1021 : vector<1x16x128xf32> to vector<16x128xf32>
    %c2_482 = arith.constant 2 : index
    %c1_483 = arith.constant 1 : index
    %c0_484 = arith.constant 0 : index
    %1023 = vector.load %arg3[%c2_482, %c1_483, %c0_484] : memref<4x18x128xf32, #tpu.memory_space<vmem>>, vector<1x16x128xf32>
    %1024 = vector.shape_cast %1023 : vector<1x16x128xf32> to vector<16x128xf32>
    %c3_485 = arith.constant 3 : index
    %c1_486 = arith.constant 1 : index
    %c0_487 = arith.constant 0 : index
    %1025 = vector.load %arg3[%c3_485, %c1_486, %c0_487] : memref<4x18x128xf32, #tpu.memory_space<vmem>>, vector<1x16x128xf32>
    %1026 = vector.shape_cast %1025 : vector<1x16x128xf32> to vector<16x128xf32>
    %c1_i32_488 = arith.constant 1 : i32
    %1027 = tpu.dynamic_rotate %1020 by %c1_i32_488 dim 1 : vector<16x128xf32>, i32 -> vector<16x128xf32>
    %c1_i32_489 = arith.constant 1 : i32
    %1028 = tpu.dynamic_rotate %1022 by %c1_i32_489 dim 1 : vector<16x128xf32>, i32 -> vector<16x128xf32>
    %c1_i32_490 = arith.constant 1 : i32
    %1029 = tpu.dynamic_rotate %1024 by %c1_i32_490 dim 1 : vector<16x128xf32>, i32 -> vector<16x128xf32>
    %c1_i32_491 = arith.constant 1 : i32
    %1030 = tpu.dynamic_rotate %1026 by %c1_i32_491 dim 1 : vector<16x128xf32>, i32 -> vector<16x128xf32>
    %cst_492 = arith.constant 0.0284087956 : f32
    %1031 = vector.broadcast %cst_492 : f32 to vector<16x128xf32>
    %1032 = arith.mulf %1031, %1027 : vector<16x128xf32>
    %cst_493 = arith.constant 0.0270011965 : f32
    %1033 = vector.broadcast %cst_493 : f32 to vector<16x128xf32>
    %1034 = arith.mulf %1033, %1028 : vector<16x128xf32>
    %1035 = arith.addf %1032, %1034 : vector<16x128xf32>
    %cst_494 = arith.constant 0.0284739304 : f32
    %1036 = vector.broadcast %cst_494 : f32 to vector<16x128xf32>
    %1037 = arith.mulf %1036, %1029 : vector<16x128xf32>
    %1038 = arith.addf %1035, %1037 : vector<16x128xf32>
    %cst_495 = arith.constant 0.0275107399 : f32
    %1039 = vector.broadcast %cst_495 : f32 to vector<16x128xf32>
    %1040 = arith.mulf %1039, %1030 : vector<16x128xf32>
    %1041 = arith.addf %1038, %1040 : vector<16x128xf32>
    %1042 = arith.addf %979, %1041 : vector<16x128xf32>
    %cst_496 = arith.constant 0.0261428338 : f32
    %1043 = vector.broadcast %cst_496 : f32 to vector<16x128xf32>
    %1044 = arith.mulf %1043, %1027 : vector<16x128xf32>
    %cst_497 = arith.constant 0.0273206905 : f32
    %1045 = vector.broadcast %cst_497 : f32 to vector<16x128xf32>
    %1046 = arith.mulf %1045, %1028 : vector<16x128xf32>
    %1047 = arith.addf %1044, %1046 : vector<16x128xf32>
    %cst_498 = arith.constant 0.0279413834 : f32
    %1048 = vector.broadcast %cst_498 : f32 to vector<16x128xf32>
    %1049 = arith.mulf %1048, %1029 : vector<16x128xf32>
    %1050 = arith.addf %1047, %1049 : vector<16x128xf32>
    %cst_499 = arith.constant 0.025739165 : f32
    %1051 = vector.broadcast %cst_499 : f32 to vector<16x128xf32>
    %1052 = arith.mulf %1051, %1030 : vector<16x128xf32>
    %1053 = arith.addf %1050, %1052 : vector<16x128xf32>
    %cst_500 = arith.constant 0.0264249444 : f32
    %1054 = vector.broadcast %cst_500 : f32 to vector<16x128xf32>
    %1055 = arith.mulf %1054, %1020 : vector<16x128xf32>
    %cst_501 = arith.constant 0.0276375916 : f32
    %1056 = vector.broadcast %cst_501 : f32 to vector<16x128xf32>
    %1057 = arith.mulf %1056, %1022 : vector<16x128xf32>
    %1058 = arith.addf %1055, %1057 : vector<16x128xf32>
    %cst_502 = arith.constant 0.0266822949 : f32
    %1059 = vector.broadcast %cst_502 : f32 to vector<16x128xf32>
    %1060 = arith.mulf %1059, %1024 : vector<16x128xf32>
    %1061 = arith.addf %1058, %1060 : vector<16x128xf32>
    %cst_503 = arith.constant 0.0287336018 : f32
    %1062 = vector.broadcast %cst_503 : f32 to vector<16x128xf32>
    %1063 = arith.mulf %1062, %1026 : vector<16x128xf32>
    %1064 = arith.addf %1061, %1063 : vector<16x128xf32>
    %1065 = arith.addf %1042, %1064 : vector<16x128xf32>
    %cst_504 = arith.constant 0.0248804316 : f32
    %1066 = vector.broadcast %cst_504 : f32 to vector<16x128xf32>
    %1067 = arith.mulf %1066, %1020 : vector<16x128xf32>
    %cst_505 = arith.constant 0.0260511562 : f32
    %1068 = vector.broadcast %cst_505 : f32 to vector<16x128xf32>
    %1069 = arith.mulf %1068, %1022 : vector<16x128xf32>
    %1070 = arith.addf %1067, %1069 : vector<16x128xf32>
    %cst_506 = arith.constant 0.0275909826 : f32
    %1071 = vector.broadcast %cst_506 : f32 to vector<16x128xf32>
    %1072 = arith.mulf %1071, %1024 : vector<16x128xf32>
    %1073 = arith.addf %1070, %1072 : vector<16x128xf32>
    %cst_507 = arith.constant 0.0284779761 : f32
    %1074 = vector.broadcast %cst_507 : f32 to vector<16x128xf32>
    %1075 = arith.mulf %1074, %1026 : vector<16x128xf32>
    %1076 = arith.addf %1073, %1075 : vector<16x128xf32>
    %1077 = arith.addf %1053, %1076 : vector<16x128xf32>
    %cst_508 = arith.constant 0.0269297976 : f32
    %1078 = vector.broadcast %cst_508 : f32 to vector<16x128xf32>
    %1079 = arith.mulf %1078, %1020 : vector<16x128xf32>
    %cst_509 = arith.constant 0.0272659361 : f32
    %1080 = vector.broadcast %cst_509 : f32 to vector<16x128xf32>
    %1081 = arith.mulf %1080, %1022 : vector<16x128xf32>
    %1082 = arith.addf %1079, %1081 : vector<16x128xf32>
    %cst_510 = arith.constant 0.0252895206 : f32
    %1083 = vector.broadcast %cst_510 : f32 to vector<16x128xf32>
    %1084 = arith.mulf %1083, %1024 : vector<16x128xf32>
    %1085 = arith.addf %1082, %1084 : vector<16x128xf32>
    %cst_511 = arith.constant 0.0288627706 : f32
    %1086 = vector.broadcast %cst_511 : f32 to vector<16x128xf32>
    %1087 = arith.mulf %1086, %1026 : vector<16x128xf32>
    %1088 = arith.addf %1085, %1087 : vector<16x128xf32>
    %1089 = arith.addf %1018, %1088 : vector<16x128xf32>
    %c127_i32_512 = arith.constant 127 : i32
    %1090 = tpu.dynamic_rotate %1020 by %c127_i32_512 dim 1 : vector<16x128xf32>, i32 -> vector<16x128xf32>
    %c127_i32_513 = arith.constant 127 : i32
    %1091 = tpu.dynamic_rotate %1022 by %c127_i32_513 dim 1 : vector<16x128xf32>, i32 -> vector<16x128xf32>
    %c127_i32_514 = arith.constant 127 : i32
    %1092 = tpu.dynamic_rotate %1024 by %c127_i32_514 dim 1 : vector<16x128xf32>, i32 -> vector<16x128xf32>
    %c127_i32_515 = arith.constant 127 : i32
    %1093 = tpu.dynamic_rotate %1026 by %c127_i32_515 dim 1 : vector<16x128xf32>, i32 -> vector<16x128xf32>
    %cst_516 = arith.constant 0.0277854539 : f32
    %1094 = vector.broadcast %cst_516 : f32 to vector<16x128xf32>
    %1095 = arith.mulf %1094, %1090 : vector<16x128xf32>
    %cst_517 = arith.constant 0.029374145 : f32
    %1096 = vector.broadcast %cst_517 : f32 to vector<16x128xf32>
    %1097 = arith.mulf %1096, %1091 : vector<16x128xf32>
    %1098 = arith.addf %1095, %1097 : vector<16x128xf32>
    %cst_518 = arith.constant 0.0296976771 : f32
    %1099 = vector.broadcast %cst_518 : f32 to vector<16x128xf32>
    %1100 = arith.mulf %1099, %1092 : vector<16x128xf32>
    %1101 = arith.addf %1098, %1100 : vector<16x128xf32>
    %cst_519 = arith.constant 0.0280450974 : f32
    %1102 = vector.broadcast %cst_519 : f32 to vector<16x128xf32>
    %1103 = arith.mulf %1102, %1093 : vector<16x128xf32>
    %1104 = arith.addf %1101, %1103 : vector<16x128xf32>
    %1105 = arith.addf %1005, %1104 : vector<16x128xf32>
    %1106 = arith.addf %1064, %1104 : vector<16x128xf32>
    %cst_520 = arith.constant 0.0275279917 : f32
    %1107 = vector.broadcast %cst_520 : f32 to vector<16x128xf32>
    %1108 = arith.mulf %1107, %1090 : vector<16x128xf32>
    %cst_521 = arith.constant 0.0270726755 : f32
    %1109 = vector.broadcast %cst_521 : f32 to vector<16x128xf32>
    %1110 = arith.mulf %1109, %1091 : vector<16x128xf32>
    %1111 = arith.addf %1108, %1110 : vector<16x128xf32>
    %cst_522 = arith.constant 0.0283896886 : f32
    %1112 = vector.broadcast %cst_522 : f32 to vector<16x128xf32>
    %1113 = arith.mulf %1112, %1092 : vector<16x128xf32>
    %1114 = arith.addf %1111, %1113 : vector<16x128xf32>
    %cst_523 = arith.constant 0.0296605956 : f32
    %1115 = vector.broadcast %cst_523 : f32 to vector<16x128xf32>
    %1116 = arith.mulf %1115, %1093 : vector<16x128xf32>
    %1117 = arith.addf %1114, %1116 : vector<16x128xf32>
    %1118 = arith.addf %1089, %1117 : vector<16x128xf32>
    %c0_524 = arith.constant 0 : index
    %c2_525 = arith.constant 2 : index
    %c0_526 = arith.constant 0 : index
    %1119 = vector.load %arg3[%c0_524, %c2_525, %c0_526] : memref<4x18x128xf32, #tpu.memory_space<vmem>>, vector<1x16x128xf32>
    %1120 = vector.shape_cast %1119 : vector<1x16x128xf32> to vector<16x128xf32>
    %c1_527 = arith.constant 1 : index
    %c2_528 = arith.constant 2 : index
    %c0_529 = arith.constant 0 : index
    %1121 = vector.load %arg3[%c1_527, %c2_528, %c0_529] : memref<4x18x128xf32, #tpu.memory_space<vmem>>, vector<1x16x128xf32>
    %1122 = vector.shape_cast %1121 : vector<1x16x128xf32> to vector<16x128xf32>
    %c2_530 = arith.constant 2 : index
    %c2_531 = arith.constant 2 : index
    %c0_532 = arith.constant 0 : index
    %1123 = vector.load %arg3[%c2_530, %c2_531, %c0_532] : memref<4x18x128xf32, #tpu.memory_space<vmem>>, vector<1x16x128xf32>
    %1124 = vector.shape_cast %1123 : vector<1x16x128xf32> to vector<16x128xf32>
    %c3_533 = arith.constant 3 : index
    %c2_534 = arith.constant 2 : index
    %c0_535 = arith.constant 0 : index
    %1125 = vector.load %arg3[%c3_533, %c2_534, %c0_535] : memref<4x18x128xf32, #tpu.memory_space<vmem>>, vector<1x16x128xf32>
    %1126 = vector.shape_cast %1125 : vector<1x16x128xf32> to vector<16x128xf32>
    %c1_i32_536 = arith.constant 1 : i32
    %1127 = tpu.dynamic_rotate %1120 by %c1_i32_536 dim 1 : vector<16x128xf32>, i32 -> vector<16x128xf32>
    %c1_i32_537 = arith.constant 1 : i32
    %1128 = tpu.dynamic_rotate %1122 by %c1_i32_537 dim 1 : vector<16x128xf32>, i32 -> vector<16x128xf32>
    %c1_i32_538 = arith.constant 1 : i32
    %1129 = tpu.dynamic_rotate %1124 by %c1_i32_538 dim 1 : vector<16x128xf32>, i32 -> vector<16x128xf32>
    %c1_i32_539 = arith.constant 1 : i32
    %1130 = tpu.dynamic_rotate %1126 by %c1_i32_539 dim 1 : vector<16x128xf32>, i32 -> vector<16x128xf32>
    %cst_540 = arith.constant 0.0269297976 : f32
    %1131 = vector.broadcast %cst_540 : f32 to vector<16x128xf32>
    %1132 = arith.mulf %1131, %1127 : vector<16x128xf32>
    %cst_541 = arith.constant 0.0272659361 : f32
    %1133 = vector.broadcast %cst_541 : f32 to vector<16x128xf32>
    %1134 = arith.mulf %1133, %1128 : vector<16x128xf32>
    %1135 = arith.addf %1132, %1134 : vector<16x128xf32>
    %cst_542 = arith.constant 0.0252895206 : f32
    %1136 = vector.broadcast %cst_542 : f32 to vector<16x128xf32>
    %1137 = arith.mulf %1136, %1129 : vector<16x128xf32>
    %1138 = arith.addf %1135, %1137 : vector<16x128xf32>
    %cst_543 = arith.constant 0.0288627706 : f32
    %1139 = vector.broadcast %cst_543 : f32 to vector<16x128xf32>
    %1140 = arith.mulf %1139, %1130 : vector<16x128xf32>
    %1141 = arith.addf %1138, %1140 : vector<16x128xf32>
    %1142 = arith.addf %1041, %1141 : vector<16x128xf32>
    %cst_544 = arith.constant 0.0264249444 : f32
    %1143 = vector.broadcast %cst_544 : f32 to vector<16x128xf32>
    %1144 = arith.mulf %1143, %1127 : vector<16x128xf32>
    %cst_545 = arith.constant 0.0276375916 : f32
    %1145 = vector.broadcast %cst_545 : f32 to vector<16x128xf32>
    %1146 = arith.mulf %1145, %1128 : vector<16x128xf32>
    %1147 = arith.addf %1144, %1146 : vector<16x128xf32>
    %cst_546 = arith.constant 0.0266822949 : f32
    %1148 = vector.broadcast %cst_546 : f32 to vector<16x128xf32>
    %1149 = arith.mulf %1148, %1129 : vector<16x128xf32>
    %1150 = arith.addf %1147, %1149 : vector<16x128xf32>
    %cst_547 = arith.constant 0.0287336018 : f32
    %1151 = vector.broadcast %cst_547 : f32 to vector<16x128xf32>
    %1152 = arith.mulf %1151, %1130 : vector<16x128xf32>
    %1153 = arith.addf %1150, %1152 : vector<16x128xf32>
    %1154 = arith.addf %1077, %1153 : vector<16x128xf32>
    %cst_548 = arith.constant 0.0275279917 : f32
    %1155 = vector.broadcast %cst_548 : f32 to vector<16x128xf32>
    %1156 = arith.mulf %1155, %1120 : vector<16x128xf32>
    %cst_549 = arith.constant 0.0270726755 : f32
    %1157 = vector.broadcast %cst_549 : f32 to vector<16x128xf32>
    %1158 = arith.mulf %1157, %1122 : vector<16x128xf32>
    %1159 = arith.addf %1156, %1158 : vector<16x128xf32>
    %cst_550 = arith.constant 0.0283896886 : f32
    %1160 = vector.broadcast %cst_550 : f32 to vector<16x128xf32>
    %1161 = arith.mulf %1160, %1124 : vector<16x128xf32>
    %1162 = arith.addf %1159, %1161 : vector<16x128xf32>
    %cst_551 = arith.constant 0.0296605956 : f32
    %1163 = vector.broadcast %cst_551 : f32 to vector<16x128xf32>
    %1164 = arith.mulf %1163, %1126 : vector<16x128xf32>
    %1165 = arith.addf %1162, %1164 : vector<16x128xf32>
    %1166 = arith.addf %1141, %1165 : vector<16x128xf32>
    %1167 = arith.addf %1106, %1165 : vector<16x128xf32>
    %cst_552 = arith.constant 0.0277854539 : f32
    %1168 = vector.broadcast %cst_552 : f32 to vector<16x128xf32>
    %1169 = arith.mulf %1168, %1120 : vector<16x128xf32>
    %cst_553 = arith.constant 0.029374145 : f32
    %1170 = vector.broadcast %cst_553 : f32 to vector<16x128xf32>
    %1171 = arith.mulf %1170, %1122 : vector<16x128xf32>
    %1172 = arith.addf %1169, %1171 : vector<16x128xf32>
    %cst_554 = arith.constant 0.0296976771 : f32
    %1173 = vector.broadcast %cst_554 : f32 to vector<16x128xf32>
    %1174 = arith.mulf %1173, %1124 : vector<16x128xf32>
    %1175 = arith.addf %1172, %1174 : vector<16x128xf32>
    %cst_555 = arith.constant 0.0280450974 : f32
    %1176 = vector.broadcast %cst_555 : f32 to vector<16x128xf32>
    %1177 = arith.mulf %1176, %1126 : vector<16x128xf32>
    %1178 = arith.addf %1175, %1177 : vector<16x128xf32>
    %1179 = arith.addf %1154, %1178 : vector<16x128xf32>
    %c127_i32_556 = arith.constant 127 : i32
    %1180 = tpu.dynamic_rotate %1120 by %c127_i32_556 dim 1 : vector<16x128xf32>, i32 -> vector<16x128xf32>
    %c127_i32_557 = arith.constant 127 : i32
    %1181 = tpu.dynamic_rotate %1122 by %c127_i32_557 dim 1 : vector<16x128xf32>, i32 -> vector<16x128xf32>
    %c127_i32_558 = arith.constant 127 : i32
    %1182 = tpu.dynamic_rotate %1124 by %c127_i32_558 dim 1 : vector<16x128xf32>, i32 -> vector<16x128xf32>
    %c127_i32_559 = arith.constant 127 : i32
    %1183 = tpu.dynamic_rotate %1126 by %c127_i32_559 dim 1 : vector<16x128xf32>, i32 -> vector<16x128xf32>
    %cst_560 = arith.constant 0.0276387874 : f32
    %1184 = vector.broadcast %cst_560 : f32 to vector<16x128xf32>
    %1185 = arith.mulf %1184, %1180 : vector<16x128xf32>
    %cst_561 = arith.constant 0.0266440902 : f32
    %1186 = vector.broadcast %cst_561 : f32 to vector<16x128xf32>
    %1187 = arith.mulf %1186, %1181 : vector<16x128xf32>
    %1188 = arith.addf %1185, %1187 : vector<16x128xf32>
    %cst_562 = arith.constant 0.0278563835 : f32
    %1189 = vector.broadcast %cst_562 : f32 to vector<16x128xf32>
    %1190 = arith.mulf %1189, %1182 : vector<16x128xf32>
    %1191 = arith.addf %1188, %1190 : vector<16x128xf32>
    %cst_563 = arith.constant 2.792100e-02 : f32
    %1192 = vector.broadcast %cst_563 : f32 to vector<16x128xf32>
    %1193 = arith.mulf %1192, %1183 : vector<16x128xf32>
    %1194 = arith.addf %1191, %1193 : vector<16x128xf32>
    %1195 = arith.addf %1167, %1194 : vector<16x128xf32>
    %c3_564 = arith.constant 3 : index
    %c1_565 = arith.constant 1 : index
    %c0_566 = arith.constant 0 : index
    %1196 = vector.load %arg3[%c3_564, %c1_565, %c0_566] : memref<4x18x128xf32, #tpu.memory_space<vmem>>, vector<1x16x128xf32>
    %1197 = vector.shape_cast %1196 : vector<1x16x128xf32> to vector<16x128xf32>
    %1198 = arith.addf %1166, %1065 : vector<16x128xf32>
    %cst_567 = arith.constant 1.50293946 : f32
    %1199 = vector.broadcast %cst_567 : f32 to vector<16x128xf32>
    %1200 = arith.mulf %1199, %1198 : vector<16x128xf32>
    %1201 = arith.subf %1200, %1197 : vector<16x128xf32>
    %1202 = math.absf %1201 : vector<16x128xf32>
    %1203 = arith.addf %1006, %1195 : vector<16x128xf32>
    %cst_568 = arith.constant 1.50234187 : f32
    %1204 = vector.broadcast %cst_568 : f32 to vector<16x128xf32>
    %1205 = arith.mulf %1204, %1203 : vector<16x128xf32>
    %1206 = arith.subf %1205, %1197 : vector<16x128xf32>
    %1207 = math.absf %1206 : vector<16x128xf32>
    %1208 = arith.cmpf olt, %1207, %1202 : vector<16x128xf32>
    %1209 = arith.select %1208, %1205, %1200 : vector<16x128xi1>, vector<16x128xf32>
    %1210 = arith.select %1208, %1207, %1202 : vector<16x128xi1>, vector<16x128xf32>
    %1211 = arith.addf %1105, %1065 : vector<16x128xf32>
    %cst_569 = arith.constant 1.49917042 : f32
    %1212 = vector.broadcast %cst_569 : f32 to vector<16x128xf32>
    %1213 = arith.mulf %1212, %1211 : vector<16x128xf32>
    %1214 = arith.subf %1213, %1197 : vector<16x128xf32>
    %1215 = math.absf %1214 : vector<16x128xf32>
    %1216 = arith.cmpf olt, %1215, %1210 : vector<16x128xf32>
    %1217 = arith.select %1216, %1213, %1209 : vector<16x128xi1>, vector<16x128xf32>
    %1218 = arith.select %1216, %1215, %1210 : vector<16x128xi1>, vector<16x128xf32>
    %1219 = arith.addf %1142, %1195 : vector<16x128xf32>
    %cst_570 = arith.constant 1.50050712 : f32
    %1220 = vector.broadcast %cst_570 : f32 to vector<16x128xf32>
    %1221 = arith.mulf %1220, %1219 : vector<16x128xf32>
    %1222 = arith.subf %1221, %1197 : vector<16x128xf32>
    %1223 = math.absf %1222 : vector<16x128xf32>
    %1224 = arith.cmpf olt, %1223, %1218 : vector<16x128xf32>
    %1225 = arith.select %1224, %1221, %1217 : vector<16x128xi1>, vector<16x128xf32>
    %1226 = arith.select %1224, %1223, %1218 : vector<16x128xi1>, vector<16x128xf32>
    %cst_571 = arith.constant 2.25407195 : f32
    %1227 = vector.broadcast %cst_571 : f32 to vector<16x128xf32>
    %1228 = arith.mulf %1227, %1065 : vector<16x128xf32>
    %1229 = arith.subf %1228, %1197 : vector<16x128xf32>
    %1230 = math.absf %1229 : vector<16x128xf32>
    %1231 = arith.cmpf olt, %1230, %1226 : vector<16x128xf32>
    %1232 = arith.select %1231, %1228, %1225 : vector<16x128xi1>, vector<16x128xf32>
    %1233 = arith.select %1231, %1230, %1226 : vector<16x128xi1>, vector<16x128xf32>
    %cst_572 = arith.constant 2.25644946 : f32
    %1234 = vector.broadcast %cst_572 : f32 to vector<16x128xf32>
    %1235 = arith.mulf %1234, %1179 : vector<16x128xf32>
    %1236 = arith.subf %1235, %1197 : vector<16x128xf32>
    %1237 = math.absf %1236 : vector<16x128xf32>
    %1238 = arith.cmpf olt, %1237, %1233 : vector<16x128xf32>
    %1239 = arith.select %1238, %1235, %1232 : vector<16x128xi1>, vector<16x128xf32>
    %1240 = arith.select %1238, %1237, %1233 : vector<16x128xi1>, vector<16x128xf32>
    %cst_573 = arith.constant 2.25681973 : f32
    %1241 = vector.broadcast %cst_573 : f32 to vector<16x128xf32>
    %1242 = arith.mulf %1241, %1118 : vector<16x128xf32>
    %1243 = arith.subf %1242, %1197 : vector<16x128xf32>
    %1244 = math.absf %1243 : vector<16x128xf32>
    %1245 = arith.cmpf olt, %1244, %1240 : vector<16x128xf32>
    %1246 = arith.select %1245, %1242, %1239 : vector<16x128xi1>, vector<16x128xf32>
    %1247 = arith.select %1245, %1244, %1240 : vector<16x128xi1>, vector<16x128xf32>
    %cst_574 = arith.constant 2.24686861 : f32
    %1248 = vector.broadcast %cst_574 : f32 to vector<16x128xf32>
    %1249 = arith.mulf %1248, %1195 : vector<16x128xf32>
    %1250 = arith.subf %1249, %1197 : vector<16x128xf32>
    %1251 = math.absf %1250 : vector<16x128xf32>
    %1252 = arith.cmpf olt, %1251, %1247 : vector<16x128xf32>
    %1253 = arith.select %1252, %1249, %1246 : vector<16x128xi1>, vector<16x128xf32>
    %c0_575 = arith.constant 0 : index
    %c3_576 = arith.constant 3 : index
    %c0_577 = arith.constant 0 : index
    %c0_578 = arith.constant 0 : index
    %1254 = vector.load %arg2[%c0_575, %c3_576, %c0_577, %c0_578] : memref<1x4x16x128xf32, #tpu.memory_space<vmem>>, vector<1x1x16x128xf32>
    %1255 = vector.shape_cast %1254 : vector<1x1x16x128xf32> to vector<16x128xf32>
    %1256 = vector.shape_cast %1253 : vector<16x128xf32> to vector<1x1x16x128xf32>
    tpu.vector_store %arg2[%c0_575, %c3_576, %c0_577, %c0_578], %1256 {strides = array<i32>} : memref<1x4x16x128xf32, #tpu.memory_space<vmem>>, vector<1x1x16x128xf32>,
    return
  }
  func.func @transform_0(%arg0: i32) -> (i32, i32, i32, i32) {
    %c0_i32 = arith.constant 0 : i32
    %c0_i32_0 = arith.constant 0 : i32
    %c0_i32_1 = arith.constant 0 : i32
    %c0_i32_2 = arith.constant 0 : i32
    return %arg0, %c0_i32, %c0_i32_0, %c0_i32_1 : i32, i32, i32, i32
  }
  func.func @transform_1(%arg0: i32) -> (i32, i32, i32, i32) {
    %c0_i32 = arith.constant 0 : i32
    %c0_i32_0 = arith.constant 0 : i32
    %c0_i32_1 = arith.constant 0 : i32
    %c0_i32_2 = arith.constant 0 : i32
    return %arg0, %c0_i32, %c0_i32_0, %c0_i32_1 : i32, i32, i32, i32
  }
}

</mosaic_0001>

<bundles_post_ra>
// kernel: tpu_custom_call.1
= control target key start
LH: loop header
LB: loop body
LE: loop exit
PB: predicated region body
PF: predicated region fallthrough
CT: control target
= control target key end

     0   :  { %6 = vsyncpa [#allocation4], 0  ;;  %s4112_s0 = inlined_call_operand.hbm [shape: f32[2,4,16,16], index: 0, kind: input, shape index: {}]   ;;  %s4113_s1 = inlined_call_operand.hbm [shape: f32[1,4,16,128], index: 1, kind: output, shape index: {}]  }
   0x1   :  { %7 = vsyncpa [#allocation5], 0  ;;  %s12_s8 = sshll.u32 %s4112_s0, 4  ;;  %s2231_s9 = smov [#allocation3]   ;;  %s13_s8 = int_to_ptr.hbm [resolvable:$true] %s12_s8 }
   0x2   :  { %s14_s10 = sshll.u32 %s2231_s9, 4  ;;  %s2232_s11 = smov 128   ;;  %s15_s10 = int_to_ptr.vmem [resolvable:$true] %s14_s10 }
   0x3   :  { %s2233_s12 = smov 8  }
   0x4   :  { %20 = dma.hbm_to_vmem [thread:$0]  %s13_s8, 2048, %s15_s10, [#allocation4], %s2232_s11, %s2232_s11, %s2233_s12  }
   0x5   :  { %2227 = dma.done.wait [#allocation4], 2048  }
   0x6   :  { %2228 = vsyncadd [#allocation4], 4294965248  ;;  %v43_v0 = vld [vmem:[#allocation3 + $0x10] sm:$0xff]  ;;  %v41_v1 = vld [vmem:[#allocation3] sm:$0xff]  ;;  %s2234_s13 = smov 1   ;;  %v2235_v6 = vmov 0.0  }
   0x7   :  { %61 = vrot.lane.b32.xlu1 %v43_v0, %s2234_s13  ;;  %57 = vrot.lane.b32.xlu0 %v41_v1, %s2234_s13  ;;  %v45_v2 = vld [vmem:[#allocation3 + $0x20] sm:$0xff]  ;;  %v44_v3 = vld [vmem:[#allocation3 + $0x18] sm:$0xff]  ;;  %v42_v4 = vld [vmem:[#allocation3 + $0x8] sm:$0xff]  ;;  %35 = vst [vmem:[#allocation2 + $0x30] sm:$0xff] %v2235_v6  ;;  %s2236_s0 = smov 19   ;;  %vm81_vm0 = vcmask 138248  }
   0x8   :  { %65 = vrot.lane.b32.xlu2 %v45_v2, %s2234_s13  ;;  %v46_v5 = vld [vmem:[#allocation3 + $0x28] sm:$0xff]  ;;  %36 = vst [vmem:[#allocation2 + $0x38] sm:$0xff] %v2235_v6  ;;  %v48_v7 = vld [vmem:[#allocation3 + $0x38] sm:$0xff]  ;;  %v47_v8 = vld [vmem:[#allocation3 + $0x30] sm:$0xff]  ;;  %vm131_vm1 = vcmask 285848   ;;  %s2237_s14 = smov 127  }
   0x9   :  { %29 = vst [vmem:[#allocation2] sm:$0xff] %v2235_v6  ;;  %v91_v9 = vld [vmem:[#allocation3 + $0x40] sm:$0xff]  ;;  %v93_v10 = vld [vmem:[#allocation3 + $0x50] sm:$0xff]  ;;  %v92_v11 = vld [vmem:[#allocation3 + $0x48] sm:$0xff]  ;;  %s2238_s15 = smov [#allocation6]   ;;  %s2104_s19 = sshll.u32 %s4113_s1, 4  ;;  %s2105_s19 = int_to_ptr.hbm [resolvable:$true] %s2104_s19 }
   0xa   :  { %30 = vst [vmem:[#allocation2 + $0x8] sm:$0xff] %v2235_v6  ;;  %v94_v12 = vld [vmem:[#allocation3 + $0x58] sm:$0xff]  ;;  %v96_v13 = vld [vmem:[#allocation3 + $0x68] sm:$0xff]  ;;  %v95_v14 = vld [vmem:[#allocation3 + $0x60] sm:$0xff]  ;;  %s2102_s16 = sshll.u32 %s2238_s15, 4  ;;  %s2103_s16 = int_to_ptr.vmem [resolvable:$true] %s2102_s16 }
   0xb   :  { %31 = vst [vmem:[#allocation2 + $0x10] sm:$0x3] %v2235_v6  ;;  %v97_v15 = vld [vmem:[#allocation3 + $0x70] sm:$0xff]  ;;  %v98_v16 = vld [vmem:[#allocation3 + $0x78] sm:$0xff] }
   0xc   :  { %32 = vst [vmem:[#allocation2 + $0x18] sm:$0xff] %v2235_v6 }
   0xd   :  { %33 = vst [vmem:[#allocation2 + $0x20] sm:$0xff] %v2235_v6 }
   0xe   :  { %34 = vst [vmem:[#allocation2 + $0x28] sm:$0x3] %v2235_v6 }
   0xf   :  { %63 = vrot.lane.b32.xlu1 %v44_v3, %s2234_s13  ;;  %59 = vrot.lane.b32.xlu0 %v42_v4, %s2234_s13  ;;  %37 = vst [vmem:[#allocation2 + $0x40] sm:$0x3] %v2235_v6 }
  0x10   :  { %67 = vrot.lane.b32.xlu2 %v46_v5, %s2234_s13  ;;  %38 = vst [vmem:[#allocation2 + $0x48] sm:$0xff] %v2235_v6 }
  0x11   :  { %39 = vst [vmem:[#allocation2 + $0x50] sm:$0xff] %v2235_v6 }
  0x12   :  { %40 = vst [vmem:[#allocation2 + $0x58] sm:$0x3] %v2235_v6 }
  0x17   :  { %71 = vrot.lane.b32.xlu1 %v48_v7, %s2234_s13  ;;  %69 = vrot.lane.b32.xlu0 %v47_v8, %s2234_s13 }
  0x18   :  { %107 = vrot.lane.b32.xlu2 %v91_v9, %s2236_s0 }
  0x1f   :  { %111 = vrot.lane.b32.xlu1 %v93_v10, %s2236_s0  ;;  %109 = vrot.lane.b32.xlu0 %v92_v11, %s2236_s0 }
  0x20   :  { %113 = vrot.lane.b32.xlu2 %v94_v12, %s2236_s0 }
  0x27   :  { %117 = vrot.lane.b32.xlu1 %v96_v13, %s2236_s0  ;;  %115 = vrot.lane.b32.xlu0 %v95_v14, %s2236_s0 }
  0x28   :  { %119 = vrot.lane.b32.xlu2 %v97_v15, %s2236_s0 }
  0x2f   :  { %121 = vrot.lane.b32.xlu0 %v98_v16, %s2236_s0 }
  0x62   :  { %v66_v17 = vpop.permute.xlu2 %65 }
  0x63   :  { %86 = vst.msk [vmem:[#allocation2 + $0x31] sm:$0xff] %vm81_vm0, %v66_v17 }
  0x6a   :  { %v68_v18 = vpop.permute.xlu2 %67 }
  0x6b   :  { %87 = vst.msk [vmem:[#allocation2 + $0x39] sm:$0xff] %vm81_vm0, %v68_v18 }
  0x72   :  { %v108_v19 = vpop.permute.xlu2 %107 }
  0x79   :  { %v62_v20 = vpop.permute.xlu1 %61  ;;  %v58_v21 = vpop.permute.xlu0 %57 }
  0x7a   :  { %84 = vst.msk [vmem:[#allocation2 + $0x19] sm:$0xff] %vm81_vm0, %v62_v20  ;;  %v114_v22 = vpop.permute.xlu2 %113 }
  0x7b   :  { %82 = vst.msk [vmem:[#allocation2 + $0x1] sm:$0xff] %vm81_vm0, %v58_v21 }
  0x7c   :  { %132 = vst.msk [vmem:[#allocation2 + $0x1] sm:$0xff] %vm131_vm1, %v108_v19 }
  0x81   :  { %v64_v23 = vpop.permute.xlu1 %63  ;;  %v60_v24 = vpop.permute.xlu0 %59 }
  0x82   :  { %85 = vst.msk [vmem:[#allocation2 + $0x21] sm:$0xff] %vm81_vm0, %v64_v23  ;;  %v120_v26 = vpop.permute.xlu2 %119 }
  0x83   :  { %83 = vst.msk [vmem:[#allocation2 + $0x9] sm:$0xff] %vm81_vm0, %v60_v24  ;;  %v2270_v25 = vld [vmem:[#allocation2] sm:$0xff] }
  0x84   :  { %135 = vst.msk [vmem:[#allocation2 + $0x21] sm:$0xff] %vm131_vm1, %v114_v22  ;;  %151 = vrot.lane.b32.xlu1 %v2270_v25, %s2234_s13  ;;  %v2333_v43 = vld [vmem:[#allocation2 + $0x1] sm:$0xff]  ;;  %v181_v16 = vmul.f32 0.024950443, %v2270_v25  ;;  %v197_v17 = vmul.f32 0.027286736, %v2270_v25 }
  0x85   :  { %v329_v19 = vmul.f32 0.028063258, %v2333_v43  ;;  %v345_v20 = vmul.f32 0.02618303, %v2333_v43 }
  0x89   :  { %v72_v27 = vpop.permute.xlu1 %71  ;;  %v70_v28 = vpop.permute.xlu0 %69 }
  0x8a   :  { %89 = vst.msk [vmem:[#allocation2 + $0x51] sm:$0xff] %vm81_vm0, %v72_v27 }
  0x8b   :  { %88 = vst.msk [vmem:[#allocation2 + $0x49] sm:$0xff] %vm81_vm0, %v70_v28  ;;  %v2345_v46 = vld [vmem:[#allocation2 + $0x21] sm:$0xff]  ;;  %v313_v28 = vmul.f32 0.02671948, %v2333_v43 }
  0x8c   :  { %138 = vst.msk [vmem:[#allocation2 + $0x49] sm:$0xff] %vm131_vm1, %v120_v26  ;;  %v2385_v52 = vld [vmem:[#allocation2 + $0x22] sm:$0xff]  ;;  %v316_v21 = vmul.f32 0.026737925, %v2345_v46  ;;  %v2511_v23 = vmul.f32 0.029116683, %v2345_v46 }
  0x8d   :  { %4216 = vst [vmem:[#allocation12_spill] sm:$0xff] %v2385_v52  ;;  %v348_v24 = vmul.f32 0.028392766, %v2345_v46  ;;  %v470_v26 = vmul.f32 0.026124584, %v2385_v52 }
  0x91   :  { %v112_v29 = vpop.permute.xlu1 %111  ;;  %v110_v30 = vpop.permute.xlu0 %109 }
  0x92   :  { %134 = vst.msk [vmem:[#allocation2 + $0x19] sm:$0xff] %vm131_vm1, %v112_v29 }
  0x93   :  { %133 = vst.msk [vmem:[#allocation2 + $0x9] sm:$0xff] %vm131_vm1, %v110_v30  ;;  %v2294_v36 = vld [vmem:[#allocation2 + $0x48] sm:$0xff] }
  0x94   :  { %v2355_v48 = vld [vmem:[#allocation2 + $0x49] sm:$0xff]  ;;  %v2516_v27 = vmul.f32 0.027209291, %v2294_v36 }
  0x99   :  { %v118_v31 = vpop.permute.xlu1 %117  ;;  %v116_v32 = vpop.permute.xlu0 %115  ;;  %v2280_v33 = vld [vmem:[#allocation2 + $0x18] sm:$0xff]  ;;  %v2282_v34 = vld [vmem:[#allocation2 + $0x20] sm:$0xff] }
  0x9a   :  { %137 = vst.msk [vmem:[#allocation2 + $0x39] sm:$0xff] %vm131_vm1, %v118_v31  ;;  %155 = vrot.lane.b32.xlu0 %v2280_v33, %s2234_s13  ;;  %157 = vrot.lane.b32.xlu1 %v2282_v34, %s2234_s13  ;;  %v2290_v35 = vld [vmem:[#allocation2 + $0x8] sm:$0xff]  ;;  %v2327_v41 = vld [vmem:[#allocation2 + $0x19] sm:$0xff]  ;;  %v183_v29 = vmul.f32 0.027514482, %v2280_v33 }
  0x9b   :  { %136 = vst.msk [vmem:[#allocation2 + $0x31] sm:$0xff] %vm131_vm1, %v116_v32  ;;  %153 = vrot.lane.b32.xlu2 %v2290_v35, %s2234_s13  ;;  %v2329_v42 = vld [vmem:[#allocation2 + $0x9] sm:$0xff]  ;;  %v2389_v53 = vld [vmem:[#allocation2 + $0x1a] sm:$0xff]  ;;  %v199_v30 = vmul.f32 0.025970694, %v2280_v33 }
  0x9c   :  { %v2373_v49 = vld [vmem:[#allocation2 + $0xa] sm:$0xff]  ;;  %v2375_v50 = vld [vmem:[#allocation2 + $0x2] sm:$0xff]  ;;  %4217 = vst [vmem:[#allocation13_spill] sm:$0xff] %v2389_v53  ;;  %v184_v31 = vmul.f32 0.027514482, %v2282_v34 }
  0x9d   :  { %4213 = vst [vmem:[#allocation9_spill] sm:$0xff] %v2373_v49  ;;  %v182_v32 = vmul.f32 0.024950443, %v2290_v35 }
  0x9e   :  { %4214 = vst [vmem:[#allocation10_spill] sm:$0xff] %v2375_v50 }
  0xa1   :  { %v122_v37 = vpop.permute.xlu0 %121  ;;  %v2339_v44 = vld [vmem:[#allocation2 + $0x39] sm:$0xff] }
  0xa2   :  { %139 = vst.msk [vmem:[#allocation2 + $0x51] sm:$0xff] %vm131_vm1, %v122_v37  ;;  %v2297_v38 = vld [vmem:[#allocation2 + $0x38] sm:$0xff]  ;;  %v2299_v39 = vld [vmem:[#allocation2 + $0x30] sm:$0xff]  ;;  %163 = vrot.lane.b32.xlu1 %v2294_v36, %s2234_s13  ;;  %v198_v37 = vmul.f32 0.027286736, %v2290_v35 }
  0xa3   :  { %161 = vrot.lane.b32.xlu0 %v2297_v38, %s2234_s13  ;;  %159 = vrot.lane.b32.xlu2 %v2299_v39, %s2234_s13  ;;  %v2341_v45 = vld [vmem:[#allocation2 + $0x31] sm:$0xff]  ;;  %v2403_v57 = vld [vmem:[#allocation2 + $0x3a] sm:$0xff] }
  0xa4   :  { %v2383_v51 = vld [vmem:[#allocation2 + $0x32] sm:$0xff]  ;;  %4218 = vst [vmem:[#allocation14_spill] sm:$0xff] %v2403_v57 }
  0xa5   :  { %4215 = vst [vmem:[#allocation11_spill] sm:$0xff] %v2383_v51 }
  0xa9   :  { %v2307_v40 = vld [vmem:[#allocation2 + $0x50] sm:$0xff] }
  0xaa   :  { %213 = vrot.lane.b32.xlu1 %v2290_v35, %s2237_s14  ;;  %v2351_v47 = vld [vmem:[#allocation2 + $0x51] sm:$0xff] }
  0xab   :  { %211 = vrot.lane.b32.xlu0 %v2270_v25, %s2237_s14  ;;  %165 = vrot.lane.b32.xlu2 %v2307_v40, %s2234_s13  ;;  %v2397_v55 = vld [vmem:[#allocation2 + $0x52] sm:$0xff]  ;;  %v2399_v56 = vld [vmem:[#allocation2 + $0x4a] sm:$0xff] }
  0xb2   :  { %219 = vrot.lane.b32.xlu1 %v2299_v39, %s2237_s14 }
  0xb3   :  { %217 = vrot.lane.b32.xlu0 %v2282_v34, %s2237_s14  ;;  %215 = vrot.lane.b32.xlu2 %v2280_v33, %s2237_s14 }
  0xba   :  { %225 = vrot.lane.b32.xlu1 %v2307_v40, %s2237_s14 }
  0xbb   :  { %223 = vrot.lane.b32.xlu0 %v2294_v36, %s2237_s14  ;;  %221 = vrot.lane.b32.xlu2 %v2297_v38, %s2237_s14 }
  0xc2   :  { %271 = vrot.lane.b32.xlu1 %v2327_v41, %s2234_s13 }
  0xc3   :  { %269 = vrot.lane.b32.xlu0 %v2329_v42, %s2234_s13  ;;  %267 = vrot.lane.b32.xlu2 %v2333_v43, %s2234_s13 }
  0xca   :  { %277 = vrot.lane.b32.xlu1 %v2339_v44, %s2234_s13 }
  0xcb   :  { %275 = vrot.lane.b32.xlu0 %v2341_v45, %s2234_s13  ;;  %273 = vrot.lane.b32.xlu2 %v2345_v46, %s2234_s13 }
  0xd2   :  { %361 = vrot.lane.b32.xlu1 %v2333_v43, %s2237_s14 }
  0xd3   :  { %281 = vrot.lane.b32.xlu0 %v2351_v47, %s2234_s13  ;;  %279 = vrot.lane.b32.xlu2 %v2355_v48, %s2234_s13 }
  0xda   :  { %367 = vrot.lane.b32.xlu1 %v2345_v46, %s2237_s14 }
  0xdb   :  { %365 = vrot.lane.b32.xlu0 %v2327_v41, %s2237_s14  ;;  %363 = vrot.lane.b32.xlu2 %v2329_v42, %s2237_s14 }
  0xe2   :  { %373 = vrot.lane.b32.xlu1 %v2355_v48, %s2237_s14 }
  0xe3   :  { %371 = vrot.lane.b32.xlu0 %v2339_v44, %s2237_s14  ;;  %369 = vrot.lane.b32.xlu2 %v2341_v45, %s2237_s14 }
  0xea   :  { %421 = vrot.lane.b32.xlu1 %v2373_v49, %s2234_s13 }
  0xeb   :  { %419 = vrot.lane.b32.xlu0 %v2375_v50, %s2234_s13  ;;  %375 = vrot.lane.b32.xlu2 %v2351_v47, %s2237_s14 }
  0xf2   :  { %427 = vrot.lane.b32.xlu1 %v2383_v51, %s2234_s13 }
  0xf3   :  { %425 = vrot.lane.b32.xlu0 %v2385_v52, %s2234_s13  ;;  %423 = vrot.lane.b32.xlu2 %v2389_v53, %s2234_s13 }
  0xf5   :  { %v2395_v54 = vpop.permute.xlu2 %153 }
  0xf6   :  { %v2413_v59 = vpop.permute.xlu1 %151 }
  0xfa   :  { %433 = vrot.lane.b32.xlu1 %v2397_v55, %s2234_s13 }
  0xfb   :  { %431 = vrot.lane.b32.xlu0 %v2399_v56, %s2234_s13  ;;  %429 = vrot.lane.b32.xlu2 %v2403_v57, %s2234_s13 }
  0xfd   :  { %v2409_v58 = vpop.permute.xlu2 %159 }
 0x102   :  { %505 = vrot.lane.b32.xlu1 %v2389_v53, %s2237_s14 }
 0x103   :  { %503 = vrot.lane.b32.xlu0 %v2373_v49, %s2237_s14  ;;  %501 = vrot.lane.b32.xlu2 %v2375_v50, %s2237_s14 }
 0x105   :  { %v2419_v60 = vpop.permute.xlu2 %165 }
 0x10a   :  { %511 = vrot.lane.b32.xlu1 %v2403_v57, %s2237_s14 }
 0x10b   :  { %509 = vrot.lane.b32.xlu0 %v2383_v51, %s2237_s14  ;;  %507 = vrot.lane.b32.xlu2 %v2385_v52, %s2237_s14 }
 0x10c   :  { %v2427_v61 = vpop.permute.xlu0 %155  ;;  %v2429_v62 = vpop.permute.xlu1 %157 }
 0x10d   :  { %v2431_v63 = vpop.permute.xlu2 %215 }
 0x10e   :  { %4219 = vst [vmem:[#allocation15_spill] sm:$0xff] %v2431_v63  ;;  %v486_v63 = vmul.f32 0.0261409, %v2373_v49 }
 0x112   :  { %639 = vrot.lane.b32.xlu1 %v2270_v25, %s2234_s13 }
 0x113   :  { %515 = vrot.lane.b32.xlu0 %v2397_v55, %s2237_s14  ;;  %513 = vrot.lane.b32.xlu2 %v2399_v56, %s2237_s14 }
 0x114   :  { %v2439_v0 = vpop.permute.xlu1 %163 }
 0x115   :  { %v2441_v1 = vpop.permute.xlu0 %161  ;;  %v2443_v2 = vpop.permute.xlu2 %221 }
 0x116   :  { %4220 = vst [vmem:[#allocation16_spill] sm:$0xff] %v2443_v2 }
 0x11a   :  { %645 = vrot.lane.b32.xlu1 %v2282_v34, %s2234_s13 }
 0x11b   :  { %643 = vrot.lane.b32.xlu0 %v2280_v33, %s2234_s13  ;;  %641 = vrot.lane.b32.xlu2 %v2290_v35, %s2234_s13 }
 0x11c   :  { %v2451_v3 = vpop.permute.xlu1 %213 }
 0x11d   :  { %v2453_v4 = vpop.permute.xlu0 %211  ;;  %v2455_v5 = vpop.permute.xlu2 %267 }
 0x11e   :  { %4221 = vst [vmem:[#allocation17_spill] sm:$0xff] %v2453_v4  ;;  %v468_v4 = vmul.f32 0.028190507, %v2373_v49 }
 0x11f   :  { %4222 = vst [vmem:[#allocation18_spill] sm:$0xff] %v2455_v5 }
 0x120   :  { %v472_v49 = vadd.f32 %v470_v26, %v468_v4  ;;  %v474_v4 = vmul.f32 0.027023276, %v2403_v57 }
 0x122   :  { %651 = vrot.lane.b32.xlu1 %v2294_v36, %s2234_s13 }
 0x123   :  { %649 = vrot.lane.b32.xlu0 %v2297_v38, %s2234_s13  ;;  %647 = vrot.lane.b32.xlu2 %v2299_v39, %s2234_s13 }
 0x124   :  { %v2463_v6 = vpop.permute.xlu1 %219 }
 0x125   :  { %4223 = vst [vmem:[#allocation19_spill] sm:$0xff] %v2463_v6  ;;  %v2465_v7 = vpop.permute.xlu0 %217  ;;  %v2467_v8 = vpop.permute.xlu2 %273  ;;  %v186_v6 = vadd.f32 %v184_v31, %v182_v32  ;;  %v487_v31 = vmul.f32 0.027259724, %v2389_v53  ;;  %v188_v32 = vmul.f32 0.025057273, %v2297_v38 }
 0x126   :  { %4224 = vst [vmem:[#allocation20_spill] sm:$0xff] %v2467_v8  ;;  %v185_v8 = vadd.f32 %v183_v29, %v181_v16  ;;  %v467_v16 = vmul.f32 0.028190507, %v2375_v50 }
 0x12a   :  { %701 = vrot.lane.b32.xlu1 %v2290_v35, %s2237_s14  ;;  %v314_v35 = vmul.f32 0.02671948, %v2329_v42 }
 0x12b   :  { %699 = vrot.lane.b32.xlu0 %v2270_v25, %s2237_s14  ;;  %653 = vrot.lane.b32.xlu2 %v2307_v40, %s2234_s13  ;;  %v488_v25 = vmul.f32 0.027259724, %v2385_v52  ;;  %v331_v52 = vmul.f32 0.029116683, %v2327_v41 }
 0x12c   :  { %v2475_v9 = vpop.permute.xlu1 %225 }
 0x12d   :  { %4225 = vst [vmem:[#allocation21_spill] sm:$0xff] %v2475_v9  ;;  %v2477_v10 = vpop.permute.xlu0 %223  ;;  %v2479_v11 = vpop.permute.xlu2 %279  ;;  %v2555_v5 = vadd.f32 %v331_v52, %v329_v19  ;;  %v203_v52 = vmul.f32 0.027330548, %v2299_v39  ;;  %v320_v19 = vmul.f32 0.029625459, %v2339_v44 }
 0x12e   :  { %4226 = vst [vmem:[#allocation22_spill] sm:$0xff] %v2477_v10  ;;  %v315_v10 = vmul.f32 0.026737925, %v2327_v41 }
 0x12f   :  { %4227 = vst [vmem:[#allocation23_spill] sm:$0xff] %v2479_v11  ;;  %v346_v11 = vmul.f32 0.02618303, %v2329_v42 }
 0x132   :  { %707 = vrot.lane.b32.xlu1 %v2299_v39, %s2237_s14 }
 0x133   :  { %705 = vrot.lane.b32.xlu0 %v2282_v34, %s2237_s14  ;;  %703 = vrot.lane.b32.xlu2 %v2280_v33, %s2237_s14  ;;  %v347_v33 = vmul.f32 0.028392766, %v2327_v41 }
 0x134   :  { %v2487_v12 = vpop.permute.xlu1 %271 }
 0x135   :  { %v2489_v13 = vpop.permute.xlu0 %269  ;;  %v2491_v14 = vpop.permute.xlu2 %363  ;;  %v2559_v29 = vadd.f32 %v347_v33, %v345_v20  ;;  %v473_v33 = vmul.f32 0.027023276, %v2383_v51 }
 0x136   :  { %4228 = vst [vmem:[#allocation24_spill] sm:$0xff] %v2489_v13  ;;  %v201_v13 = vadd.f32 %v199_v30, %v197_v17  ;;  %v469_v17 = vmul.f32 0.026124584, %v2389_v53  ;;  %v2561_v30 = vadd.f32 %v316_v21, %v314_v35  ;;  %v491_v35 = vmul.f32 0.028905885, %v2383_v51 }
 0x137   :  { %4229 = vst [vmem:[#allocation25_spill] sm:$0xff] %v2491_v14  ;;  %v2529_v14 = vmul.f32 0.02687724, %v2294_v36  ;;  %v167_v51 = vmul.f32 0.024385478, %v2413_v59 }
 0x138   :  { %v471_v21 = vadd.f32 %v469_v17, %v467_v16  ;;  %v336_v16 = vmul.f32 0.026241675, %v2339_v44  ;;  %v352_v17 = vmul.f32 0.0261683, %v2339_v44  ;;  %v174_v59 = vmul.f32 0.026449919, %v2441_v1 }
 0x13a   :  { %713 = vrot.lane.b32.xlu1 %v2307_v40, %s2237_s14 }
 0x13b   :  { %711 = vrot.lane.b32.xlu0 %v2294_v36, %s2237_s14  ;;  %709 = vrot.lane.b32.xlu2 %v2297_v38, %s2237_s14 }
 0x13c   :  { %v2499_v15 = vpop.permute.xlu1 %277 }
 0x13d   :  { %4230 = vst [vmem:[#allocation26_spill] sm:$0xff] %v2499_v15  ;;  %v2503_v18 = vpop.permute.xlu0 %275  ;;  %v2508_v22 = vpop.permute.xlu2 %369  ;;  %v2533_v15 = vmul.f32 0.02785262, %v2355_v48 }
 0x13e   :  { %4231 = vst [vmem:[#allocation27_spill] sm:$0xff] %v2503_v18  ;;  %v187_v18 = vmul.f32 0.025057273, %v2299_v39  ;;  %v335_v39 = vmul.f32 0.026241675, %v2341_v45 }
 0x13f   :  { %4232 = vst [vmem:[#allocation28_spill] sm:$0xff] %v2508_v22  ;;  %v200_v22 = vmul.f32 0.025970694, %v2282_v34  ;;  %v2540_v34 = vmul.f32 0.029058933, %v2355_v48 }
 0x140   :  { %4233 = vst [vmem:[#allocation29_spill] sm:$0xff] %v2533_v15  ;;  %v189_v20 = vadd.f32 %v187_v18, %v185_v8  ;;  %v190_v8 = vadd.f32 %v188_v32, %v186_v6  ;;  %v351_v18 = vmul.f32 0.0261683, %v2341_v45  ;;  %v477_v6 = vmul.f32 0.02597378, %v2399_v56 }
 0x141   :  { %v202_v2 = vadd.f32 %v200_v22, %v198_v37  ;;  %v485_v22 = vmul.f32 0.0261409, %v2375_v50  ;;  %v204_v37 = vmul.f32 0.027330548, %v2297_v38  ;;  %v319_v38 = vmul.f32 0.029625459, %v2341_v45 }
 0x142   :  { %759 = vrot.lane.b32.xlu1 %v2327_v41, %s2234_s13  ;;  %v208_v32 = vmul.f32 0.02687724, %v2307_v40  ;;  %v169_v50 = vmul.f32 0.030736394, %v2427_v61 }
 0x143   :  { %757 = vrot.lane.b32.xlu0 %v2329_v42, %s2234_s13  ;;  %755 = vrot.lane.b32.xlu2 %v2333_v43, %s2234_s13 }
 0x144   :  { %v2544_v36 = vpop.permute.xlu1 %361  ;;  %v171_v1 = vadd.f32 %v169_v50, %v167_v51  ;;  %v177_v50 = vmul.f32 0.030075839, %v2439_v0  ;;  %v340_v51 = vmul.f32 0.02785262, %v2351_v47  ;;  %v285_v0 = vmul.f32 0.025970694, %v2487_v12 }
 0x145   :  { %4234 = vst [vmem:[#allocation30_spill] sm:$0xff] %v2544_v36  ;;  %v2548_v9 = vpop.permute.xlu0 %281  ;;  %v2552_v15 = vpop.permute.xlu2 %375  ;;  %v317_v36 = vadd.f32 %v315_v10, %v313_v28  ;;  %v489_v10 = vadd.f32 %v487_v31, %v485_v22  ;;  %v192_v28 = vmul.f32 0.027209291, %v2307_v40  ;;  %v475_v31 = vadd.f32 %v473_v33, %v471_v21 }
 0x146   :  { %4235 = vst [vmem:[#allocation31_spill] sm:$0xff] %v2548_v9  ;;  %v490_v9 = vadd.f32 %v488_v25, %v486_v63  ;;  %v205_v25 = vadd.f32 %v203_v52, %v201_v13  ;;  %v495_v13 = vmul.f32 0.027483987, %v2399_v56  ;;  %v496_v52 = vmul.f32 0.027483987, %v2397_v55 }
 0x147   :  { %4236 = vst [vmem:[#allocation32_spill] sm:$0xff] %v2552_v15  ;;  %v350_v15 = vadd.f32 %v348_v24, %v346_v11  ;;  %v206_v11 = vadd.f32 %v204_v37, %v202_v2  ;;  %v492_v24 = vmul.f32 0.028905885, %v2403_v57  ;;  %v493_v53 = vadd.f32 %v491_v35, %v489_v10 }
 0x148   :  { %v2593_v2 = vadd.f32 %v2516_v27, %v189_v20  ;;  %v476_v37 = vadd.f32 %v474_v4, %v472_v49  ;;  %v170_v21 = vmul.f32 0.030736394, %v2429_v62  ;;  %v2601_v33 = vadd.f32 %v192_v28, %v190_v8 }
 0x149   :  { %v494_v57 = vadd.f32 %v492_v24, %v490_v9  ;;  %v324_v35 = vmul.f32 0.025322784, %v2351_v47  ;;  %v356_v27 = vmul.f32 0.029058933, %v2351_v47  ;;  %v330_v40 = vmul.f32 0.028063258, %v2329_v42 }
 0x14a   :  { %765 = vrot.lane.b32.xlu1 %v2339_v44, %s2234_s13  ;;  %v168_v49 = vmul.f32 0.024385478, %v2395_v54  ;;  %v2609_v9 = vadd.f32 %v477_v6, %v475_v31  ;;  %v2613_v61 = vadd.f32 %v2529_v14, %v205_v25  ;;  %v2617_v62 = vadd.f32 %v495_v13, %v493_v53 }
 0x14b   :  { %763 = vrot.lane.b32.xlu0 %v2341_v45, %s2234_s13  ;;  %761 = vrot.lane.b32.xlu2 %v2345_v46, %s2234_s13  ;;  %v478_v20 = vmul.f32 0.02597378, %v2397_v55  ;;  %v2620_v10 = vadd.f32 %v496_v52, %v494_v57  ;;  %v2622_v4 = vadd.f32 %v208_v32, %v206_v11  ;;  %v321_v24 = vadd.f32 %v319_v38, %v317_v36 }
 0x14c   :  { %v2580_v63 = vpop.permute.xlu1 %367  ;;  %v172_v8 = vadd.f32 %v170_v21, %v168_v49  ;;  %v323_v25 = vmul.f32 0.025322784, %v2355_v48  ;;  %v354_v53 = vadd.f32 %v352_v17, %v350_v15  ;;  %v322_v28 = vadd.f32 %v320_v19, %v2561_v30 }
 0x14d   :  { %v2584_v26 = vpop.permute.xlu0 %365  ;;  %v2589_v22 = vpop.permute.xlu2 %423  ;;  %v334_v57 = vadd.f32 %v2511_v23, %v330_v40  ;;  %v353_v11 = vadd.f32 %v351_v18, %v2559_v29  ;;  %v173_v6 = vmul.f32 0.026449919, %v2409_v58  ;;  %v337_v30 = vadd.f32 %v335_v39, %v2555_v5  ;;  %v4240_v40 = vld [vmem:[#allocation15_spill] sm:$0xff] }
 0x14e   :  { %v176_v32 = vadd.f32 %v174_v59, %v172_v8  ;;  %v2639_v13 = vadd.f32 %v356_v27, %v354_v53  ;;  %v2641_v36 = vadd.f32 %v324_v35, %v322_v28  ;;  %v178_v23 = vmul.f32 0.030075839, %v2419_v60  ;;  %v4241_v59 = vld [vmem:[#allocation17_spill] sm:$0xff] }
 0x14f   :  { %v338_v15 = vadd.f32 %v336_v16, %v334_v57  ;;  %v175_v19 = vadd.f32 %v173_v6, %v171_v1  ;;  %v230_v38 = vmul.f32 0.029116683, %v2465_v7  ;;  %v2646_v29 = vadd.f32 %v323_v25, %v321_v24  ;;  %v4242_v24 = vld [vmem:[#allocation16_spill] sm:$0xff] }
 0x150   :  { %v246_v58 = vmul.f32 0.026737925, %v2465_v7  ;;  %v2651_v18 = vadd.f32 %v2540_v34, %v353_v11  ;;  %v2655_v16 = vadd.f32 %v478_v20, %v476_v37  ;;  %v180_v5 = vadd.f32 %v178_v23, %v176_v32  ;;  %v4237_v7 = vld [vmem:[#allocation18_spill] sm:$0xff]  ;;  %v4238_v34 = vld [vmem:[#allocation27_spill] sm:$0xff]  ;;  %v4239_v37 = vld [vmem:[#allocation29_spill] sm:$0xff] }
 0x151   :  { %v179_v39 = vadd.f32 %v177_v50, %v175_v19  ;;  %v228_v60 = vmul.f32 0.028063258, %v2451_v3  ;;  %v2658_v17 = vadd.f32 %v340_v51, %v338_v15  ;;  %v283_v52 = vmul.f32 0.027286736, %v4237_v7  ;;  %v4243_v50 = vld [vmem:[#allocation19_spill] sm:$0xff] }
 0x152   :  { %849 = vrot.lane.b32.xlu1 %v2333_v43, %s2237_s14  ;;  %v244_v21 = vmul.f32 0.02671948, %v2451_v3  ;;  %v289_v35 = vmul.f32 0.027330548, %v4238_v34  ;;  %v2670_v27 = vadd.f32 %v4239_v37, %v337_v30  ;;  %v229_v49 = vmul.f32 0.029116683, %v4240_v40 }
 0x153   :  { %769 = vrot.lane.b32.xlu0 %v2351_v47, %s2234_s13  ;;  %767 = vrot.lane.b32.xlu2 %v2355_v48, %s2234_s13  ;;  %v227_v20 = vmul.f32 0.028063258, %v4241_v59  ;;  %v232_v1 = vadd.f32 %v230_v38, %v228_v60  ;;  %v245_v3 = vmul.f32 0.026737925, %v4240_v40  ;;  %v234_v25 = vmul.f32 0.026241675, %v4242_v24 }
 0x154   :  { %v2626_v54 = vpop.permute.xlu1 %373  ;;  %v248_v53 = vadd.f32 %v246_v58, %v244_v21  ;;  %v287_v28 = vadd.f32 %v285_v0, %v283_v52  ;;  %v2682_v11 = vadd.f32 %v2601_v33, %v180_v5  ;;  %v250_v6 = vmul.f32 0.029625459, %v4242_v24  ;;  %v4244_v30 = vld [vmem:[#allocation21_spill] sm:$0xff]  ;;  %v4245_v5 = vld [vmem:[#allocation23_spill] sm:$0xff]  ;;  %v4246_v37 = vld [vmem:[#allocation22_spill] sm:$0xff] }
 0x155   :  { %v2628_v14 = vpop.permute.xlu0 %371  ;;  %v2633_v31 = vpop.permute.xlu2 %429  ;;  %v195_v32 = vadd.f32 %v2593_v2, %v179_v39  ;;  %v233_v51 = vmul.f32 0.026241675, %v4243_v50  ;;  %v249_v15 = vmul.f32 0.029625459, %v4243_v50  ;;  %v238_v23 = vmul.f32 0.02785262, %v4244_v30 }
 0x156   :  { %v254_v19 = vmul.f32 0.025322784, %v4244_v30  ;;  %v291_v38 = vadd.f32 %v289_v35, %v287_v28  ;;  %v231_v58 = vadd.f32 %v229_v49, %v227_v20  ;;  %v236_v60 = vadd.f32 %v234_v25, %v232_v1  ;;  %v4247_v30 = vld [vmem:[#allocation24_spill] sm:$0xff] }
 0x157   :  { %v301_v52 = vmul.f32 0.027514482, %v2487_v12  ;;  %v293_v21 = vmul.f32 0.02687724, %v4245_v5  ;;  %v237_v40 = vmul.f32 0.02785262, %v4246_v37 }
 0x158   :  { %v253_v39 = vmul.f32 0.025322784, %v4246_v37  ;;  %v299_v24 = vmul.f32 0.024950443, %v4237_v7  ;;  %v235_v50 = vadd.f32 %v233_v51, %v231_v58  ;;  %v284_v35 = vmul.f32 0.027286736, %v4247_v30 }
 0x159   :  { %v305_v49 = vmul.f32 0.025057273, %v4238_v34  ;;  %v2701_v20 = vadd.f32 %v238_v23, %v236_v60  ;;  %v2703_v1 = vadd.f32 %v293_v21, %v291_v38  ;;  %v4249_v7 = vld [vmem:[#allocation20_spill] sm:$0xff]  ;;  %v300_v25 = vmul.f32 0.024950443, %v4247_v30  ;;  %v4250_v34 = vld [vmem:[#allocation26_spill] sm:$0xff] }
 0x15a   :  { %855 = vrot.lane.b32.xlu1 %v2345_v46, %s2237_s14  ;;  %v290_v28 = vmul.f32 0.027330548, %v4250_v34  ;;  %v309_v51 = vmul.f32 0.027209291, %v4245_v5  ;;  %v306_v58 = vmul.f32 0.025057273, %v4250_v34 }
 0x15b   :  { %853 = vrot.lane.b32.xlu0 %v2327_v41, %s2237_s14  ;;  %851 = vrot.lane.b32.xlu2 %v2329_v42, %s2237_s14  ;;  %v243_v41 = vmul.f32 0.02671948, %v4241_v59  ;;  %v252_v59 = vadd.f32 %v250_v6, %v248_v53  ;;  %4248 = vst [vmem:[#allocation18_spill] sm:$0xff] %v2703_v1  ;;  %v303_v53 = vadd.f32 %v301_v52, %v299_v24  ;;  %v4253_v37 = vld [vmem:[#allocation25_spill] sm:$0xff] }
 0x15c   :  { %v2667_v46 = vpop.permute.xlu1 %421  ;;  %v2722_v52 = vadd.f32 %v2701_v20, %v2601_v33  ;;  %v378_v5 = vmul.f32 0.0261409, %v4253_v37 }
 0x15d   :  { %v2675_v8 = vpop.permute.xlu0 %419  ;;  %v2679_v57 = vpop.permute.xlu2 %501  ;;  %v247_v0 = vadd.f32 %v245_v3, %v243_v41  ;;  %v256_v41 = vadd.f32 %v254_v19, %v252_v59  ;;  %v286_v3 = vmul.f32 0.025970694, %v4249_v7  ;;  %v307_v38 = vadd.f32 %v305_v49, %v303_v53 }
 0x15e   :  { %4252 = vst [vmem:[#allocation27_spill] sm:$0xff] %v2722_v52  ;;  %v379_v49 = vmul.f32 0.027259724, %v2584_v26  ;;  %v436_v52 = vmul.f32 0.02618303, %v2667_v46 }
 0x15f   :  { %v251_v12 = vadd.f32 %v249_v15, %v247_v0  ;;  %v2714_v15 = vadd.f32 %v237_v40, %v235_v50  ;;  %v4251_v0 = vld [vmem:[#allocation31_spill] sm:$0xff]  ;;  %v2725_v21 = vadd.f32 %v256_v41, %v2622_v4  ;;  %v297_v40 = vadd.f32 %v2703_v1, %v195_v32 }
 0x160   :  { %v294_v60 = vmul.f32 0.02687724, %v4251_v0  ;;  %v310_v50 = vmul.f32 0.027209291, %v4251_v0  ;;  %v380_v4 = vmul.f32 0.027259724, %v2580_v63  ;;  %v2742_v41 = vadd.f32 %v309_v51, %v307_v38 }
 0x161   :  { %v255_v23 = vadd.f32 %v253_v39, %v251_v12  ;;  %v2730_v39 = vmul.f32 0.028190507, %v4253_v37  ;;  %v4255_v12 = vld [vmem:[#allocation9_spill] sm:$0xff]  ;;  %v405_v1 = vmul.f32 0.02597378, %v2626_v54 }
 0x162   :  { %861 = vrot.lane.b32.xlu1 %v2355_v48, %s2237_s14 }
 0x163   :  { %859 = vrot.lane.b32.xlu0 %v2339_v44, %s2237_s14  ;;  %857 = vrot.lane.b32.xlu2 %v2341_v45, %s2237_s14  ;;  %v302_v44 = vmul.f32 0.027514482, %v4249_v7  ;;  %v288_v45 = vadd.f32 %v286_v3, %v284_v35  ;;  %v2734_v30 = vadd.f32 %v255_v23, %v2613_v61  ;;  %v4254_v35 = vld [vmem:[#allocation28_spill] sm:$0xff]  ;;  %v4258_v61 = vld [vmem:[#allocation30_spill] sm:$0xff] }
 0x164   :  { %v2707_v48 = vpop.permute.xlu1 %427  ;;  %v383_v33 = vmul.f32 0.028905885, %v4254_v35  ;;  %v401_v32 = vmul.f32 0.027023276, %v4254_v35  ;;  %v377_v53 = vmul.f32 0.0261409, %v4258_v61 }
 0x165   :  { %v426_v6 = vpop.permute.xlu0 %425  ;;  %v2716_v19 = vpop.permute.xlu2 %507  ;;  %v304_v59 = vadd.f32 %v302_v44, %v300_v25  ;;  %v292_v24 = vadd.f32 %v290_v28, %v288_v45  ;;  %v4257_v25 = vld [vmem:[#allocation10_spill] sm:$0xff]  ;;  %v395_v34 = vmul.f32 0.028190507, %v4258_v61  ;;  %v384_v28 = vmul.f32 0.028905885, %v2628_v14  ;;  %v4259_v23 = vld [vmem:[#allocation32_spill] sm:$0xff] }
 0x166   :  { %v2752_v44 = vadd.f32 %v2646_v29, %v297_v40  ;;  %v388_v45 = vmul.f32 0.027483987, %v4259_v23  ;;  %v438_v0 = vmul.f32 0.028392766, %v426_v6  ;;  %v381_v37 = vadd.f32 %v379_v49, %v377_v53 }
 0x167   :  { %v308_v7 = vadd.f32 %v306_v58, %v304_v59  ;;  %v2744_v3 = vadd.f32 %v294_v60, %v292_v24  ;;  %v397_v58 = vmul.f32 0.026124584, %v2584_v26  ;;  %v382_v59 = vadd.f32 %v380_v4, %v378_v5 }
 0x168   :  { %v398_v24 = vmul.f32 0.026124584, %v2580_v63  ;;  %v435_v35 = vmul.f32 0.02618303, %v2675_v8  ;;  %v453_v26 = vmul.f32 0.026737925, %v2589_v22  ;;  %v440_v53 = vadd.f32 %v438_v0, %v436_v52 }
 0x169   :  { %4256 = vst [vmem:[#allocation29_spill] sm:$0xff] %v2744_v3  ;;  %v312_v38 = vadd.f32 %v310_v50, %v308_v7  ;;  %v298_v40 = vadd.f32 %v2744_v3, %v2682_v11  ;;  %v454_v50 = vmul.f32 0.026737925, %v426_v6  ;;  %v386_v7 = vadd.f32 %v384_v28, %v382_v59  ;;  %v4260_v6 = vld [vmem:[#allocation11_spill] sm:$0xff] }
 0x16a   :  { %909 = vrot.lane.b32.xlu1 %v4255_v12, %s2234_s13  ;;  %v387_v49 = vmul.f32 0.027483987, %v2626_v54  ;;  %v451_v5 = vmul.f32 0.02671948, %v2675_v8  ;;  %v399_v63 = vadd.f32 %v397_v58, %v395_v34  ;;  %v452_v4 = vmul.f32 0.02671948, %v2667_v46 }
 0x16b   :  { %907 = vrot.lane.b32.xlu0 %v4257_v25, %s2234_s13  ;;  %863 = vrot.lane.b32.xlu2 %v2351_v47, %s2237_s14  ;;  %v437_v47 = vmul.f32 0.028392766, %v2589_v22  ;;  %v441_v25 = vmul.f32 0.0261683, %v2707_v48  ;;  %v442_v11 = vmul.f32 0.0261683, %v2633_v31  ;;  %v385_v3 = vadd.f32 %v383_v33, %v381_v37 }
 0x16c   :  { %v434_v51 = vpop.permute.xlu1 %433  ;;  %v456_v22 = vadd.f32 %v454_v50, %v452_v4  ;;  %v457_v28 = vmul.f32 0.029625459, %v2707_v48  ;;  %v4261_v34 = vld [vmem:[#allocation12_spill] sm:$0xff]  ;;  %v458_v46 = vmul.f32 0.029625459, %v2633_v31  ;;  %v2779_v52 = vadd.f32 %v388_v45, %v386_v7  ;;  %v4262_v54 = vld [vmem:[#allocation13_spill] sm:$0xff] }
 0x16d   :  { %v432_v60 = vpop.permute.xlu0 %431  ;;  %v2760_v61 = vpop.permute.xlu2 %513  ;;  %v439_v12 = vadd.f32 %v437_v47, %v435_v35  ;;  %v446_v8 = vmul.f32 0.029058933, %v434_v51  ;;  %v389_v58 = vadd.f32 %v387_v49, %v385_v3  ;;  %v455_v33 = vadd.f32 %v453_v26, %v451_v5 }
 0x16e   :  { %v445_v59 = vmul.f32 0.029058933, %v432_v60  ;;  %v461_v35 = vmul.f32 0.025322784, %v432_v60  ;;  %v444_v47 = vadd.f32 %v442_v11, %v440_v53  ;;  %v462_v50 = vmul.f32 0.025322784, %v434_v51 }
 0x16f   :  { %v443_v37 = vadd.f32 %v441_v25, %v439_v12  ;;  %v328_v4 = vadd.f32 %v2641_v36, %v298_v40  ;;  %v2786_v31 = vmul.f32 2.254072, %v2752_v44  ;;  %v459_v3 = vadd.f32 %v457_v28, %v455_v33 }
 0x170   :  { %v460_v7 = vadd.f32 %v458_v46, %v456_v22  ;;  %v2790_v49 = vadd.f32 %v446_v8, %v444_v47  ;;  %v2794_v12 = vadd.f32 %v2714_v15, %v2593_v2  ;;  %v400_v25 = vadd.f32 %v398_v24, %v2730_v39 }
 0x171   :  { %v447_v26 = vadd.f32 %v445_v59, %v443_v37  ;;  %v392_v51 = vadd.f32 %v2779_v52, %v2701_v20  ;;  %v391_v60 = vadd.f32 %v389_v58, %v2714_v15  ;;  %v463_v40 = vadd.f32 %v461_v35, %v459_v3 }
 0x172   :  { %915 = vrot.lane.b32.xlu1 %v4260_v6, %s2234_s13  ;;  %v402_v6 = vmul.f32 0.027023276, %v2628_v14  ;;  %v359_v14 = vadd.f32 %v2651_v18, %v2734_v30  ;;  %v464_v5 = vadd.f32 %v462_v50, %v460_v7  ;;  %v585_v53 = vsub.f32 %v2786_v31, %v2333_v43 }
 0x173   :  { %913 = vrot.lane.b32.xlu0 %v4261_v34, %s2234_s13  ;;  %911 = vrot.lane.b32.xlu2 %v4262_v54, %s2234_s13  ;;  %v403_v34 = vadd.f32 %v401_v32, %v399_v63  ;;  %v344_v63 = vadd.f32 %v2658_v17, %v312_v38  ;;  %v343_v2 = vadd.f32 %v2670_v27, %v2742_v41  ;;  %v2809_v18 = vmul.f32 2.254072, %v328_v4  ;;  %v4263_v38 = vld [vmem:[#allocation14_spill] sm:$0xff] }
 0x174   :  { %v506_v0 = vpop.permute.xlu1 %505  ;;  %v481_v20 = vadd.f32 %v2609_v9, %v447_v26  ;;  %v482_v15 = vadd.f32 %v2655_v16, %v2790_v49  ;;  %v360_v17 = vadd.f32 %v2639_v13, %v2725_v21  ;;  %v406_v27 = vmul.f32 0.02597378, %v4259_v23 }
 0x175   :  { %v504_v48 = vpop.permute.xlu0 %503  ;;  %v2788_v45 = vpop.permute.xlu2 %641  ;;  %v407_v32 = vadd.f32 %v405_v1, %v403_v34  ;;  %v519_v39 = vmul.f32 0.02768159, %v506_v0  ;;  %v404_v1 = vadd.f32 %v402_v6, %v400_v25  ;;  %v517_v41 = vmul.f32 0.02595759, %v2679_v57 }
 0x176   :  { %v556_v11 = vadd.f32 %v392_v51, %v328_v4  ;;  %v555_v6 = vadd.f32 %v391_v60, %v2752_v44  ;;  %v465_v22 = vadd.f32 %v463_v40, %v343_v2  ;;  %v466_v28 = vadd.f32 %v464_v5, %v344_v63  ;;  %v4264_v51 = vld [vmem:[#allocation9_spill] sm:$0xff]  ;;  %v4266_v5 = vld [vmem:[#allocation10_spill] sm:$0xff] }
 0x177   :  { %v409_v30 = vadd.f32 %v407_v32, %v359_v14  ;;  %v393_v8 = vadd.f32 %v389_v58, %v2646_v29  ;;  %v2824_v34 = vand.u32 2147483647, %v585_v53  ;;  %v521_v13 = vadd.f32 %v519_v39, %v517_v41 }
 0x178   :  { %v586_v57 = vsub.f32 %v2809_v18, %v2329_v42  ;;  %v408_v46 = vadd.f32 %v406_v27, %v404_v1  ;;  %v533_v33 = vadd.f32 %v481_v20, %v2752_v44  ;;  %v534_v0 = vadd.f32 %v482_v15, %v328_v4 }
 0x179   :  { %v2831_v37 = vmul.f32 2.2568197, %v409_v30  ;;  %v527_v35 = vmul.f32 0.026784891, %v2760_v61  ;;  %v518_v47 = vmul.f32 0.02595759, %v504_v48  ;;  %v499_v3 = vadd.f32 %v2617_v62, %v465_v22 }
 0x17a   :  { %921 = vrot.lane.b32.xlu1 %v2397_v55, %s2234_s13  ;;  %v2834_v29 = vmul.f32 1.4991704, %v556_v11  ;;  %v2836_v58 = vmul.f32 1.4991704, %v555_v6  ;;  %v500_v7 = vadd.f32 %v2620_v10, %v466_v28  ;;  %v483_v25 = vadd.f32 %v2609_v9, %v393_v8  ;;  %v4265_v10 = vld [vmem:[#allocation18_spill] sm:$0xff] }
 0x17b   :  { %919 = vrot.lane.b32.xlu0 %v2399_v56, %s2234_s13  ;;  %917 = vrot.lane.b32.xlu2 %v4263_v38, %s2234_s13  ;;  %v520_v14 = vmul.f32 0.02768159, %v2716_v19  ;;  %v410_v61 = vadd.f32 %v408_v46, %v360_v17  ;;  %v535_v48 = vmul.f32 1.5029395, %v533_v33  ;;  %v2844_v32 = vmul.f32 1.5029395, %v534_v0 }
 0x17c   :  { %v512_v24 = vpop.permute.xlu1 %511  ;;  %v394_v62 = vadd.f32 %v2779_v52, %v2641_v36  ;;  %v609_v9 = vsub.f32 %v2831_v37, %v2333_v43  ;;  %v449_v19 = vadd.f32 %v447_v26, %v4265_v10  ;;  %v560_v63 = vsub.f32 %v2834_v29, %v2329_v42 }
 0x17d   :  { %v510_v59 = vpop.permute.xlu0 %509  ;;  %v2826_v21 = vpop.permute.xlu2 %647  ;;  %v524_v4 = vmul.f32 0.028899767, %v512_v24  ;;  %v522_v60 = vadd.f32 %v520_v14, %v518_v47  ;;  %v559_v53 = vsub.f32 %v2836_v58, %v2333_v43  ;;  %v2859_v2 = vmul.f32 2.2564495, %v499_v3  ;;  %v4268_v47 = vld [vmem:[#allocation11_spill] sm:$0xff] }
 0x17e   :  { %v523_v23 = vmul.f32 0.028899767, %v510_v59  ;;  %v2861_v36 = vmul.f32 2.2564495, %v500_v7  ;;  %v2864_v17 = vand.u32 2147483647, %v586_v57  ;;  %v537_v30 = vsub.f32 %v535_v48, %v2333_v43 }
 0x17f   :  { %v526_v1 = vadd.f32 %v524_v4, %v522_v60  ;;  %v2866_v27 = vmul.f32 2.2568197, %v410_v61  ;;  %v538_v41 = vsub.f32 %v2844_v32, %v2329_v42  ;;  %v484_v6 = vadd.f32 %v2655_v16, %v394_v62  ;;  %v4269_v7 = vld [vmem:[#allocation27_spill] sm:$0xff] }
 0x180   :  { %v525_v50 = vadd.f32 %v523_v23, %v521_v13  ;;  %v561_v28 = vand.u32 2147483647, %v559_v53  ;;  %v597_v59 = vsub.f32 %v2859_v2, %v2333_v43  ;;  %v598_v8 = vsub.f32 %v2861_v36, %v2329_v42  ;;  %v4267_v23 = vld [vmem:[#allocation29_spill] sm:$0xff] }
 0x181   :  { %v2878_v13 = vand.u32 2147483647, %v560_v63  ;;  %v450_v57 = vadd.f32 %v2790_v49, %v4267_v23  ;;  %v539_v16 = vand.u32 2147483647, %v537_v30  ;;  %v540_v0 = vand.u32 2147483647, %v538_v41 }
 0x182   :  { %v529_v44 = vadd.f32 %v527_v35, %v525_v50  ;;  %993 = vrot.lane.b32.xlu1 %v4262_v54, %s2237_s14  ;;  %v656_v35 = vmul.f32 0.024441058, %v2788_v45  ;;  %v4270_v49 = vld [vmem:[#allocation12_spill] sm:$0xff]  ;;  %v599_v4 = vand.u32 2147483647, %v597_v59 }
 0x183   :  { %991 = vrot.lane.b32.xlu0 %v4264_v51, %s2237_s14  ;;  %989 = vrot.lane.b32.xlu2 %v4266_v5, %s2237_s14  ;;  %v2894_v61 = vand.u32 2147483647, %v598_v8 }
 0x184   :  { %v531_v40 = vadd.f32 %v529_v44, %v483_v25  ;;  %v640_v54 = vpop.permute.xlu1 %639 }
 0x185   :  { %v516_v52 = vpop.permute.xlu0 %515  ;;  %v654_v20 = vpop.permute.xlu2 %653  ;;  %v655_v53 = vmul.f32 0.024441058, %v640_v54 }
 0x186   :  { %v541_v39 = vadd.f32 %v531_v40, %v2794_v12  ;;  %v569_v26 = vadd.f32 %v531_v40, %v449_v19  ;;  %v528_v15 = vmul.f32 0.026784891, %v516_v52  ;;  %v2872_v12 = vand.u32 2147483647, %v609_v9 }
 0x187   :  { %v619_v63 = vmul.f32 2.2468686, %v531_v40 }
 0x188   :  { %v543_v24 = vmul.f32 1.5023419, %v541_v39  ;;  %v571_v11 = vmul.f32 1.5005071, %v569_v26  ;;  %v530_v22 = vadd.f32 %v528_v15, %v526_v1  ;;  %v661_v1 = vmul.f32 0.028036097, %v2826_v21 }
 0x189   :  { %v621_v59 = vsub.f32 %v619_v63, %v2333_v43 }
 0x18a   :  { %v545_v46 = vsub.f32 %v543_v24, %v2333_v43  ;;  %v532_v33 = vadd.f32 %v530_v22, %v484_v6  ;;  %999 = vrot.lane.b32.xlu1 %v4263_v38, %s2237_s14  ;;  %v573_v3 = vsub.f32 %v571_v11, %v2333_v43  ;;  %v610_v38 = vsub.f32 %v2866_v27, %v2329_v42  ;;  %v2902_v6 = vld [vmem:[#allocation2] sm:$0xff] }
 0x18b   :  { %997 = vrot.lane.b32.xlu0 %v4268_v47, %s2237_s14  ;;  %995 = vrot.lane.b32.xlu2 %v4270_v49, %s2237_s14  ;;  %4271 = vst [vmem:[#allocation15_spill] sm:$0xff] %v2902_v6  ;;  %v666_v22 = vmul.f32 0.029074388, %v654_v20  ;;  %v2938_v49 = vld [vmem:[#allocation2 + $0x8] sm:$0xff] }
 0x18c   :  { %v547_v50 = vand.u32 2147483647, %v545_v46  ;;  %v542_v25 = vadd.f32 %v532_v33, %v4269_v7  ;;  %v570_v14 = vadd.f32 %v532_v33, %v450_v57  ;;  %v646_v44 = vpop.permute.xlu1 %645  ;;  %v575_v52 = vand.u32 2147483647, %v573_v3  ;;  %4274 = vst [vmem:[#allocation19_spill] sm:$0xff] %v2938_v49 }
 0x18d   :  { %v644_v45 = vpop.permute.xlu0 %643  ;;  %v658_v51 = vmul.f32 0.026470734, %v646_v44  ;;  %v2896_v10 = vpop.permute.xlu2 %703  ;;  %v612_v44 = vand.u32 2147483647, %v610_v38 }
 0x18e   :  { %vm549_vm2 = vcmp.lt.f32.partialorder %v547_v50, %v539_v16  ;;  %v544_v62 = vmul.f32 1.5023419, %v542_v25  ;;  %v572_v9 = vmul.f32 1.5005071, %v570_v14  ;;  %v657_v19 = vmul.f32 0.026470734, %v644_v45 }
 0x18f   :  { %v551_v60 = vsel %vm549_vm2, %v543_v24, %v535_v48  ;;  %v553_v5 = vsel %vm549_vm2, %v547_v50, %v539_v16  ;;  %v660_v24 = vadd.f32 %v658_v51, %v656_v35  ;;  %v2932_v25 = vld [vmem:[#allocation2 + $0x18] sm:$0xff]  ;;  %v717_v51 = vmul.f32 0.028550973, %v2896_v10 }
 0x190   :  { %vm563_vm3 = vcmp.lt.f32.partialorder %v561_v28, %v553_v5  ;;  %v546_v39 = vsub.f32 %v544_v62, %v2329_v42  ;;  %v574_v26 = vsub.f32 %v572_v9, %v2329_v42  ;;  %v659_v41 = vadd.f32 %v657_v19, %v655_v53  ;;  %4273 = vst [vmem:[#allocation16_spill] sm:$0xff] %v2932_v25 }
 0x191   :  { %v565_v15 = vsel %vm563_vm3, %v2836_v58, %v551_v60  ;;  %v567_v30 = vsel %vm563_vm3, %v561_v28, %v553_v5  ;;  %v620_v28 = vmul.f32 2.2468686, %v532_v33 }
 0x192   :  { %vm577_vm4 = vcmp.lt.f32.partialorder %v575_v52, %v567_v30  ;;  %v548_v48 = vand.u32 2147483647, %v546_v39  ;;  %1128 = vrot.lane.b32.xlu1 %v2902_v6, %s2234_s13  ;;  %v663_v21 = vadd.f32 %v661_v1, %v659_v41  ;;  %v576_v58 = vand.u32 2147483647, %v574_v26  ;;  %v2957_v39 = vld [vmem:[#allocation2 + $0x48] sm:$0xff] }
 0x193   :  { %v579_v40 = vsel %vm577_vm4, %v571_v11, %v565_v15  ;;  %v581_v54 = vsel %vm577_vm4, %v575_v52, %v567_v30  ;;  %1003 = vrot.lane.b32.xlu0 %v2397_v55, %s2237_s14  ;;  %1001 = vrot.lane.b32.xlu2 %v2399_v56, %s2237_s14  ;;  %4275 = vst [vmem:[#allocation21_spill] sm:$0xff] %v2957_v39 }
 0x194   :  { %vm589_vm5 = vcmp.lt.f32.partialorder %v2824_v34, %v581_v54  ;;  %vm550_vm6 = vcmp.lt.f32.partialorder %v548_v48, %v540_v0  ;;  %v652_v20 = vpop.permute.xlu1 %651 }
 0x195   :  { %v591_v8 = vsel %vm589_vm5, %v2786_v31, %v579_v40  ;;  %v593_v11 = vsel %vm589_vm5, %v2824_v34, %v581_v54  ;;  %v552_v23 = vsel %vm550_vm6, %v544_v62, %v2844_v32  ;;  %v554_v43 = vsel %vm550_vm6, %v548_v48, %v540_v0  ;;  %v650_v57 = vpop.permute.xlu0 %649  ;;  %v2916_v55 = vpop.permute.xlu2 %709  ;;  %v2922_v32 = vld [vmem:[#allocation2 + $0x9] sm:$0xff] }
 0x196   :  { %vm601_vm7 = vcmp.lt.f32.partialorder %v599_v4, %v593_v11  ;;  %vm564_vm8 = vcmp.lt.f32.partialorder %v2878_v13, %v554_v43  ;;  %v662_v46 = vmul.f32 0.028036097, %v650_v57  ;;  %v665_v16 = vmul.f32 0.029074388, %v652_v20 }
 0x197   :  { %v603_v33 = vsel %vm601_vm7, %v2859_v2, %v591_v8  ;;  %v605_v35 = vsel %vm601_vm7, %v599_v4, %v593_v11  ;;  %v566_v56 = vsel %vm564_vm8, %v2834_v29, %v552_v23  ;;  %v568_v31 = vsel %vm564_vm8, %v2878_v13, %v554_v43  ;;  %v2927_v2 = vld [vmem:[#allocation2 + $0x20] sm:$0xff]  ;;  %v2973_v11 = vld [vmem:[#allocation2 + $0x50] sm:$0xff] }
 0x198   :  { %vm613_vm9 = vcmp.lt.f32.partialorder %v2872_v12, %v605_v35  ;;  %v623_v34 = vand.u32 2147483647, %v621_v59  ;;  %vm578_vm10 = vcmp.lt.f32.partialorder %v576_v58, %v568_v31  ;;  %v622_v0 = vsub.f32 %v620_v28, %v2922_v32  ;;  %4272 = vst [vmem:[#allocation17_spill] sm:$0xff] %v2927_v2 }
 0x199   :  { %v615_v47 = vsel %vm613_vm9, %v2831_v37, %v603_v33  ;;  %v617_v50 = vsel %vm613_vm9, %v2872_v12, %v605_v35  ;;  %v580_v3 = vsel %vm578_vm10, %v572_v9, %v566_v56  ;;  %v582_v7 = vsel %vm578_vm10, %v576_v58, %v568_v31  ;;  %4278 = vst [vmem:[#allocation24_spill] sm:$0xff] %v2973_v11 }
 0x19a   :  { %vm625_vm11 = vcmp.lt.f32.partialorder %v623_v34, %v617_v50  ;;  %vm590_vm12 = vcmp.lt.f32.partialorder %v2864_v17, %v582_v7  ;;  %v664_v29 = vadd.f32 %v662_v46, %v660_v24  ;;  %v2930_v13 = vadd.f32 %v665_v16, %v663_v21  ;;  %1134 = vrot.lane.b32.xlu1 %v2927_v2, %s2234_s13  ;;  %v2994_v50 = vld [vmem:[#allocation2 + $0x18] sm:$0xff] }
 0x19b   :  { %v627_v14 = vsel %vm625_vm11, %v619_v63, %v615_v47  ;;  %v592_v37 = vsel %vm590_vm12, %v2809_v18, %v580_v3  ;;  %v594_v12 = vsel %vm590_vm12, %v2864_v17, %v582_v7  ;;  %1132 = vrot.lane.b32.xlu0 %v2932_v25, %s2234_s13  ;;  %1130 = vrot.lane.b32.xlu2 %v2938_v49, %s2234_s13  ;;  %v733_v62 = vmul.f32 0.028843168, %v2896_v10  ;;  %v2963_v10 = vld [vmem:[#allocation2 + $0x30] sm:$0xff] }
 0x19c   :  { %629 = vst [vmem:[#allocation6] sm:$0xff] %v627_v14  ;;  %vm602_vm13 = vcmp.lt.f32.partialorder %v2894_v61, %v594_v12  ;;  %v2946_v4 = vadd.f32 %v666_v22, %v664_v29  ;;  %v702_v18 = vpop.permute.xlu1 %701  ;;  %v624_v42 = vand.u32 2147483647, %v622_v0  ;;  %v722_v59 = vmul.f32 0.027119152, %v2916_v55  ;;  %v2991_v0 = vld [vmem:[#allocation2] sm:$0xff] }
 0x19d   :  { %v604_v17 = vsel %vm602_vm13, %v2861_v36, %v592_v37  ;;  %v606_v45 = vsel %vm602_vm13, %v2894_v61, %v594_v12  ;;  %v700_v9 = vpop.permute.xlu0 %699  ;;  %v2954_v38 = vpop.permute.xlu2 %755  ;;  %v2959_v61 = vld [vmem:[#allocation2 + $0x38] sm:$0xff]  ;;  %4277 = vst [vmem:[#allocation22_spill] sm:$0xff] %v2963_v10  ;;  %v716_v26 = vmul.f32 0.027125228, %v702_v18  ;;  %v732_v41 = vmul.f32 0.025015654, %v702_v18 }
 0x19e   :  { %vm614_vm14 = vcmp.lt.f32.partialorder %v612_v44, %v606_v45  ;;  %v715_v19 = vmul.f32 0.027125228, %v700_v9  ;;  %v731_v60 = vmul.f32 0.025015654, %v700_v9  ;;  %4276 = vst [vmem:[#allocation23_spill] sm:$0xff] %v2959_v61 }
 0x19f   :  { %v616_v5 = vsel %vm614_vm14, %v2866_v27, %v604_v17  ;;  %v618_v63 = vsel %vm614_vm14, %v612_v44, %v606_v45  ;;  %v738_v21 = vmul.f32 0.026737671, %v2916_v55  ;;  %v669_v47 = vmul.f32 0.025448479, %v2991_v0 }
 0x1a0   :  { %vm626_vm15 = vcmp.lt.f32.partialorder %v624_v42, %v618_v63  ;;  %v719_v53 = vadd.f32 %v717_v51, %v715_v19  ;;  %v735_v52 = vadd.f32 %v733_v62, %v731_v60  ;;  %v671_v3 = vmul.f32 0.030439768, %v2994_v50  ;;  %v3002_v51 = vld [vmem:[#allocation2 + $0x30] sm:$0xff]  ;;  %v3007_v63 = vld [vmem:[#allocation2 + $0x48] sm:$0xff] }
 0x1a1   :  { %v628_v36 = vsel %vm626_vm15, %v620_v28, %v616_v5  ;;  %v787_v29 = vmul.f32 0.025448479, %v2954_v38  ;;  %v675_v62 = vmul.f32 0.025549721, %v3002_v51 }
 0x1a2   :  { %630 = vst [vmem:[#allocation6 + $0x8] sm:$0xff] %v628_v36  ;;  %1140 = vrot.lane.b32.xlu1 %v2957_v39, %s2234_s13  ;;  %v673_v60 = vadd.f32 %v671_v3, %v669_v47  ;;  %v771_v36 = vmul.f32 0.02539589, %v2954_v38 }
 0x1a3   :  { %1138 = vrot.lane.b32.xlu0 %v2959_v61, %s2234_s13  ;;  %1136 = vrot.lane.b32.xlu2 %v2963_v10, %s2234_s13 }
 0x1a4   :  { %v708_v27 = vpop.permute.xlu1 %707 }
 0x1a5   :  { %v706_v1 = vpop.permute.xlu0 %705  ;;  %v721_v15 = vmul.f32 0.027119152, %v708_v27  ;;  %v737_v30 = vmul.f32 0.026737671, %v708_v27  ;;  %v762_v22 = vpop.permute.xlu2 %761 }
 0x1a6   :  { %v718_v48 = vmul.f32 0.028550973, %v706_v1  ;;  %v734_v24 = vmul.f32 0.028843168, %v706_v1  ;;  %v774_v14 = vmul.f32 0.027667891, %v762_v22 }
 0x1a7   :  { %v723_v40 = vadd.f32 %v721_v15, %v719_v53  ;;  %v739_v54 = vadd.f32 %v737_v30, %v735_v52  ;;  %v790_v44 = vmul.f32 0.030439768, %v762_v22  ;;  %v679_v53 = vmul.f32 0.030145109, %v3007_v63  ;;  %v2131_v15 = vld [vmem:[#allocation2 + $0x20] sm:$0xff] }
 0x1a8   :  { %v720_v58 = vadd.f32 %v718_v48, %v716_v26  ;;  %v736_v28 = vadd.f32 %v734_v24, %v732_v41  ;;  %v677_v52 = vadd.f32 %v675_v62, %v673_v60  ;;  %v2130_v26 = vld [vmem:[#allocation2 + $0x8] sm:$0xff]  ;;  %v672_v30 = vmul.f32 0.030439768, %v2131_v15 }
 0x1a9   :  { %v670_v1 = vmul.f32 0.025448479, %v2130_v26 }
 0x1aa   :  { %1190 = vrot.lane.b32.xlu1 %v2938_v49, %s2237_s14  ;;  %v724_v20 = vadd.f32 %v722_v59, %v720_v58  ;;  %v740_v8 = vadd.f32 %v738_v21, %v736_v28  ;;  %v2132_v59 = vld [vmem:[#allocation2 + $0x38] sm:$0xff]  ;;  %v3017_v58 = vadd.f32 %v679_v53, %v677_v52  ;;  %v686_v53 = vmul.f32 0.02539589, %v2130_v26 }
 0x1ab   :  { %1188 = vrot.lane.b32.xlu0 %v2902_v6, %s2237_s14  ;;  %1142 = vrot.lane.b32.xlu2 %v2973_v11, %s2234_s13  ;;  %v676_v21 = vmul.f32 0.025549721, %v2132_v59  ;;  %v688_v52 = vmul.f32 0.027667891, %v2131_v15 }
 0x1ac   :  { %v714_v23 = vpop.permute.xlu1 %713 }
 0x1ad   :  { %v712_v43 = vpop.permute.xlu0 %711  ;;  %v726_v57 = vmul.f32 0.028839631, %v714_v23  ;;  %v742_v46 = vmul.f32 0.026210368, %v714_v23  ;;  %v768_v55 = vpop.permute.xlu2 %767 }
 0x1ae   :  { %v725_v16 = vmul.f32 0.028839631, %v712_v43  ;;  %v741_v33 = vmul.f32 0.026210368, %v712_v43  ;;  %v781_v28 = vmul.f32 0.029749155, %v768_v55  ;;  %v674_v43 = vadd.f32 %v672_v30, %v670_v1 }
 0x1af   :  { %v2979_v35 = vadd.f32 %v726_v57, %v724_v20  ;;  %v2981_v56 = vadd.f32 %v742_v46, %v740_v8  ;;  %v797_v20 = vmul.f32 0.030145109, %v768_v55  ;;  %v2133_v57 = vld [vmem:[#allocation2 + $0x50] sm:$0xff]  ;;  %v3031_v55 = vld [vmem:[#allocation2 + $0x1] sm:$0xff] }
 0x1b0   :  { %v2983_v31 = vadd.f32 %v725_v16, %v723_v40  ;;  %v2985_v34 = vadd.f32 %v741_v33, %v739_v54  ;;  %v680_v46 = vmul.f32 0.030145109, %v2133_v57  ;;  %v3019_v16 = vld [vmem:[#allocation2 + $0x19] sm:$0xff]  ;;  %v683_v33 = vadd.f32 %v3017_v58, %v2930_v13  ;;  %4282 = vst [vmem:[#allocation25_spill] sm:$0xff] %v3031_v55  ;;  %v3061_v1 = vld [vmem:[#allocation2 + $0x31] sm:$0xff]  ;;  %v3067_v30 = vld [vmem:[#allocation2 + $0x1] sm:$0xff] }
 0x1b1   :  { %4279 = vst [vmem:[#allocation20_spill] sm:$0xff] %v3019_v16  ;;  %v696_v15 = vmul.f32 0.029749155, %v2133_v57  ;;  %v802_v57 = vmul.f32 0.025015654, %v2922_v32 }
 0x1b2   :  { %1196 = vrot.lane.b32.xlu1 %v2963_v10, %s2237_s14  ;;  %4286 = vst [vmem:[#allocation13_spill] sm:$0xff] %v3061_v1 }
 0x1b3   :  { %1194 = vrot.lane.b32.xlu0 %v2927_v2, %s2237_s14  ;;  %1192 = vrot.lane.b32.xlu2 %v2932_v25, %s2237_s14 }
 0x1b4   :  { %v760_v7 = vpop.permute.xlu1 %759 }
 0x1b5   :  { %v758_v37 = vpop.permute.xlu0 %757  ;;  %v789_v12 = vmul.f32 0.030439768, %v760_v7  ;;  %v3000_v18 = vpop.permute.xlu2 %851  ;;  %v773_v5 = vmul.f32 0.027667891, %v760_v7 }
 0x1b6   :  { %v772_v17 = vmul.f32 0.02539589, %v758_v37  ;;  %v788_v45 = vmul.f32 0.025448479, %v758_v37 }
 0x1b7   :  { %v791_v9 = vadd.f32 %v789_v12, %v787_v29  ;;  %v775_v48 = vadd.f32 %v773_v5, %v771_v36  ;;  %v3027_v29 = vld [vmem:[#allocation2 + $0x9] sm:$0xff] }
 0x1b8   :  { %v776_v42 = vadd.f32 %v774_v14, %v772_v17  ;;  %v792_v19 = vadd.f32 %v790_v44, %v788_v45  ;;  %4281 = vst [vmem:[#allocation31_spill] sm:$0xff] %v3027_v29  ;;  %v678_v14 = vadd.f32 %v676_v21, %v674_v43  ;;  %v834_v21 = vmul.f32 0.027396597, %v2922_v32 }
 0x1ba   :  { %1202 = vrot.lane.b32.xlu1 %v2973_v11, %s2237_s14  ;;  %v3042_v44 = vadd.f32 %v680_v46, %v678_v14 }
 0x1bb   :  { %1200 = vrot.lane.b32.xlu0 %v2957_v39, %s2237_s14  ;;  %1198 = vrot.lane.b32.xlu2 %v2959_v61, %s2237_s14 }
 0x1bc   :  { %v766_v27 = vpop.permute.xlu1 %765 }
 0x1bd   :  { %v764_v41 = vpop.permute.xlu0 %763  ;;  %v794_v22 = vmul.f32 0.025549721, %v766_v27  ;;  %v3015_v24 = vpop.permute.xlu2 %857  ;;  %v778_v7 = vmul.f32 0.028472466, %v766_v27  ;;  %v3055_v27 = vld [vmem:[#allocation2 + $0x39] sm:$0xff] }
 0x1be   :  { %v777_v40 = vmul.f32 0.028472466, %v764_v41  ;;  %v793_v54 = vmul.f32 0.025549721, %v764_v41  ;;  %4284 = vst [vmem:[#allocation30_spill] sm:$0xff] %v3055_v27 }
 0x1bf   :  { %v796_v38 = vadd.f32 %v794_v22, %v792_v19  ;;  %v780_v17 = vadd.f32 %v778_v7, %v776_v42  ;;  %v684_v19 = vadd.f32 %v3042_v44, %v2946_v4  ;;  %v3059_v42 = vld [vmem:[#allocation2 + $0x21] sm:$0xff]  ;;  %v692_v4 = vmul.f32 0.028472466, %v2132_v59 }
 0x1c0   :  { %v779_v8 = vadd.f32 %v777_v40, %v775_v48  ;;  %v795_v23 = vadd.f32 %v793_v54, %v791_v9  ;;  %4285 = vst [vmem:[#allocation32_spill] sm:$0xff] %v3059_v42  ;;  %v801_v41 = vmul.f32 0.025015654, %v3067_v30  ;;  %v3072_v48 = vld [vmem:[#allocation2 + $0x19] sm:$0xff]  ;;  %v690_v54 = vadd.f32 %v688_v52, %v686_v53  ;;  %v3088_v53 = vld [vmem:[#allocation2 + $0x49] sm:$0xff]  ;;  %v3090_v52 = vld [vmem:[#allocation2 + $0x51] sm:$0xff] }
 0x1c1   :  { %v803_v40 = vmul.f32 0.028843168, %v3072_v48  ;;  %v840_v46 = vmul.f32 0.027348952, %v3055_v27  ;;  %4288 = vst [vmem:[#allocation9_spill] sm:$0xff] %v3088_v53 }
 0x1c2   :  { %v3023_v47 = vadd.f32 %v781_v28, %v779_v8  ;;  %v3025_v3 = vadd.f32 %v797_v20, %v795_v23  ;;  %1248 = vrot.lane.b32.xlu1 %v3019_v16, %s2234_s13  ;;  %v807_v23 = vmul.f32 0.026737671, %v3061_v1  ;;  %v694_v43 = vadd.f32 %v692_v4, %v690_v54  ;;  %4289 = vst [vmem:[#allocation18_spill] sm:$0xff] %v3090_v52  ;;  %v3094_v4 = vld [vmem:[#allocation2 + $0x51] sm:$0xff] }
 0x1c3   :  { %1246 = vrot.lane.b32.xlu0 %v3027_v29, %s2234_s13  ;;  %1244 = vrot.lane.b32.xlu2 %v3031_v55, %s2234_s13  ;;  %v844_v54 = vmul.f32 0.028675977, %v3094_v4  ;;  %v871_v11 = vmul.f32 0.029122425, %v3015_v24 }
 0x1c4   :  { %4280 = vst [vmem:[#allocation26_spill] sm:$0xff] %v3023_v47  ;;  %v3036_v37 = vadd.f32 %v3023_v47, %v683_v33  ;;  %v3040_v13 = vpop.permute.xlu1 %849  ;;  %v808_v33 = vmul.f32 0.026737671, %v3055_v27 }
 0x1c5   :  { %v770_v12 = vpop.permute.xlu0 %769  ;;  %v3044_v45 = vpop.permute.xlu2 %863  ;;  %v865_v8 = vmul.f32 0.025485108, %v3040_v13 }
 0x1c6   :  { %v782_v62 = vmul.f32 0.029749155, %v770_v12  ;;  %v798_v9 = vmul.f32 0.030145109, %v770_v12  ;;  %v805_v12 = vadd.f32 %v803_v40, %v801_v41  ;;  %v3100_v41 = vld [vmem:[#allocation2 + $0x49] sm:$0xff] }
 0x1c7   :  { %4290 = vst [vmem:[#allocation10_spill] sm:$0xff] %v3100_v41 }
 0x1c8   :  { %v3048_v60 = vadd.f32 %v782_v62, %v780_v17  ;;  %v3050_v5 = vadd.f32 %v798_v9, %v796_v38  ;;  %v3076_v38 = vld [vmem:[#allocation2 + $0x21] sm:$0xff]  ;;  %v698_v17 = vadd.f32 %v696_v15, %v694_v43  ;;  %v809_v15 = vadd.f32 %v807_v23, %v805_v12 }
 0x1c9   :  { %4287 = vst [vmem:[#allocation14_spill] sm:$0xff] %v3076_v38  ;;  %v836_v59 = vmul.f32 0.026205353, %v3076_v38  ;;  %v804_v7 = vmul.f32 0.028843168, %v3076_v38 }
 0x1ca   :  { %4283 = vst [vmem:[#allocation28_spill] sm:$0xff] %v3048_v60  ;;  %v3053_v36 = vadd.f32 %v3048_v60, %v684_v19  ;;  %1254 = vrot.lane.b32.xlu1 %v3055_v27, %s2234_s13  ;;  %v746_v43 = vadd.f32 %v2981_v56, %v698_v17  ;;  %v876_v60 = vmul.f32 0.02862577, %v3044_v45  ;;  %v894_v56 = vmul.f32 0.026066244, %v3044_v45 }
 0x1cb   :  { %1252 = vrot.lane.b32.xlu0 %v3061_v1, %s2234_s13  ;;  %1250 = vrot.lane.b32.xlu2 %v3059_v42, %s2234_s13  ;;  %v838_v62 = vadd.f32 %v836_v59, %v834_v21  ;;  %v866_v21 = vmul.f32 0.025485108, %v3000_v18  ;;  %v884_v59 = vmul.f32 0.026779208, %v3000_v18 }
 0x1cc   :  { %v856_v26 = vpop.permute.xlu1 %855 }
 0x1cd   :  { %v3070_v22 = vpop.permute.xlu0 %853  ;;  %v3079_v28 = vpop.permute.xlu2 %911  ;;  %v868_v9 = vmul.f32 0.029049946, %v856_v26  ;;  %v886_v19 = vmul.f32 0.028736651, %v856_v26  ;;  %v811_v26 = vmul.f32 0.026210368, %v3100_v41  ;;  %v842_v40 = vadd.f32 %v840_v46, %v838_v62 }
 0x1ce   :  { %v867_v20 = vmul.f32 0.029049946, %v3070_v22 }
 0x1cf   :  { %v870_v61 = vadd.f32 %v868_v9, %v866_v21  ;;  %v888_v46 = vadd.f32 %v886_v19, %v884_v59  ;;  %v846_v49 = vadd.f32 %v844_v54, %v842_v40  ;;  %v3114_v2 = vadd.f32 %v811_v26, %v809_v15  ;;  %v2141_v26 = vld [vmem:[#allocation2 + $0x22] sm:$0xff] }
 0x1d0   :  { %v869_v14 = vadd.f32 %v867_v20, %v865_v8  ;;  %v812_v20 = vmul.f32 0.026210368, %v3094_v4  ;;  %v687_v19 = vmul.f32 0.027667891, %v2994_v50  ;;  %v3161_v54 = vmul.f32 0.027125228, %v3067_v30 }
 0x1d1   :  { %v848_v17 = vadd.f32 %v846_v49, %v746_v43  ;;  %v833_v15 = vmul.f32 0.027396597, %v3067_v30  ;;  %v958_v40 = vmul.f32 0.028736651, %v2141_v26  ;;  %v691_v21 = vmul.f32 0.028472466, %v3002_v51 }
 0x1d2   :  { %1338 = vrot.lane.b32.xlu1 %v3031_v55, %s2237_s14  ;;  %v806_v55 = vadd.f32 %v804_v7, %v802_v57  ;;  %v873_v12 = vadd.f32 %v871_v11, %v869_v14  ;;  %v3122_v7 = vadd.f32 %v3114_v2, %v3036_v37  ;;  %v2142_v59 = vld [vmem:[#allocation2 + $0x2] sm:$0xff]  ;;  %v2143_v43 = vld [vmem:[#allocation2 + $0xa] sm:$0xff] }
 0x1d3   :  { %1258 = vrot.lane.b32.xlu0 %v3090_v52, %s2234_s13  ;;  %1256 = vrot.lane.b32.xlu2 %v3088_v53, %s2234_s13 }
 0x1d4   :  { %v3108_v8 = vpop.permute.xlu1 %861  ;;  %v810_v25 = vadd.f32 %v808_v33, %v806_v55 }
 0x1d5   :  { %v860_v23 = vpop.permute.xlu0 %859  ;;  %v875_v10 = vmul.f32 0.02862577, %v3108_v8  ;;  %v3112_v62 = vpop.permute.xlu2 %917 }
 0x1d6   :  { %v872_v39 = vmul.f32 0.029122425, %v860_v23  ;;  %v890_v18 = vmul.f32 0.02780426, %v860_v23  ;;  %v3126_v9 = vadd.f32 %v812_v20, %v810_v25  ;;  %v955_v20 = vmul.f32 0.026779208, %v2142_v59 }
 0x1d7   :  { %v3116_v6 = vadd.f32 %v875_v10, %v873_v12  ;;  %v956_v23 = vmul.f32 0.026779208, %v2143_v43  ;;  %v974_v12 = vmul.f32 0.025485108, %v2143_v43 }
 0x1d8   :  { %v874_v57 = vadd.f32 %v872_v39, %v870_v61  ;;  %v892_v11 = vadd.f32 %v890_v18, %v888_v46  ;;  %4291 = vst [vmem:[#allocation29_spill] sm:$0xff] %v3126_v9  ;;  %v3139_v39 = vadd.f32 %v3126_v9, %v3053_v36  ;;  %v685_v36 = vmul.f32 0.02539589, %v2991_v0  ;;  %v2144_v46 = vld [vmem:[#allocation2 + $0x1a] sm:$0xff] }
 0x1d9   :  { %v879_v14 = vadd.f32 %v3116_v6, %v2983_v31  ;;  %v976_v0 = vmul.f32 0.029049946, %v2141_v26  ;;  %v957_v30 = vmul.f32 0.028736651, %v2144_v46 }
 0x1da   :  { %v3128_v55 = vadd.f32 %v876_v60, %v874_v57  ;;  %v896_v10 = vadd.f32 %v894_v56, %v892_v11  ;;  %1344 = vrot.lane.b32.xlu1 %v3059_v42, %s2237_s14  ;;  %v689_v56 = vadd.f32 %v687_v19, %v685_v36  ;;  %v695_v57 = vmul.f32 0.029749155, %v3007_v63 }
 0x1db   :  { %v3133_v45 = vadd.f32 %v879_v14, %v3122_v7  ;;  %1342 = vrot.lane.b32.xlu0 %v3019_v16, %s2237_s14  ;;  %1340 = vrot.lane.b32.xlu2 %v3027_v29, %s2237_s14  ;;  %v973_v11 = vmul.f32 0.025485108, %v2142_v59  ;;  %v975_v14 = vmul.f32 0.029049946, %v2144_v46  ;;  %v839_v42 = vmul.f32 0.027348952, %v3061_v1 }
 0x1dc   :  { %4292 = vst [vmem:[#allocation11_spill] sm:$0xff] %v3128_v55  ;;  %v880_v25 = vadd.f32 %v3128_v55, %v2979_v35  ;;  %v3143_v49 = vadd.f32 %v896_v10, %v848_v17  ;;  %v3147_v61 = vpop.permute.xlu1 %909  ;;  %v818_v17 = vmul.f32 0.027125228, %v2922_v32  ;;  %v823_v10 = vmul.f32 0.027119152, %v3061_v1  ;;  %v2146_v29 = vld [vmem:[#allocation2 + $0x3a] sm:$0xff] }
 0x1dd   :  { %v3149_v37 = vpop.permute.xlu0 %907  ;;  %v3154_v33 = vpop.permute.xlu2 %989  ;;  %v962_v16 = vmul.f32 0.02780426, %v2146_v29  ;;  %v960_v36 = vadd.f32 %v958_v40, %v956_v23  ;;  %v3177_v19 = vadd.f32 %v976_v0, %v974_v12  ;;  %v820_v63 = vmul.f32 0.028550973, %v3076_v38  ;;  %v3180_v59 = vld [vmem:[#allocation2 + $0x2] sm:$0xff]  ;;  %v3182_v46 = vld [vmem:[#allocation2 + $0xa] sm:$0xff] }
 0x1de   :  { %4293 = vst [vmem:[#allocation27_spill] sm:$0xff] %v3143_v49  ;;  %v3152_v60 = vadd.f32 %v880_v25, %v3139_v39  ;;  %v2145_v25 = vld [vmem:[#allocation2 + $0x32] sm:$0xff]  ;;  %v959_v49 = vadd.f32 %v957_v30, %v955_v20  ;;  %v977_v32 = vadd.f32 %v975_v14, %v973_v11  ;;  %v3184_v47 = vmul.f32 0.029122425, %v2146_v29  ;;  %v2147_v55 = vld [vmem:[#allocation2 + $0x4a] sm:$0xff] }
 0x1df   :  { %v961_v26 = vmul.f32 0.02780426, %v2145_v25  ;;  %v979_v43 = vmul.f32 0.029122425, %v2145_v25  ;;  %4295 = vst [vmem:[#allocation33_spill] sm:$0xff] %v3180_v59  ;;  %v2148_v0 = vld [vmem:[#allocation2 + $0x52] sm:$0xff]  ;;  %v3202_v30 = vadd.f32 %v962_v16, %v960_v36 }
 0x1e0   :  { %4296 = vst [vmem:[#allocation34_spill] sm:$0xff] %v3182_v46  ;;  %v3193_v20 = vmul.f32 0.02862577, %v2147_v55  ;;  %v3195_v23 = vmul.f32 0.026066244, %v2148_v0  ;;  %v3223_v38 = vld [vmem:[#allocation2 + $0x32] sm:$0xff] }
 0x1e1   :  { %v3191_v40 = vadd.f32 %v961_v26, %v959_v49  ;;  %v819_v29 = vmul.f32 0.028550973, %v3072_v48  ;;  %v3200_v12 = vadd.f32 %v979_v43, %v977_v32  ;;  %v3204_v11 = vmul.f32 0.02862577, %v2148_v0  ;;  %4297 = vst [vmem:[#allocation35_spill] sm:$0xff] %v3223_v38 }
 0x1e2   :  { %1350 = vrot.lane.b32.xlu1 %v3088_v53, %s2237_s14  ;;  %v693_v53 = vadd.f32 %v691_v21, %v689_v56  ;;  %v3186_v21 = vmul.f32 0.026066244, %v2147_v55  ;;  %v835_v56 = vmul.f32 0.026205353, %v3072_v48  ;;  %v822_v49 = vadd.f32 %v820_v63, %v818_v17 }
 0x1e3   :  { %1348 = vrot.lane.b32.xlu0 %v3055_v27, %s2237_s14  ;;  %1346 = vrot.lane.b32.xlu2 %v3061_v1, %s2237_s14  ;;  %v824_v25 = vmul.f32 0.027119152, %v3055_v27  ;;  %v828_v26 = vmul.f32 0.028839631, %v3094_v4  ;;  %v843_v16 = vmul.f32 0.028675977, %v3100_v41  ;;  %v821_v17 = vadd.f32 %v819_v29, %v3161_v54 }
 0x1e4   :  { %v3169_v50 = vpop.permute.xlu1 %915  ;;  %v697_v14 = vadd.f32 %v695_v57, %v693_v53  ;;  %v837_v43 = vadd.f32 %v835_v56, %v833_v15  ;;  %v923_v36 = vmul.f32 0.027396597, %v3149_v37  ;;  %v924_v53 = vmul.f32 0.027396597, %v3147_v61 }
 0x1e5   :  { %v914_v18 = vpop.permute.xlu0 %913  ;;  %v3172_v51 = vpop.permute.xlu2 %995  ;;  %v827_v63 = vmul.f32 0.028839631, %v3100_v41  ;;  %v883_v4 = vmul.f32 0.026779208, %v3040_v13  ;;  %v925_v0 = vmul.f32 0.026205353, %v3079_v28  ;;  %v825_v9 = vadd.f32 %v823_v10, %v821_v17 }
 0x1e6   :  { %4294 = vst [vmem:[#allocation12_spill] sm:$0xff] %v3172_v51  ;;  %v926_v1 = vmul.f32 0.026205353, %v914_v18  ;;  %v942_v57 = vmul.f32 0.028843168, %v914_v18  ;;  %v3227_v13 = vld [vmem:[#allocation2 + $0x1a] sm:$0xff] }
 0x1e7   :  { %v940_v15 = vmul.f32 0.025015654, %v3147_v61  ;;  %v929_v27 = vmul.f32 0.027348952, %v3169_v50  ;;  %v941_v18 = vmul.f32 0.028843168, %v3079_v28  ;;  %v927_v41 = vadd.f32 %v925_v0, %v923_v36 }
 0x1e8   :  { %v928_v56 = vadd.f32 %v926_v1, %v924_v53  ;;  %v930_v29 = vmul.f32 0.027348952, %v3112_v62  ;;  %v3229_v51 = vld [vmem:[#allocation2 + $0x22] sm:$0xff]  ;;  %v945_v1 = vmul.f32 0.026737671, %v3169_v50  ;;  %v745_v0 = vadd.f32 %v2985_v34, %v697_v14 }
 0x1e9   :  { %4298 = vst [vmem:[#allocation36_spill] sm:$0xff] %v3229_v51  ;;  %v889_v28 = vmul.f32 0.02780426, %v3015_v24  ;;  %v946_v10 = vmul.f32 0.026737671, %v3112_v62  ;;  %v931_v53 = vadd.f32 %v929_v27, %v927_v41  ;;  %v967_v27 = vadd.f32 %v3186_v21, %v3191_v40  ;;  %v3260_v21 = vld [vmem:[#allocation2 + $0x4a] sm:$0xff] }
 0x1ea   :  { %1398 = vrot.lane.b32.xlu1 %v3182_v46, %s2234_s13  ;;  %v885_v46 = vmul.f32 0.028736651, %v3070_v22  ;;  %v939_v22 = vmul.f32 0.025015654, %v3149_v37  ;;  %v932_v17 = vadd.f32 %v930_v29, %v928_v56  ;;  %v3243_v24 = vmul.f32 2.254072, %v3122_v7 }
 0x1eb   :  { %1396 = vrot.lane.b32.xlu0 %v3180_v59, %s2234_s13  ;;  %1352 = vrot.lane.b32.xlu2 %v3090_v52, %s2237_s14  ;;  %v841_v52 = vadd.f32 %v839_v42, %v837_v43  ;;  %v944_v42 = vadd.f32 %v942_v57, %v940_v15  ;;  %v826_v15 = vadd.f32 %v824_v25, %v822_v49  ;;  %v3255_v25 = vld [vmem:[#allocation2 + $0x52] sm:$0xff] }
 0x1ec   :  { %v922_v55 = vpop.permute.xlu1 %921  ;;  %v887_v54 = vadd.f32 %v885_v46, %v883_v4  ;;  %v893_v46 = vmul.f32 0.026066244, %v3108_v8  ;;  %v943_v43 = vadd.f32 %v941_v18, %v939_v22  ;;  %v829_v56 = vadd.f32 %v827_v63, %v825_v9 }
 0x1ed   :  { %v920_v59 = vpop.permute.xlu0 %919  ;;  %v3213_v32 = vpop.permute.xlu2 %1001  ;;  %v934_v37 = vmul.f32 0.028675977, %v922_v55  ;;  %v950_v50 = vmul.f32 0.026210368, %v922_v55  ;;  %v948_v18 = vadd.f32 %v946_v10, %v944_v42  ;;  %v830_v41 = vadd.f32 %v828_v26, %v826_v15  ;;  %v4302_v15 = vld [vmem:[#allocation11_spill] sm:$0xff] }
 0x1ee   :  { %v933_v61 = vmul.f32 0.028675977, %v920_v59  ;;  %v949_v57 = vmul.f32 0.026210368, %v920_v59  ;;  %v947_v8 = vadd.f32 %v945_v1, %v943_v43  ;;  %v845_v59 = vadd.f32 %v843_v16, %v841_v52 }
 0x1ef   :  { %v3253_v14 = vadd.f32 %v3195_v23, %v3202_v30  ;;  %v952_v49 = vadd.f32 %v950_v50, %v948_v18  ;;  %v832_v29 = vadd.f32 %v830_v41, %v3050_v5  ;;  %v1073_v52 = vsub.f32 %v3243_v24, %v3072_v48  ;;  %v3269_v23 = vld [vmem:[#allocation2 + $0x3a] sm:$0xff]  ;;  %v4304_v41 = vld [vmem:[#allocation26_spill] sm:$0xff] }
 0x1f0   :  { %v935_v22 = vadd.f32 %v933_v61, %v931_v53  ;;  %v951_v34 = vadd.f32 %v949_v57, %v947_v8  ;;  %v847_v42 = vadd.f32 %v845_v59, %v745_v0  ;;  %v831_v9 = vadd.f32 %v829_v56, %v3025_v3 }
 0x1f1   :  { %v3281_v26 = vadd.f32 %v2979_v35, %v3042_v44  ;;  %v954_v63 = vadd.f32 %v952_v49, %v832_v29  ;;  %v3290_v10 = vmul.f32 2.254072, %v3139_v39 }
 0x1f2   :  { %1404 = vrot.lane.b32.xlu1 %v3223_v38, %s2234_s13  ;;  %v3247_v38 = vadd.f32 %v934_v37, %v932_v17  ;;  %v953_v16 = vadd.f32 %v951_v34, %v831_v9  ;;  %v729_v37 = vadd.f32 %v2983_v31, %v3017_v58  ;;  %v1015_v31 = vmul.f32 0.029541887, %v3213_v32  ;;  %v4299_v17 = vld [vmem:[#allocation12_spill] sm:$0xff]  ;;  %v4305_v34 = vld [vmem:[#allocation33_spill] sm:$0xff] }
 0x1f3   :  { %1402 = vrot.lane.b32.xlu0 %v3229_v51, %s2234_s13  ;;  %1400 = vrot.lane.b32.xlu2 %v3227_v13, %s2234_s13  ;;  %v891_v51 = vadd.f32 %v889_v28, %v887_v54  ;;  %v982_v54 = vadd.f32 %v3184_v47, %v3177_v19  ;;  %v985_v47 = vadd.f32 %v3193_v20, %v3200_v12  ;;  %v1005_v19 = vmul.f32 0.028323684, %v3154_v33 }
 0x1f4   :  { %v994_v36 = vpop.permute.xlu1 %993  ;;  %v970_v40 = vadd.f32 %v3253_v14, %v3247_v38  ;;  %v881_v20 = vadd.f32 %v3116_v6, %v3114_v2  ;;  %v3300_v6 = vmul.f32 1.4991704, %v3152_v60  ;;  %v3303_v2 = vmul.f32 1.4991704, %v3133_v45  ;;  %v4303_v45 = vld [vmem:[#allocation34_spill] sm:$0xff] }
 0x1f5   :  { %v992_v4 = vpop.permute.xlu0 %991  ;;  %v3245_v62 = vpop.permute.xlu2 %1130  ;;  %v895_v55 = vadd.f32 %v893_v46, %v891_v51  ;;  %v1007_v1 = vmul.f32 0.02587001, %v994_v36  ;;  %v969_v51 = vadd.f32 %v967_v27, %v935_v22  ;;  %v986_v3 = vadd.f32 %v3204_v11, %v982_v54 }
 0x1f6   :  { %v3292_v11 = vand.u32 2147483647, %v1073_v52  ;;  %v1022_v44 = vadd.f32 %v970_v40, %v3139_v39  ;;  %v1006_v58 = vmul.f32 0.028323684, %v992_v4  ;;  %v987_v36 = vadd.f32 %v985_v47, %v953_v16  ;;  %v4300_v39 = vld [vmem:[#allocation14_spill] sm:$0xff]  ;;  %v4301_v4 = vld [vmem:[#allocation29_spill] sm:$0xff] }
 0x1f7   :  { %v897_v5 = vadd.f32 %v895_v55, %v847_v42  ;;  %v1009_v33 = vadd.f32 %v1007_v1, %v1005_v19  ;;  %v1021_v35 = vadd.f32 %v969_v51, %v3122_v7  ;;  %v988_v53 = vadd.f32 %v986_v3, %v954_v63  ;;  %v4306_v19 = vld [vmem:[#allocation27_spill] sm:$0xff] }
 0x1f8   :  { %v971_v57 = vadd.f32 %v967_v27, %v881_v20  ;;  %v1008_v50 = vmul.f32 0.02587001, %v4299_v17  ;;  %v1074_v32 = vsub.f32 %v3290_v10, %v4300_v39  ;;  %v882_v60 = vadd.f32 %v4302_v15, %v4301_v4 }
 0x1f9   :  { %v3296_v46 = vmul.f32 2.2568197, %v897_v5  ;;  %v1023_v8 = vmul.f32 1.5029395, %v1021_v35  ;;  %v3312_v18 = vmul.f32 1.5029395, %v1022_v44  ;;  %v937_v59 = vadd.f32 %v935_v22, %v4304_v41 }
 0x1fa   :  { %1410 = vrot.lane.b32.xlu1 %v3255_v25, %s2234_s13  ;;  %v1010_v55 = vadd.f32 %v1008_v50, %v1006_v58  ;;  %v1048_v54 = vsub.f32 %v3300_v6, %v4300_v39  ;;  %v1047_v29 = vsub.f32 %v3303_v2, %v3072_v48  ;;  %v3325_v42 = vmul.f32 2.2564495, %v987_v36  ;;  %v4307_v58 = vld [vmem:[#allocation28_spill] sm:$0xff]  ;;  %v4308_v50 = vld [vmem:[#allocation35_spill] sm:$0xff] }
 0x1fb   :  { %1408 = vrot.lane.b32.xlu0 %v3260_v21, %s2234_s13  ;;  %1406 = vrot.lane.b32.xlu2 %v3269_v23, %s2234_s13  ;;  %v1097_v27 = vsub.f32 %v3296_v46, %v3072_v48  ;;  %v3327_v1 = vmul.f32 2.2564495, %v988_v53  ;;  %v3329_v5 = vand.u32 2147483647, %v1074_v32  ;;  %v1025_v3 = vsub.f32 %v1023_v8, %v3072_v48 }
 0x1fc   :  { %v1000_v30 = vpop.permute.xlu1 %999  ;;  %v1026_v16 = vsub.f32 %v3312_v18, %v4300_v39  ;;  %v972_v20 = vadd.f32 %v3253_v14, %v882_v60  ;;  %v1085_v35 = vsub.f32 %v3325_v42, %v3072_v48  ;;  %v1145_v17 = vmul.f32 0.027772168, %v3245_v62 }
 0x1fd   :  { %v998_v61 = vpop.permute.xlu0 %997  ;;  %v3287_v12 = vpop.permute.xlu2 %1136  ;;  %v1012_v0 = vmul.f32 0.029244687, %v1000_v30  ;;  %v3332_v30 = vmul.f32 2.2568197, %v4306_v19  ;;  %v1086_v44 = vsub.f32 %v3327_v1, %v4300_v39  ;;  %v1027_v14 = vand.u32 2147483647, %v1025_v3 }
 0x1fe   :  { %v1011_v28 = vmul.f32 0.029244687, %v998_v61 }
 0x1ff   :  { %v1014_v22 = vadd.f32 %v1012_v0, %v1010_v55  ;;  %v1098_v60 = vsub.f32 %v3332_v30, %v4300_v39  ;;  %v3360_v41 = vand.u32 2147483647, %v1086_v44 }
 0x200   :  { %v1013_v43 = vadd.f32 %v1011_v28, %v1009_v33  ;;  %v3338_v28 = vand.u32 2147483647, %v1097_v27  ;;  %v1087_v27 = vand.u32 2147483647, %v1085_v35 }
 0x202   :  { %v1017_v7 = vadd.f32 %v1015_v31, %v1013_v43  ;;  %1482 = vrot.lane.b32.xlu1 %v3227_v13, %s2237_s14  ;;  %v3344_v31 = vand.u32 2147483647, %v1048_v54  ;;  %v938_v43 = vadd.f32 %v3247_v38, %v4307_v58  ;;  %v4309_v38 = vld [vmem:[#allocation36_spill] sm:$0xff] }
 0x203   :  { %1480 = vrot.lane.b32.xlu0 %v4303_v45, %s2237_s14  ;;  %1478 = vrot.lane.b32.xlu2 %v4305_v34, %s2237_s14 }
 0x204   :  { %v1019_v56 = vadd.f32 %v1017_v7, %v971_v57  ;;  %v1129_v49 = vpop.permute.xlu1 %1128  ;;  %v1028_v57 = vand.u32 2147483647, %v1026_v16  ;;  %v1150_v16 = vmul.f32 0.02673731, %v3287_v12 }
 0x205   :  { %v1004_v52 = vpop.permute.xlu0 %1003  ;;  %v1143_v40 = vpop.permute.xlu2 %1142 }
 0x206   :  { %v1029_v9 = vadd.f32 %v1019_v56, %v729_v37  ;;  %v1057_v51 = vadd.f32 %v1019_v56, %v937_v59  ;;  %v1016_v47 = vmul.f32 0.029541887, %v1004_v52  ;;  %v1049_v37 = vand.u32 2147483647, %v1047_v29 }
 0x207   :  { %v1155_v44 = vmul.f32 0.028920362, %v1143_v40 }
 0x208   :  { %v1031_v63 = vmul.f32 1.5023419, %v1029_v9  ;;  %v1059_v61 = vmul.f32 1.5005071, %v1057_v51  ;;  %v1018_v33 = vadd.f32 %v1016_v47, %v1014_v22  ;;  %v1107_v51 = vmul.f32 2.2468686, %v1019_v56 }
 0x209   :  { %v1144_v22 = vmul.f32 0.027772168, %v1129_v49 }
 0x20a   :  { %v1033_v36 = vsub.f32 %v1031_v63, %v3072_v48  ;;  %v1020_v53 = vadd.f32 %v1018_v33, %v972_v20  ;;  %1488 = vrot.lane.b32.xlu1 %v3269_v23, %s2237_s14  ;;  %v1061_v0 = vsub.f32 %v1059_v61, %v3072_v48 }
 0x20b   :  { %1486 = vrot.lane.b32.xlu0 %v4308_v50, %s2237_s14  ;;  %1484 = vrot.lane.b32.xlu2 %v4309_v38, %s2237_s14 }
 0x20c   :  { %v1035_v7 = vand.u32 2147483647, %v1033_v36  ;;  %v1030_v32 = vadd.f32 %v1020_v53, %v3281_v26  ;;  %v1058_v4 = vadd.f32 %v1020_v53, %v938_v43  ;;  %v1135_v15 = vpop.permute.xlu1 %1134  ;;  %v1063_v47 = vand.u32 2147483647, %v1061_v0 }
 0x20d   :  { %v1133_v62 = vpop.permute.xlu0 %1132  ;;  %v1147_v59 = vmul.f32 0.028565496, %v1135_v15  ;;  %v3362_v29 = vpop.permute.xlu2 %1192 }
 0x20e   :  { %vm1037_vm0 = vcmp.lt.f32.partialorder %v1035_v7, %v1027_v14  ;;  %v1032_v55 = vmul.f32 1.5023419, %v1030_v32  ;;  %v1060_v54 = vmul.f32 1.5005071, %v1058_v4  ;;  %v1146_v52 = vmul.f32 0.028565496, %v1133_v62 }
 0x20f   :  { %v1039_v26 = vsel %vm1037_vm0, %v1031_v63, %v1023_v8  ;;  %v1041_v9 = vsel %vm1037_vm0, %v1035_v7, %v1027_v14  ;;  %v1149_v43 = vadd.f32 %v1147_v59, %v1145_v17  ;;  %v4310_v8 = vld [vmem:[#allocation15_spill] sm:$0xff]  ;;  %v1109_v63 = vsub.f32 %v1107_v51, %v3072_v48 }
 0x210   :  { %vm1051_vm1 = vcmp.lt.f32.partialorder %v1049_v37, %v1041_v9  ;;  %v1034_v19 = vsub.f32 %v1032_v55, %v4300_v39  ;;  %v1062_v3 = vsub.f32 %v1060_v54, %v4300_v39  ;;  %v1148_v35 = vadd.f32 %v1146_v52, %v1144_v22 }
 0x211   :  { %v1053_v20 = vsel %vm1051_vm1, %v3303_v2, %v1039_v26  ;;  %v1055_v33 = vsel %vm1051_vm1, %v1049_v37, %v1041_v9  ;;  %v1108_v2 = vmul.f32 2.2468686, %v1020_v53  ;;  %v4313_v9 = vld [vmem:[#allocation19_spill] sm:$0xff]  ;;  %v1206_v22 = vmul.f32 0.027769318, %v3362_v29 }
 0x212   :  { %vm1065_vm2 = vcmp.lt.f32.partialorder %v1063_v47, %v1055_v33  ;;  %v1036_v58 = vand.u32 2147483647, %v1034_v19  ;;  %1617 = vrot.lane.b32.xlu1 %v4310_v8, %s2234_s13  ;;  %v1152_v36 = vadd.f32 %v1150_v16, %v1148_v35  ;;  %v1064_v12 = vand.u32 2147483647, %v1062_v3 }
 0x213   :  { %v1067_v56 = vsel %vm1065_vm2, %v1059_v61, %v1053_v20  ;;  %v1069_v49 = vsel %vm1065_vm2, %v1063_v47, %v1055_v33  ;;  %1492 = vrot.lane.b32.xlu0 %v3255_v25, %s2237_s14  ;;  %1490 = vrot.lane.b32.xlu2 %v3260_v21, %s2237_s14  ;;  %v1222_v47 = vmul.f32 0.029721592, %v3362_v29  ;;  %v4315_v29 = vld [vmem:[#allocation23_spill] sm:$0xff] }
 0x214   :  { %vm1077_vm3 = vcmp.lt.f32.partialorder %v3292_v11, %v1069_v49  ;;  %vm1038_vm4 = vcmp.lt.f32.partialorder %v1036_v58, %v1028_v57  ;;  %v1141_v40 = vpop.permute.xlu1 %1140 }
 0x215   :  { %v1079_v37 = vsel %vm1077_vm3, %v3243_v24, %v1067_v56  ;;  %v1081_v61 = vsel %vm1077_vm3, %v3292_v11, %v1069_v49  ;;  %v1040_v14 = vsel %vm1038_vm4, %v1032_v55, %v3312_v18  ;;  %v1042_v48 = vsel %vm1038_vm4, %v1036_v58, %v1028_v57  ;;  %v1139_v17 = vpop.permute.xlu0 %1138  ;;  %v1199_v7 = vpop.permute.xlu2 %1198  ;;  %v4316_v58 = vld [vmem:[#allocation22_spill] sm:$0xff] }
 0x216   :  { %vm1089_vm5 = vcmp.lt.f32.partialorder %v1087_v27, %v1081_v61  ;;  %vm1052_vm6 = vcmp.lt.f32.partialorder %v3344_v31, %v1042_v48  ;;  %v1151_v0 = vmul.f32 0.02673731, %v1139_v17  ;;  %v1154_v32 = vmul.f32 0.028920362, %v1141_v40 }
 0x217   :  { %v1091_v53 = vsel %vm1089_vm5, %v3325_v42, %v1079_v37  ;;  %v1093_v4 = vsel %vm1089_vm5, %v1087_v27, %v1081_v61  ;;  %v1054_v15 = vsel %vm1052_vm6, %v3300_v6, %v1040_v14  ;;  %v1056_v62 = vsel %vm1052_vm6, %v3344_v31, %v1042_v48  ;;  %v4311_v6 = vld [vmem:[#allocation17_spill] sm:$0xff] }
 0x218   :  { %vm1101_vm7 = vcmp.lt.f32.partialorder %v3338_v28, %v1093_v4  ;;  %v1111_v24 = vand.u32 2147483647, %v1109_v63  ;;  %vm1066_vm8 = vcmp.lt.f32.partialorder %v1064_v12, %v1056_v62  ;;  %v1110_v11 = vsub.f32 %v1108_v2, %v4300_v39 }
 0x219   :  { %v1103_v18 = vsel %vm1101_vm7, %v3296_v46, %v1091_v53  ;;  %v1105_v57 = vsel %vm1101_vm7, %v3338_v28, %v1093_v4  ;;  %v1068_v59 = vsel %vm1066_vm8, %v1060_v54, %v1054_v15  ;;  %v1070_v55 = vsel %vm1066_vm8, %v1064_v12, %v1056_v62  ;;  %v4312_v46 = vld [vmem:[#allocation16_spill] sm:$0xff]  ;;  %v3421_v4 = vld [vmem:[#allocation2] sm:$0xff] }
 0x21a   :  { %vm1113_vm9 = vcmp.lt.f32.partialorder %v1111_v24, %v1105_v57  ;;  %vm1078_vm10 = vcmp.lt.f32.partialorder %v3329_v5, %v1070_v55  ;;  %v1153_v42 = vadd.f32 %v1151_v0, %v1149_v43  ;;  %v3388_v27 = vadd.f32 %v1154_v32, %v1152_v36  ;;  %1623 = vrot.lane.b32.xlu1 %v4311_v6, %s2234_s13  ;;  %v3417_v0 = vld [vmem:[#allocation2 + $0x8] sm:$0xff]  ;;  %v4318_v15 = vld [vmem:[#allocation24_spill] sm:$0xff] }
 0x21b   :  { %v1115_v31 = vsel %vm1113_vm9, %v1107_v51, %v1103_v18  ;;  %v1080_v52 = vsel %vm1078_vm10, %v3290_v10, %v1068_v59  ;;  %v1082_v26 = vsel %vm1078_vm10, %v3329_v5, %v1070_v55  ;;  %1621 = vrot.lane.b32.xlu0 %v4312_v46, %s2234_s13  ;;  %v1100_v28 = vand.u32 2147483647, %v1098_v60  ;;  %1619 = vrot.lane.b32.xlu2 %v4313_v9, %s2234_s13 }
 0x21c   :  { %1118 = vst [vmem:[#allocation6 + $0x10] sm:$0xff] %v1115_v31  ;;  %vm1090_vm11 = vcmp.lt.f32.partialorder %v3360_v41, %v1082_v26  ;;  %v3400_v54 = vadd.f32 %v1155_v44, %v1153_v42  ;;  %v1191_v51 = vpop.permute.xlu1 %1190  ;;  %v1112_v39 = vand.u32 2147483647, %v1110_v11  ;;  %v1211_v61 = vmul.f32 0.0278706, %v1199_v7 }
 0x21d   :  { %v1092_v10 = vsel %vm1090_vm11, %v3327_v1, %v1080_v52  ;;  %v1094_v5 = vsel %vm1090_vm11, %v3360_v41, %v1082_v26  ;;  %v1189_v19 = vpop.permute.xlu0 %1188  ;;  %v3408_v60 = vpop.permute.xlu2 %1244  ;;  %v4314_v41 = vld [vmem:[#allocation21_spill] sm:$0xff]  ;;  %v1205_v8 = vmul.f32 0.027802464, %v1191_v51  ;;  %v1221_v63 = vmul.f32 0.02856551, %v1191_v51  ;;  %4317 = vst [vmem:[#allocation12_spill] sm:$0xff] %v3421_v4 }
 0x21e   :  { %vm1102_vm12 = vcmp.lt.f32.partialorder %v1100_v28, %v1094_v5  ;;  %v1204_v3 = vmul.f32 0.027802464, %v1189_v19  ;;  %v1220_v16 = vmul.f32 0.02856551, %v1189_v19  ;;  %v1227_v14 = vmul.f32 0.027548313, %v1199_v7 }
 0x21f   :  { %v1104_v20 = vsel %vm1102_vm12, %v3332_v30, %v1092_v10  ;;  %v1106_v33 = vsel %vm1102_vm12, %v1100_v28, %v1094_v5  ;;  %v3435_v52 = vld [vmem:[#allocation2 + $0x30] sm:$0xff]  ;;  %v3439_v26 = vld [vmem:[#allocation2 + $0x20] sm:$0xff]  ;;  %v1158_v46 = vmul.f32 0.027630111, %v3421_v4  ;;  %v3444_v28 = vld [vmem:[#allocation2 + $0x18] sm:$0xff] }
 0x220   :  { %vm1114_vm13 = vcmp.lt.f32.partialorder %v1112_v39, %v1106_v33  ;;  %v1208_v35 = vadd.f32 %v1206_v22, %v1204_v3  ;;  %v1224_v44 = vadd.f32 %v1222_v47, %v1220_v16  ;;  %4319 = vst [vmem:[#allocation14_spill] sm:$0xff] %v3435_v52  ;;  %v1160_v9 = vmul.f32 0.026434153, %v3444_v28 }
 0x221   :  { %v1116_v1 = vsel %vm1114_vm13, %v1108_v2, %v1104_v20  ;;  %4320 = vst [vmem:[#allocation29_spill] sm:$0xff] %v3439_v26  ;;  %v1276_v10 = vmul.f32 0.027630111, %v3408_v60  ;;  %v1164_v20 = vmul.f32 0.027901074, %v3435_v52 }
 0x222   :  { %1119 = vst [vmem:[#allocation6 + $0x18] sm:$0xff] %v1116_v1  ;;  %1629 = vrot.lane.b32.xlu1 %v4314_v41, %s2234_s13  ;;  %v1162_v1 = vadd.f32 %v1160_v9, %v1158_v46  ;;  %v4326_v9 = vld [vmem:[#allocation20_spill] sm:$0xff] }
 0x223   :  { %1627 = vrot.lane.b32.xlu0 %v4315_v29, %s2234_s13  ;;  %1625 = vrot.lane.b32.xlu2 %v4316_v58, %s2234_s13  ;;  %4321 = vst [vmem:[#allocation11_spill] sm:$0xff] %v3444_v28  ;;  %v3453_v29 = vld [vmem:[#allocation2 + $0x50] sm:$0xff]  ;;  %v3457_v58 = vld [vmem:[#allocation2 + $0x48] sm:$0xff] }
 0x224   :  { %v1197_v43 = vpop.permute.xlu1 %1196  ;;  %4322 = vst [vmem:[#allocation34_spill] sm:$0xff] %v3453_v29 }
 0x225   :  { %v1195_v56 = vpop.permute.xlu0 %1194  ;;  %v1210_v49 = vmul.f32 0.0278706, %v1197_v43  ;;  %v1226_v30 = vmul.f32 0.027548313, %v1197_v43  ;;  %v1251_v36 = vpop.permute.xlu2 %1250  ;;  %4323 = vst [vmem:[#allocation26_spill] sm:$0xff] %v3457_v58 }
 0x226   :  { %v1207_v12 = vmul.f32 0.027769318, %v1195_v56  ;;  %v1223_v40 = vmul.f32 0.029721592, %v1195_v56  ;;  %v1263_v5 = vmul.f32 0.026968762, %v1251_v36 }
 0x227   :  { %v1212_v2 = vadd.f32 %v1210_v49, %v1208_v35  ;;  %v1228_v37 = vadd.f32 %v1226_v30, %v1224_v44  ;;  %v1279_v19 = vmul.f32 0.026434153, %v1251_v36  ;;  %v1168_v43 = vmul.f32 0.02847334, %v3457_v58  ;;  %v3463_v49 = vld [vmem:[#allocation2 + $0x38] sm:$0xff] }
 0x228   :  { %v1209_v48 = vadd.f32 %v1207_v12, %v1205_v8  ;;  %v1225_v17 = vadd.f32 %v1223_v40, %v1221_v63  ;;  %v1166_v8 = vadd.f32 %v1164_v20, %v1162_v1  ;;  %v1260_v56 = vmul.f32 0.028758138, %v3408_v60  ;;  %4324 = vst [vmem:[#allocation33_spill] sm:$0xff] %v3463_v49 }
 0x229   :  { %v1159_v63 = vmul.f32 0.027630111, %v3417_v0  ;;  %v1161_v36 = vmul.f32 0.026434153, %v3439_v26 }
 0x22a   :  { %1679 = vrot.lane.b32.xlu1 %v3417_v0, %s2237_s14  ;;  %v1213_v32 = vadd.f32 %v1211_v61, %v1209_v48  ;;  %v1229_v53 = vadd.f32 %v1227_v14, %v1225_v17  ;;  %v1165_v48 = vmul.f32 0.027901074, %v3463_v49  ;;  %v3472_v60 = vadd.f32 %v1168_v43, %v1166_v8  ;;  %v3504_v8 = vld [vmem:[#allocation2 + $0x39] sm:$0xff] }
 0x22b   :  { %1677 = vrot.lane.b32.xlu0 %v3421_v4, %s2237_s14  ;;  %1631 = vrot.lane.b32.xlu2 %v4318_v15, %s2234_s13  ;;  %v1177_v43 = vmul.f32 0.026968762, %v3439_v26  ;;  %4330 = vst [vmem:[#allocation35_spill] sm:$0xff] %v3504_v8 }
 0x22c   :  { %v1203_v62 = vpop.permute.xlu1 %1202 }
 0x22d   :  { %v1201_v24 = vpop.permute.xlu0 %1200  ;;  %v1215_v7 = vmul.f32 0.028610084, %v1203_v62  ;;  %v1231_v11 = vmul.f32 0.02832451, %v1203_v62  ;;  %v1257_v18 = vpop.permute.xlu2 %1256 }
 0x22e   :  { %v1214_v57 = vmul.f32 0.028610084, %v1201_v24  ;;  %v1230_v59 = vmul.f32 0.02832451, %v1201_v24  ;;  %v1163_v24 = vadd.f32 %v1161_v36, %v1159_v63  ;;  %v1185_v36 = vmul.f32 0.02647553, %v3453_v29 }
 0x22f   :  { %v3427_v55 = vadd.f32 %v1215_v7, %v1213_v32  ;;  %v3429_v42 = vadd.f32 %v1231_v11, %v1229_v53  ;;  %v1270_v32 = vmul.f32 0.02647553, %v1257_v18  ;;  %v1286_v53 = vmul.f32 0.02847334, %v1257_v18 }
 0x230   :  { %v3431_v6 = vadd.f32 %v1214_v57, %v1212_v2  ;;  %v3433_v31 = vadd.f32 %v1230_v59, %v1228_v37  ;;  %v1169_v7 = vmul.f32 0.02847334, %v3453_v29  ;;  %v1172_v11 = vadd.f32 %v3472_v60, %v3388_v27 }
 0x231   :  { %v1167_v18 = vadd.f32 %v1165_v48, %v1163_v24  ;;  %v3530_v24 = vld [vmem:[#allocation2 + $0x9] sm:$0xff] }
 0x232   :  { %1685 = vrot.lane.b32.xlu1 %v3435_v52, %s2237_s14  ;;  %4334 = vst [vmem:[#allocation15_spill] sm:$0xff] %v3530_v24 }
 0x233   :  { %1683 = vrot.lane.b32.xlu0 %v3439_v26, %s2237_s14  ;;  %1681 = vrot.lane.b32.xlu2 %v3444_v28, %s2237_s14 }
 0x234   :  { %v1249_v51 = vpop.permute.xlu1 %1248 }
 0x235   :  { %v1247_v22 = vpop.permute.xlu0 %1246  ;;  %v1278_v47 = vmul.f32 0.026434153, %v1249_v51  ;;  %v3450_v39 = vpop.permute.xlu2 %1340  ;;  %v1262_v41 = vmul.f32 0.026968762, %v1249_v51  ;;  %v4327_v51 = vld [vmem:[#allocation31_spill] sm:$0xff] }
 0x236   :  { %v1261_v3 = vmul.f32 0.028758138, %v1247_v22  ;;  %v1277_v16 = vmul.f32 0.027630111, %v1247_v22 }
 0x237   :  { %v1280_v33 = vadd.f32 %v1278_v47, %v1276_v10  ;;  %v1264_v2 = vadd.f32 %v1262_v41, %v1260_v56  ;;  %v3492_v47 = vadd.f32 %v1169_v7, %v1167_v18  ;;  %v1175_v41 = vmul.f32 0.028758138, %v3417_v0 }
 0x238   :  { %v1265_v35 = vadd.f32 %v1263_v5, %v1261_v3  ;;  %v1281_v44 = vadd.f32 %v1279_v19, %v1277_v16  ;;  %v4328_v5 = vld [vmem:[#allocation25_spill] sm:$0xff]  ;;  %v1291_v7 = vmul.f32 0.02856551, %v3530_v24 }
 0x239   :  { %v1179_v63 = vadd.f32 %v1177_v43, %v1175_v41 }
 0x23a   :  { %1691 = vrot.lane.b32.xlu1 %v3453_v29, %s2237_s14 }
 0x23b   :  { %1689 = vrot.lane.b32.xlu0 %v3457_v58, %s2237_s14  ;;  %1687 = vrot.lane.b32.xlu2 %v3463_v49, %s2237_s14 }
 0x23c   :  { %v1255_v30 = vpop.permute.xlu1 %1254 }
 0x23d   :  { %v1253_v12 = vpop.permute.xlu0 %1252  ;;  %v1283_v40 = vmul.f32 0.027901074, %v1255_v30  ;;  %v3469_v37 = vpop.permute.xlu2 %1346  ;;  %v1267_v46 = vmul.f32 0.027903557, %v1255_v30  ;;  %v4332_v30 = vld [vmem:[#allocation32_spill] sm:$0xff] }
 0x23e   :  { %v1266_v61 = vmul.f32 0.027903557, %v1253_v12  ;;  %v1282_v14 = vmul.f32 0.027901074, %v1253_v12  ;;  %v1290_v12 = vmul.f32 0.02856551, %v4328_v5 }
 0x23f   :  { %v1285_v17 = vadd.f32 %v1283_v40, %v1281_v44  ;;  %v1269_v19 = vadd.f32 %v1267_v46, %v1265_v35  ;;  %v3509_v35 = vld [vmem:[#allocation2 + $0x31] sm:$0xff]  ;;  %v1292_v40 = vmul.f32 0.029721592, %v4326_v9  ;;  %v4335_v46 = vld [vmem:[#allocation30_spill] sm:$0xff]  ;;  %v1360_v41 = vmul.f32 0.028734548, %v3469_v37 }
 0x240   :  { %v1268_v15 = vadd.f32 %v1266_v61, %v1264_v2  ;;  %v1284_v62 = vadd.f32 %v1282_v14, %v1280_v33  ;;  %v1173_v33 = vadd.f32 %v3492_v47, %v3400_v54  ;;  %4331 = vst [vmem:[#allocation36_spill] sm:$0xff] %v3509_v35  ;;  %v1181_v54 = vmul.f32 0.027903557, %v3463_v49 }
 0x241   :  { %v1323_v61 = vmul.f32 0.027202712, %v4327_v51  ;;  %v1325_v14 = vmul.f32 0.029308077, %v4332_v30  ;;  %v1297_v43 = vmul.f32 0.027548313, %v4335_v46 }
 0x242   :  { %v3477_v57 = vadd.f32 %v1270_v32, %v1268_v15  ;;  %v3479_v59 = vadd.f32 %v1286_v53, %v1284_v62  ;;  %1737 = vrot.lane.b32.xlu1 %v4326_v9, %s2234_s13  ;;  %v1183_v32 = vadd.f32 %v1181_v54, %v1179_v63  ;;  %v4333_v15 = vld [vmem:[#allocation13_spill] sm:$0xff]  ;;  %v1329_v9 = vmul.f32 0.026846515, %v4335_v46 }
 0x243   :  { %1735 = vrot.lane.b32.xlu0 %v4327_v51, %s2234_s13  ;;  %1733 = vrot.lane.b32.xlu2 %v4328_v5, %s2234_s13  ;;  %v1296_v62 = vmul.f32 0.027548313, %v4333_v15  ;;  %v1294_v5 = vadd.f32 %v1292_v40, %v1290_v12  ;;  %v3540_v54 = vld [vmem:[#allocation2 + $0x1] sm:$0xff]  ;;  %v1355_v40 = vmul.f32 0.027487466, %v3450_v39 }
 0x244   :  { %4325 = vst [vmem:[#allocation27_spill] sm:$0xff] %v3477_v57  ;;  %v3486_v10 = vadd.f32 %v3477_v57, %v1172_v11  ;;  %v3490_v22 = vpop.permute.xlu1 %1338  ;;  %v1293_v11 = vmul.f32 0.029721592, %v4332_v30  ;;  %v1187_v51 = vadd.f32 %v1185_v36, %v1183_v32  ;;  %v4338_v63 = vld [vmem:[#allocation9_spill] sm:$0xff]  ;;  %v1322_v26 = vmul.f32 0.027202712, %v3540_v54 }
 0x245   :  { %v1259_v27 = vpop.permute.xlu0 %1258  ;;  %v3494_v3 = vpop.permute.xlu2 %1352  ;;  %v1354_v53 = vmul.f32 0.027487466, %v3490_v22  ;;  %4337 = vst [vmem:[#allocation17_spill] sm:$0xff] %v3540_v54  ;;  %v1300_v36 = vmul.f32 0.02832451, %v4338_v63 }
 0x246   :  { %v1271_v16 = vmul.f32 0.02647553, %v1259_v27  ;;  %v1287_v20 = vmul.f32 0.02847334, %v1259_v27  ;;  %v1327_v27 = vadd.f32 %v1325_v14, %v1323_v61  ;;  %v1295_v61 = vadd.f32 %v1293_v11, %v1291_v7  ;;  %v4339_v14 = vld [vmem:[#allocation10_spill] sm:$0xff] }
 0x247   :  { %v1235_v32 = vadd.f32 %v3429_v42, %v1187_v51  ;;  %v1365_v42 = vmul.f32 0.026485197, %v3494_v3  ;;  %v1383_v51 = vmul.f32 0.028638585, %v3494_v3 }
 0x248   :  { %v3498_v44 = vadd.f32 %v1271_v16, %v1269_v19  ;;  %v3500_v1 = vadd.f32 %v1287_v20, %v1285_v17  ;;  %v4336_v19 = vld [vmem:[#allocation18_spill] sm:$0xff]  ;;  %v1331_v12 = vadd.f32 %v1329_v9, %v1327_v27  ;;  %v1299_v11 = vadd.f32 %v1297_v43, %v1295_v61 }
 0x249   :  { %v1333_v16 = vmul.f32 0.027704878, %v4336_v19 }
 0x24a   :  { %4329 = vst [vmem:[#allocation28_spill] sm:$0xff] %v3498_v44  ;;  %v3507_v56 = vadd.f32 %v3498_v44, %v1173_v33  ;;  %1743 = vrot.lane.b32.xlu1 %v3504_v8, %s2234_s13 }
 0x24b   :  { %1741 = vrot.lane.b32.xlu0 %v3509_v35, %s2234_s13  ;;  %1739 = vrot.lane.b32.xlu2 %v4332_v30, %s2234_s13  ;;  %v1298_v30 = vadd.f32 %v1296_v62, %v1294_v5  ;;  %v1335_v7 = vadd.f32 %v1333_v16, %v1331_v12 }
 0x24c   :  { %v1345_v0 = vpop.permute.xlu1 %1344 }
 0x24d   :  { %v3521_v2 = vpop.permute.xlu0 %1342  ;;  %v3525_v48 = vpop.permute.xlu2 %1400  ;;  %v1357_v20 = vmul.f32 0.025453575, %v1345_v0  ;;  %v1375_v33 = vmul.f32 0.026787309, %v1345_v0  ;;  %v1373_v0 = vmul.f32 0.028775321, %v3450_v39  ;;  %v3556_v29 = vadd.f32 %v1300_v36, %v1298_v30 }
 0x24e   :  { %v1356_v17 = vmul.f32 0.025453575, %v3521_v2  ;;  %v3577_v36 = vld [vmem:[#allocation2 + $0x21] sm:$0xff] }
 0x24f   :  { %v1359_v5 = vadd.f32 %v1357_v20, %v1355_v40  ;;  %v1377_v9 = vadd.f32 %v1375_v33, %v1373_v0  ;;  %v3564_v20 = vadd.f32 %v3556_v29, %v3486_v10  ;;  %4343 = vst [vmem:[#allocation23_spill] sm:$0xff] %v3577_v36  ;;  %v3589_v0 = vld [vmem:[#allocation2 + $0x19] sm:$0xff]  ;;  %v1309_v44 = vmul.f32 0.027769318, %v3577_v36 }
 0x250   :  { %v1358_v18 = vadd.f32 %v1356_v17, %v1354_v53  ;;  %v1301_v53 = vmul.f32 0.02832451, %v4336_v19  ;;  %4345 = vst [vmem:[#allocation24_spill] sm:$0xff] %v3589_v0 }
 0x252   :  { %1829 = vrot.lane.b32.xlu1 %v3530_v24, %s2237_s14  ;;  %v1362_v46 = vadd.f32 %v1360_v41, %v1358_v18  ;;  %v1337_v41 = vadd.f32 %v1335_v7, %v1235_v32  ;;  %v3568_v16 = vadd.f32 %v1301_v53, %v1299_v11  ;;  %v1462_v7 = vmul.f32 0.027487466, %v4305_v34 }
 0x253   :  { %1827 = vrot.lane.b32.xlu0 %v3540_v54, %s2237_s14  ;;  %1745 = vrot.lane.b32.xlu2 %v4339_v14, %s2234_s13  ;;  %v1446_v11 = vmul.f32 0.026787309, %v3227_v13 }
 0x254   :  { %v3549_v17 = vpop.permute.xlu1 %1350  ;;  %4340 = vst [vmem:[#allocation16_spill] sm:$0xff] %v3568_v16  ;;  %v3583_v10 = vadd.f32 %v3568_v16, %v3507_v56  ;;  %v1174_v56 = vmul.f32 0.028758138, %v3421_v4  ;;  %v1308_v4 = vmul.f32 0.027769318, %v3589_v0 }
 0x255   :  { %v1349_v15 = vpop.permute.xlu0 %1348  ;;  %v1364_v62 = vmul.f32 0.026485197, %v3549_v17  ;;  %v3554_v27 = vpop.permute.xlu2 %1406 }
 0x256   :  { %v1361_v63 = vmul.f32 0.028734548, %v1349_v15  ;;  %v1379_v39 = vmul.f32 0.028065614, %v1349_v15 }
 0x257   :  { %v3558_v14 = vadd.f32 %v1364_v62, %v1362_v46  ;;  %v1176_v46 = vmul.f32 0.026968762, %v3444_v28  ;;  %v3604_v62 = vld [vmem:[#allocation2 + $0x51] sm:$0xff]  ;;  %v1454_v28 = vmul.f32 0.028638585, %v3260_v21 }
 0x258   :  { %v1363_v19 = vadd.f32 %v1361_v63, %v1359_v5  ;;  %v1381_v18 = vadd.f32 %v1379_v39, %v1377_v9  ;;  %v1180_v5 = vmul.f32 0.027903557, %v3435_v52  ;;  %v1184_v9 = vmul.f32 0.02647553, %v3457_v58  ;;  %v3610_v63 = vld [vmem:[#allocation2 + $0x49] sm:$0xff] }
 0x259   :  { %v1368_v33 = vadd.f32 %v3558_v14, %v3431_v6  ;;  %4346 = vst [vmem:[#allocation20_spill] sm:$0xff] %v3610_v63  ;;  %v1444_v39 = vmul.f32 0.028775321, %v4305_v34  ;;  %v1307_v58 = vmul.f32 0.027802464, %v3530_v24 }
 0x25a   :  { %v3570_v43 = vadd.f32 %v1365_v42, %v1363_v19  ;;  %v1385_v30 = vadd.f32 %v1383_v51, %v1381_v18  ;;  %1835 = vrot.lane.b32.xlu1 %v3509_v35, %s2237_s14  ;;  %v1178_v51 = vadd.f32 %v1176_v46, %v1174_v56  ;;  %v1445_v19 = vmul.f32 0.028775321, %v4303_v45 }
 0x25b   :  { %v3575_v3 = vadd.f32 %v1368_v33, %v3564_v20  ;;  %1833 = vrot.lane.b32.xlu0 %v3577_v36, %s2237_s14  ;;  %1831 = vrot.lane.b32.xlu2 %v3589_v0, %s2237_s14  ;;  %v1464_v18 = vmul.f32 0.025453575, %v3227_v13  ;;  %v1447_v33 = vmul.f32 0.026787309, %v4309_v38  ;;  %v1468_v56 = vmul.f32 0.028734548, %v4308_v50 }
 0x25c   :  { %4341 = vst [vmem:[#allocation19_spill] sm:$0xff] %v3570_v43  ;;  %v1369_v12 = vadd.f32 %v3570_v43, %v3427_v55  ;;  %v3587_v40 = vadd.f32 %v1385_v30, %v1337_v41  ;;  %v3593_v61 = vpop.permute.xlu1 %1398  ;;  %v1463_v30 = vmul.f32 0.027487466, %v4303_v45  ;;  %v1182_v49 = vadd.f32 %v1180_v5, %v1178_v51 }
 0x25d   :  { %4342 = vst [vmem:[#allocation21_spill] sm:$0xff] %v3575_v3  ;;  %v3595_v32 = vpop.permute.xlu0 %1396  ;;  %v3600_v15 = vpop.permute.xlu2 %1478  ;;  %v1451_v46 = vmul.f32 0.028065614, %v3269_v23  ;;  %v1448_v52 = vadd.f32 %v1446_v11, %v1444_v39  ;;  %v1449_v57 = vadd.f32 %v1447_v33, %v1445_v19  ;;  %v1324_v5 = vmul.f32 0.029308077, %v3589_v0 }
 0x25e   :  { %4344 = vst [vmem:[#allocation22_spill] sm:$0xff] %v3587_v40  ;;  %v3598_v53 = vadd.f32 %v1369_v12, %v3583_v10  ;;  %v1465_v12 = vmul.f32 0.025453575, %v4309_v38  ;;  %v1466_v40 = vadd.f32 %v1464_v18, %v1462_v7  ;;  %v3641_v43 = vmul.f32 0.028734548, %v3269_v23  ;;  %v2165_v18 = vld [vmem:[#allocation2 + $0x51] sm:$0xff] }
 0x25f   :  { %v3647_v11 = vadd.f32 %v1451_v46, %v1449_v57  ;;  %v3650_v24 = vmul.f32 0.026485197, %v3260_v21  ;;  %v3653_v7 = vmul.f32 0.028638585, %v3255_v25  ;;  %v1186_v23 = vadd.f32 %v1184_v9, %v1182_v49 }
 0x260   :  { %v3638_v51 = vadd.f32 %v1465_v12, %v1463_v30  ;;  %v3645_v39 = vadd.f32 %v1468_v56, %v1466_v40  ;;  %v3662_v40 = vld [vmem:[#allocation2 + $0x31] sm:$0xff]  ;;  %v1311_v19 = vadd.f32 %v1309_v44, %v1307_v58  ;;  %v1317_v33 = vmul.f32 0.028610084, %v2165_v18  ;;  %v2166_v12 = vld [vmem:[#allocation2 + $0x49] sm:$0xff] }
 0x261   :  { %v1328_v57 = vmul.f32 0.026846515, %v3662_v40  ;;  %v1374_v49 = vmul.f32 0.026787309, %v3521_v2  ;;  %v1326_v9 = vadd.f32 %v1324_v5, %v1322_v26  ;;  %v1332_v56 = vmul.f32 0.027704878, %v2166_v12 }
 0x262   :  { %1841 = vrot.lane.b32.xlu1 %v3604_v62, %s2237_s14  ;;  %v1412_v46 = vmul.f32 0.027202712, %v3595_v32  ;;  %v1413_v36 = vmul.f32 0.027202712, %v3593_v61  ;;  %v1316_v58 = vmul.f32 0.028610084, %v2166_v12 }
 0x263   :  { %1839 = vrot.lane.b32.xlu0 %v3610_v63, %s2237_s14  ;;  %1837 = vrot.lane.b32.xlu2 %v3504_v8, %s2237_s14  ;;  %v1450_v63 = vmul.f32 0.028065614, %v4308_v50  ;;  %v1306_v8 = vmul.f32 0.027802464, %v3540_v54  ;;  %v1372_v44 = vmul.f32 0.028775321, %v3490_v22  ;;  %v1330_v54 = vadd.f32 %v1328_v57, %v1326_v9 }
 0x264   :  { %v3619_v42 = vpop.permute.xlu1 %1404  ;;  %v1414_v18 = vmul.f32 0.029308077, %v3525_v48  ;;  %v1428_v16 = vmul.f32 0.02856551, %v3595_v32  ;;  %v1429_v26 = vmul.f32 0.02856551, %v3593_v61 }
 0x265   :  { %v1403_v41 = vpop.permute.xlu0 %1402  ;;  %v3627_v35 = vpop.permute.xlu2 %1484  ;;  %v1452_v50 = vadd.f32 %v1450_v63, %v1448_v52  ;;  %v3659_v63 = vld [vmem:[#allocation2 + $0x39] sm:$0xff]  ;;  %v1310_v0 = vadd.f32 %v1308_v4, %v1306_v8  ;;  %v1418_v5 = vmul.f32 0.026846515, %v3619_v42  ;;  %v1376_v3 = vadd.f32 %v1374_v49, %v1372_v44  ;;  %v3680_v8 = vld [vmem:[#allocation2 + $0xa] sm:$0xff] }
 0x266   :  { %4347 = vst [vmem:[#allocation31_spill] sm:$0xff] %v3627_v35  ;;  %v1415_v30 = vmul.f32 0.029308077, %v1403_v41  ;;  %v1430_v35 = vmul.f32 0.029721592, %v3525_v48  ;;  %v1416_v4 = vadd.f32 %v1414_v18, %v1412_v46  ;;  %v1234_v44 = vadd.f32 %v3433_v31, %v1186_v23 }
 0x267   :  { %v3657_v52 = vadd.f32 %v1454_v28, %v1452_v50  ;;  %4348 = vst [vmem:[#allocation25_spill] sm:$0xff] %v3659_v63  ;;  %v1434_v32 = vmul.f32 0.027548313, %v3619_v42  ;;  %v1378_v48 = vmul.f32 0.028065614, %v3469_v37 }
 0x268   :  { %v1417_v2 = vadd.f32 %v1415_v30, %v1413_v36  ;;  %v3685_v36 = vld [vmem:[#allocation2 + $0x2] sm:$0xff]  ;;  %v1382_v30 = vmul.f32 0.028638585, %v3549_v17  ;;  %v1420_v9 = vadd.f32 %v1418_v5, %v1416_v4  ;;  %v3696_v37 = vmul.f32 2.254072, %v3564_v20 }
 0x26a   :  { %1889 = vrot.lane.b32.xlu1 %v3227_v13, %s2234_s13  ;;  %v1313_v13 = vmul.f32 0.0278706, %v3659_v63 }
 0x26b   :  { %1887 = vrot.lane.b32.xlu0 %v4303_v45, %s2234_s13  ;;  %1885 = vrot.lane.b32.xlu2 %v4305_v34, %s2234_s13  ;;  %v1312_v45 = vmul.f32 0.0278706, %v3662_v40  ;;  %v1431_v34 = vmul.f32 0.029721592, %v1403_v41  ;;  %v1419_v41 = vmul.f32 0.026846515, %v3554_v27 }
 0x26c   :  { %v1411_v21 = vpop.permute.xlu1 %1410  ;;  %v1315_v18 = vadd.f32 %v1313_v13, %v1311_v19  ;;  %v1471_v13 = vadd.f32 %v3641_v43, %v3638_v51  ;;  %v1494_v51 = vmul.f32 0.025511317, %v3600_v15  ;;  %v1370_v15 = vadd.f32 %v3558_v14, %v3556_v29  ;;  %v4349_v14 = vld [vmem:[#allocation21_spill] sm:$0xff] }
 0x26d   :  { %v1409_v28 = vpop.permute.xlu0 %1408  ;;  %v3670_v50 = vpop.permute.xlu2 %1490  ;;  %v1314_v63 = vadd.f32 %v1312_v45, %v1310_v0  ;;  %v1433_v22 = vadd.f32 %v1431_v34, %v1429_v26  ;;  %v1423_v61 = vmul.f32 0.027704878, %v1411_v21  ;;  %v1435_v0 = vmul.f32 0.027548313, %v3554_v27 }
 0x26e   :  { %v1422_v57 = vmul.f32 0.027704878, %v1409_v28  ;;  %v1432_v45 = vadd.f32 %v1430_v35, %v1428_v16  ;;  %v1438_v42 = vmul.f32 0.02832451, %v1409_v28  ;;  %v1421_v12 = vadd.f32 %v1419_v41, %v1417_v2 }
 0x26f   :  { %v1439_v46 = vmul.f32 0.02832451, %v1411_v21  ;;  %v1380_v26 = vadd.f32 %v1378_v48, %v1376_v3  ;;  %v1437_v16 = vadd.f32 %v1435_v0, %v1433_v22  ;;  %v1473_v28 = vmul.f32 0.026485197, %v3255_v25 }
 0x270   :  { %v1436_v17 = vadd.f32 %v1434_v32, %v1432_v45  ;;  %v3700_v35 = vadd.f32 %v1422_v57, %v1420_v9  ;;  %v1319_v2 = vadd.f32 %v1317_v33, %v1315_v18  ;;  %v1334_v21 = vadd.f32 %v1332_v56, %v1330_v54  ;;  %v3728_v33 = vld [vmem:[#allocation2 + $0x1a] sm:$0xff]  ;;  %v4350_v18 = vld [vmem:[#allocation31_spill] sm:$0xff] }
 0x271   :  { %v1384_v5 = vadd.f32 %v1382_v30, %v1380_v26  ;;  %v1318_v41 = vadd.f32 %v1316_v58, %v1314_v63  ;;  %v3707_v3 = vadd.f32 %v3653_v7, %v3647_v11  ;;  %v1441_v23 = vadd.f32 %v1439_v46, %v1437_v16  ;;  %v3721_v63 = vld [vmem:[#allocation2 + $0x22] sm:$0xff]  ;;  %v3762_v16 = vld [vmem:[#allocation2 + $0x3a] sm:$0xff] }
 0x272   :  { %1969 = vrot.lane.b32.xlu1 %v3680_v8, %s2237_s14  ;;  %v1440_v31 = vadd.f32 %v1438_v42, %v1436_v17  ;;  %v1321_v19 = vadd.f32 %v1319_v2, %v3500_v1  ;;  %v1336_v4 = vadd.f32 %v1334_v21, %v1234_v44  ;;  %v1562_v25 = vsub.f32 %v3696_v37, %v3662_v40  ;;  %v3758_v44 = vld [vmem:[#allocation2 + $0x32] sm:$0xff] }
 0x273   :  { %1967 = vrot.lane.b32.xlu0 %v3685_v36, %s2237_s14  ;;  %1891 = vrot.lane.b32.xlu2 %v4309_v38, %s2234_s13  ;;  %v3702_v38 = vadd.f32 %v1423_v61, %v1421_v12  ;;  %v1320_v54 = vadd.f32 %v1318_v41, %v3479_v59  ;;  %v1458_v11 = vadd.f32 %v3657_v52, %v3700_v35  ;;  %v3743_v30 = vmul.f32 2.254072, %v3583_v10  ;;  %v4354_v41 = vld [vmem:[#allocation27_spill] sm:$0xff] }
 0x274   :  { %v1483_v49 = vpop.permute.xlu1 %1482  ;;  %v1474_v1 = vadd.f32 %v3650_v24, %v3645_v39  ;;  %v1386_v43 = vadd.f32 %v1384_v5, %v1336_v4  ;;  %v1475_v56 = vadd.f32 %v1473_v28, %v1471_v13  ;;  %v3734_v58 = vadd.f32 %v3427_v55, %v3492_v47  ;;  %v4353_v28 = vld [vmem:[#allocation19_spill] sm:$0xff] }
 0x275   :  { %v1481_v34 = vpop.permute.xlu0 %1480  ;;  %v3698_v27 = vpop.permute.xlu2 %1619  ;;  %v1496_v22 = vmul.f32 0.02829186, %v1483_v49  ;;  %v1459_v7 = vadd.f32 %v3707_v3, %v3702_v38  ;;  %v1442_v32 = vadd.f32 %v1440_v31, %v1320_v54  ;;  %v1443_v57 = vadd.f32 %v1441_v23, %v1321_v19 }
 0x276   :  { %v1218_v24 = vadd.f32 %v3431_v6, %v3472_v60  ;;  %v3745_v45 = vand.u32 2147483647, %v1562_v25  ;;  %v1510_v55 = vadd.f32 %v1458_v11, %v3564_v20  ;;  %v3749_v49 = vmul.f32 2.2568197, %v1386_v43 }
 0x277   :  { %v1498_v39 = vadd.f32 %v1496_v22, %v1494_v51  ;;  %v1511_v47 = vadd.f32 %v1459_v7, %v3583_v10  ;;  %v1504_v6 = vmul.f32 0.029610733, %v3670_v50  ;;  %v1495_v60 = vmul.f32 0.025511317, %v1481_v34  ;;  %v4352_v34 = vld [vmem:[#allocation16_spill] sm:$0xff] }
 0x278   :  { %v3753_v29 = vmul.f32 1.4991704, %v3598_v53  ;;  %v3756_v42 = vmul.f32 1.4991704, %v4349_v14  ;;  %v1476_v12 = vadd.f32 %v1474_v1, %v1442_v32  ;;  %v1477_v46 = vadd.f32 %v1475_v56, %v1443_v57  ;;  %v4351_v53 = vld [vmem:[#allocation25_spill] sm:$0xff]  ;;  %v4355_v56 = vld [vmem:[#allocation22_spill] sm:$0xff] }
 0x279   :  { %v1460_v20 = vadd.f32 %v3657_v52, %v1370_v15  ;;  %v1497_v10 = vmul.f32 0.02829186, %v4350_v18  ;;  %v1563_v50 = vsub.f32 %v3743_v30, %v4351_v53  ;;  %v1371_v2 = vadd.f32 %v4353_v28, %v4352_v34  ;;  %v3810_v18 = vld [vmem:[#allocation2 + $0x4a] sm:$0xff] }
 0x27a   :  { %1747 = vrot.lane.b32.xlu1 %v3604_v62, %s2234_s13  ;;  %v1512_v21 = vmul.f32 1.5029395, %v1510_v55  ;;  %v3770_v5 = vmul.f32 1.5029395, %v1511_v47  ;;  %v1586_v52 = vsub.f32 %v3749_v49, %v3662_v40  ;;  %v1426_v31 = vadd.f32 %v3700_v35, %v4354_v41 }
 0x27b   :  { %1973 = vrot.lane.b32.xlu0 %v3721_v63, %s2237_s14  ;;  %1971 = vrot.lane.b32.xlu2 %v3728_v33, %s2237_s14  ;;  %v1499_v23 = vadd.f32 %v1497_v10, %v1495_v60  ;;  %v1537_v4 = vsub.f32 %v3753_v29, %v4351_v53  ;;  %v1536_v22 = vsub.f32 %v3756_v42, %v3662_v40  ;;  %v3784_v25 = vmul.f32 2.2564495, %v1476_v12  ;;  %v4356_v12 = vld [vmem:[#allocation28_spill] sm:$0xff] }
 0x27c   :  { %v1489_v59 = vpop.permute.xlu1 %1488  ;;  %v3786_v54 = vmul.f32 2.2564495, %v1477_v46  ;;  %v3791_v32 = vmul.f32 2.2568197, %v4355_v56  ;;  %v1514_v57 = vsub.f32 %v1512_v21, %v3662_v40  ;;  %v3797_v47 = vand.u32 2147483647, %v1586_v52 }
 0x27d   :  { %v1487_v61 = vpop.permute.xlu0 %1486  ;;  %v3740_v48 = vpop.permute.xlu2 %1625  ;;  %v1501_v17 = vmul.f32 0.025969261, %v1489_v59  ;;  %v3788_v59 = vand.u32 2147483647, %v1563_v50  ;;  %v3805_v14 = vand.u32 2147483647, %v1537_v4  ;;  %v1427_v46 = vadd.f32 %v3702_v38, %v4356_v12 }
 0x27e   :  { %v1500_v0 = vmul.f32 0.025969261, %v1487_v61  ;;  %v1515_v61 = vsub.f32 %v3770_v5, %v4351_v53  ;;  %v1575_v60 = vsub.f32 %v3786_v54, %v4351_v53  ;;  %v1516_v10 = vand.u32 2147483647, %v1514_v57 }
 0x27f   :  { %v1503_v35 = vadd.f32 %v1501_v17, %v1499_v23  ;;  %v1634_v17 = vmul.f32 0.028660536, %v3698_v27  ;;  %v1587_v52 = vsub.f32 %v3791_v32, %v4351_v53 }
 0x280   :  { %v1502_v9 = vadd.f32 %v1500_v0, %v1498_v39  ;;  %v1461_v0 = vadd.f32 %v3707_v3, %v1371_v2 }
 0x282   :  { %v1506_v26 = vadd.f32 %v1504_v6, %v1502_v9  ;;  %1975 = vrot.lane.b32.xlu1 %v3758_v44, %s2237_s14  ;;  %v1574_v6 = vsub.f32 %v3784_v25, %v3662_v40  ;;  %v3803_v9 = vld [vmem:[#allocation2 + $0x52] sm:$0xff] }
 0x283   :  { %1895 = vrot.lane.b32.xlu0 %v3762_v16, %s2234_s13  ;;  %1893 = vrot.lane.b32.xlu2 %v3758_v44, %s2234_s13 }
 0x284   :  { %v1508_v13 = vadd.f32 %v1506_v26, %v1460_v20  ;;  %v1618_v19 = vpop.permute.xlu1 %1617  ;;  %v1517_v26 = vand.u32 2147483647, %v1515_v61  ;;  %v1576_v41 = vand.u32 2147483647, %v1574_v6 }
 0x285   :  { %v1493_v11 = vpop.permute.xlu0 %1492  ;;  %v1632_v43 = vpop.permute.xlu2 %1631 }
 0x286   :  { %v1518_v7 = vadd.f32 %v1508_v13, %v1218_v24  ;;  %v1546_v1 = vadd.f32 %v1508_v13, %v1426_v31  ;;  %v1505_v51 = vmul.f32 0.029610733, %v1493_v11  ;;  %v1538_v24 = vand.u32 2147483647, %v1536_v22 }
 0x287   :  { %v3823_v31 = vand.u32 2147483647, %v1575_v60  ;;  %v1644_v12 = vmul.f32 0.029750606, %v1632_v43 }
 0x288   :  { %v1520_v15 = vmul.f32 1.5023419, %v1518_v7  ;;  %v1548_v39 = vmul.f32 1.5005071, %v1546_v1  ;;  %v1507_v55 = vadd.f32 %v1505_v51, %v1503_v35  ;;  %v1596_v35 = vmul.f32 2.2468686, %v1508_v13 }
 0x289   :  { %v1633_v51 = vmul.f32 0.028660536, %v1618_v19 }
 0x28a   :  { %v1522_v20 = vsub.f32 %v1520_v15, %v3662_v40  ;;  %v1509_v3 = vadd.f32 %v1507_v55, %v1461_v0  ;;  %1899 = vrot.lane.b32.xlu1 %v3803_v9, %s2234_s13  ;;  %v1550_v34 = vsub.f32 %v1548_v39, %v3662_v40  ;;  %v1639_v0 = vmul.f32 0.028789451, %v3740_v48 }
 0x28b   :  { %1897 = vrot.lane.b32.xlu0 %v3810_v18, %s2234_s13  ;;  %1977 = vrot.lane.b32.xlu2 %v3762_v16, %s2237_s14  ;;  %v1598_v13 = vsub.f32 %v1596_v35, %v3662_v40 }
 0x28c   :  { %v1524_v50 = vand.u32 2147483647, %v1522_v20  ;;  %v1519_v38 = vadd.f32 %v1509_v3, %v3734_v58  ;;  %v1547_v28 = vadd.f32 %v1509_v3, %v1427_v46  ;;  %v1624_v2 = vpop.permute.xlu1 %1623  ;;  %v1552_v56 = vand.u32 2147483647, %v1550_v34 }
 0x28d   :  { %v1622_v27 = vpop.permute.xlu0 %1621  ;;  %v1636_v23 = vmul.f32 0.029838251, %v1624_v2  ;;  %v3825_v11 = vpop.permute.xlu2 %1681 }
 0x28e   :  { %vm1526_vm14 = vcmp.lt.f32.partialorder %v1524_v50, %v1516_v10  ;;  %v1521_v4 = vmul.f32 1.5023419, %v1519_v38  ;;  %v1549_v22 = vmul.f32 1.5005071, %v1547_v28  ;;  %v1635_v7 = vmul.f32 0.029838251, %v1622_v27 }
 0x28f   :  { %v1528_v58 = vsel %vm1526_vm14, %v1520_v15, %v1512_v21  ;;  %v1530_v1 = vsel %vm1526_vm14, %v1524_v50, %v1516_v10  ;;  %v1638_v20 = vadd.f32 %v1636_v23, %v1634_v17  ;;  %v1597_v10 = vmul.f32 2.2468686, %v1509_v3 }
 0x290   :  { %vm1540_vm15 = vcmp.lt.f32.partialorder %v1538_v24, %v1530_v1  ;;  %v1523_v57 = vsub.f32 %v1521_v4, %v4351_v53  ;;  %v1551_v61 = vsub.f32 %v1549_v22, %v4351_v53  ;;  %v1637_v60 = vadd.f32 %v1635_v7, %v1633_v51 }
 0x291   :  { %v1542_v55 = vsel %vm1540_vm15, %v3756_v42, %v1528_v58  ;;  %v1544_v6 = vsel %vm1540_vm15, %v1538_v24, %v1530_v1  ;;  %v1589_v58 = vand.u32 2147483647, %v1587_v52 }
 0x292   :  { %vm1554_vm0 = vcmp.lt.f32.partialorder %v1552_v56, %v1544_v6  ;;  %v1525_v46 = vand.u32 2147483647, %v1523_v57  ;;  %v1641_v19 = vadd.f32 %v1639_v0, %v1637_v60  ;;  %v1553_v48 = vand.u32 2147483647, %v1551_v61 }
 0x293   :  { %v1556_v21 = vsel %vm1554_vm0, %v1548_v39, %v1542_v55  ;;  %v1558_v15 = vsel %vm1554_vm0, %v1552_v56, %v1544_v6  ;;  %1981 = vrot.lane.b32.xlu0 %v3803_v9, %s2237_s14  ;;  %1979 = vrot.lane.b32.xlu2 %v3810_v18, %s2237_s14 }
 0x294   :  { %vm1566_vm1 = vcmp.lt.f32.partialorder %v3745_v45, %v1558_v15  ;;  %vm1527_vm2 = vcmp.lt.f32.partialorder %v1525_v46, %v1517_v26  ;;  %v1630_v42 = vpop.permute.xlu1 %1629 }
 0x295   :  { %v1568_v43 = vsel %vm1566_vm1, %v3696_v37, %v1556_v21  ;;  %v1570_v39 = vsel %vm1566_vm1, %v3745_v45, %v1558_v15  ;;  %v1529_v24 = vsel %vm1527_vm2, %v1521_v4, %v3770_v5  ;;  %v1531_v40 = vsel %vm1527_vm2, %v1525_v46, %v1517_v26  ;;  %v1628_v17 = vpop.permute.xlu0 %1627  ;;  %v1688_v50 = vpop.permute.xlu2 %1687 }
 0x296   :  { %vm1578_vm3 = vcmp.lt.f32.partialorder %v1576_v41, %v1570_v39  ;;  %vm1541_vm4 = vcmp.lt.f32.partialorder %v3805_v14, %v1531_v40  ;;  %v1640_v34 = vmul.f32 0.028789451, %v1628_v17  ;;  %v1643_v38 = vmul.f32 0.029750606, %v1630_v42 }
 0x297   :  { %v1580_v3 = vsel %vm1578_vm3, %v3784_v25, %v1568_v43  ;;  %v1582_v28 = vsel %vm1578_vm3, %v1576_v41, %v1570_v39  ;;  %v1543_v2 = vsel %vm1541_vm4, %v3753_v29, %v1529_v24  ;;  %v1545_v27 = vsel %vm1541_vm4, %v3805_v14, %v1531_v40 }
 0x298   :  { %vm1590_vm5 = vcmp.lt.f32.partialorder %v3797_v47, %v1582_v28  ;;  %v1600_v37 = vand.u32 2147483647, %v1598_v13  ;;  %vm1555_vm6 = vcmp.lt.f32.partialorder %v1553_v48, %v1545_v27  ;;  %v1599_v45 = vsub.f32 %v1597_v10, %v4351_v53 }
 0x299   :  { %v1592_v5 = vsel %vm1590_vm5, %v3749_v49, %v1580_v3  ;;  %v1594_v26 = vsel %vm1590_vm5, %v3797_v47, %v1582_v28  ;;  %v1557_v23 = vsel %vm1555_vm6, %v1549_v22, %v1543_v2  ;;  %v1559_v4 = vsel %vm1555_vm6, %v1553_v48, %v1545_v27 }
 0x29a   :  { %vm1602_vm7 = vcmp.lt.f32.partialorder %v1600_v37, %v1594_v26  ;;  %vm1567_vm8 = vcmp.lt.f32.partialorder %v3788_v59, %v1559_v4  ;;  %v1642_v25 = vadd.f32 %v1640_v34, %v1638_v20  ;;  %v3849_v41 = vadd.f32 %v1643_v38, %v1641_v19  ;;  %v4358_v26 = vld [vmem:[#allocation11_spill] sm:$0xff] }
 0x29b   :  { %v1604_v29 = vsel %vm1602_vm7, %v1596_v35, %v1592_v5  ;;  %v1569_v14 = vsel %vm1567_vm8, %v3743_v30, %v1557_v23  ;;  %v1571_v7 = vsel %vm1567_vm8, %v3788_v59, %v1559_v4  ;;  %v1695_v35 = vmul.f32 0.026051156, %v3825_v11 }
 0x29c   :  { %1607 = vst [vmem:[#allocation6 + $0x20] sm:$0xff] %v1604_v29  ;;  %vm1579_vm9 = vcmp.lt.f32.partialorder %v3823_v31, %v1571_v7  ;;  %v3857_v49 = vadd.f32 %v1644_v12, %v1642_v25  ;;  %v1680_v47 = vpop.permute.xlu1 %1679  ;;  %v1711_v30 = vmul.f32 0.027637592, %v3825_v11  ;;  %v1601_v59 = vand.u32 2147483647, %v1599_v45 }
 0x29d   :  { %v1581_v22 = vsel %vm1579_vm9, %v3786_v54, %v1569_v14  ;;  %v1583_v1 = vsel %vm1579_vm9, %v3823_v31, %v1571_v7  ;;  %v1678_v51 = vpop.permute.xlu0 %1677  ;;  %v1734_v56 = vpop.permute.xlu2 %1733  ;;  %v1694_v31 = vmul.f32 0.024880432, %v1680_v47  ;;  %v1710_v11 = vmul.f32 0.026424944, %v1680_v47 }
 0x29e   :  { %vm1591_vm10 = vcmp.lt.f32.partialorder %v1589_v58, %v1583_v1  ;;  %v1693_v53 = vmul.f32 0.024880432, %v1678_v51  ;;  %v1709_v52 = vmul.f32 0.026424944, %v1678_v51  ;;  %v1700_v48 = vmul.f32 0.027590983, %v1688_v50 }
 0x29f   :  { %v1593_v57 = vsel %vm1591_vm10, %v3791_v32, %v1581_v22  ;;  %v1595_v61 = vsel %vm1591_vm10, %v1589_v58, %v1583_v1  ;;  %v1716_v42 = vmul.f32 0.026682295, %v1688_v50  ;;  %v4357_v50 = vld [vmem:[#allocation12_spill] sm:$0xff]  ;;  %v1649_v23 = vmul.f32 0.02732069, %v4358_v26 }
 0x2a0   :  { %vm1603_vm11 = vcmp.lt.f32.partialorder %v1601_v59, %v1595_v61  ;;  %v1697_v0 = vadd.f32 %v1695_v35, %v1693_v53  ;;  %v1713_v55 = vadd.f32 %v1711_v30, %v1709_v52  ;;  %v1647_v5 = vmul.f32 0.026142834, %v4357_v50  ;;  %v4359_v35 = vld [vmem:[#allocation14_spill] sm:$0xff] }
 0x2a1   :  { %v1605_v6 = vsel %vm1603_vm11, %v1597_v10, %v1593_v57  ;;  %v1765_v25 = vmul.f32 0.026142834, %v1734_v56  ;;  %v1653_v30 = vmul.f32 0.027941383, %v4359_v35  ;;  %v4360_v61 = vld [vmem:[#allocation26_spill] sm:$0xff] }
 0x2a2   :  { %1608 = vst [vmem:[#allocation6 + $0x28] sm:$0xff] %v1605_v6  ;;  %v1651_v52 = vadd.f32 %v1649_v23, %v1647_v5  ;;  %v1749_v6 = vmul.f32 0.028408796, %v1734_v56 }
 0x2a4   :  { %v1686_v54 = vpop.permute.xlu1 %1685 }
 0x2a5   :  { %v1684_v60 = vpop.permute.xlu0 %1683  ;;  %v1699_v12 = vmul.f32 0.027590983, %v1686_v54  ;;  %v1715_v46 = vmul.f32 0.026682295, %v1686_v54  ;;  %v1740_v20 = vpop.permute.xlu2 %1739 }
 0x2a6   :  { %v1696_v21 = vmul.f32 0.026051156, %v1684_v60  ;;  %v1712_v15 = vmul.f32 0.027637592, %v1684_v60  ;;  %v1752_v29 = vmul.f32 0.027001197, %v1740_v20 }
 0x2a7   :  { %v1701_v13 = vadd.f32 %v1699_v12, %v1697_v0  ;;  %v1717_v19 = vadd.f32 %v1715_v46, %v1713_v55  ;;  %v1768_v58 = vmul.f32 0.02732069, %v1740_v20  ;;  %v1657_v0 = vmul.f32 0.025739165, %v4360_v61 }
 0x2a8   :  { %v1698_v32 = vadd.f32 %v1696_v21, %v1694_v31  ;;  %v1714_v43 = vadd.f32 %v1712_v15, %v1710_v11  ;;  %v1655_v55 = vadd.f32 %v1653_v30, %v1651_v52  ;;  %v4367_v52 = vld [vmem:[#allocation24_spill] sm:$0xff] }
 0x2aa   :  { %v1702_v39 = vadd.f32 %v1700_v48, %v1698_v32  ;;  %v1718_v24 = vadd.f32 %v1716_v42, %v1714_v43  ;;  %v3885_v21 = vadd.f32 %v1657_v0, %v1655_v55  ;;  %v1813_v0 = vmul.f32 0.027265936, %v4367_v52 }
 0x2ac   :  { %v1692_v40 = vpop.permute.xlu1 %1691  ;;  %v1661_v56 = vadd.f32 %v3885_v21, %v3849_v41 }
 0x2ad   :  { %v1690_v10 = vpop.permute.xlu0 %1689  ;;  %v1704_v17 = vmul.f32 0.028477976, %v1692_v40  ;;  %v1720_v34 = vmul.f32 0.028733602, %v1692_v40  ;;  %v1746_v38 = vpop.permute.xlu2 %1745  ;;  %v1663_v40 = vmul.f32 0.028408796, %v4357_v50 }
 0x2ae   :  { %v1703_v3 = vmul.f32 0.028477976, %v1690_v10  ;;  %v1719_v28 = vmul.f32 0.028733602, %v1690_v10  ;;  %v3901_v10 = vld [vmem:[#allocation2 + $0x8] sm:$0xff] }
 0x2af   :  { %v3864_v2 = vadd.f32 %v1704_v17, %v1702_v39  ;;  %v3866_v27 = vadd.f32 %v1720_v34, %v1718_v24  ;;  %v1664_v17 = vmul.f32 0.028408796, %v3901_v10  ;;  %v1665_v34 = vmul.f32 0.027001197, %v4358_v26  ;;  %v4366_v26 = vld [vmem:[#allocation17_spill] sm:$0xff] }
 0x2b0   :  { %v3868_v37 = vadd.f32 %v1703_v3, %v1701_v13  ;;  %v3870_v45 = vadd.f32 %v1719_v28, %v1717_v19  ;;  %v1759_v13 = vmul.f32 0.02751074, %v1746_v38  ;;  %v1775_v19 = vmul.f32 0.025739165, %v1746_v38  ;;  %v4363_v3 = vld [vmem:[#allocation29_spill] sm:$0xff] }
 0x2b1   :  { %v1666_v41 = vmul.f32 0.027001197, %v4363_v3  ;;  %v1779_v30 = vmul.f32 0.026424944, %v4366_v26 }
 0x2b4   :  { %v1738_v4 = vpop.permute.xlu1 %1737 }
 0x2b5   :  { %v1736_v14 = vpop.permute.xlu0 %1735  ;;  %v1767_v7 = vmul.f32 0.02732069, %v1738_v4  ;;  %v3874_v47 = vpop.permute.xlu2 %1831  ;;  %v1751_v57 = vmul.f32 0.027001197, %v1738_v4  ;;  %v1669_v4 = vmul.f32 0.02847393, %v4359_v35 }
 0x2b6   :  { %v1750_v22 = vmul.f32 0.028408796, %v1736_v14  ;;  %v1766_v1 = vmul.f32 0.026142834, %v1736_v14  ;;  %v1863_v28 = vmul.f32 0.027072676, %v3874_v47 }
 0x2b7   :  { %v1769_v51 = vadd.f32 %v1767_v7, %v1765_v25  ;;  %v1753_v12 = vadd.f32 %v1751_v57, %v1749_v6  ;;  %v4364_v14 = vld [vmem:[#allocation33_spill] sm:$0xff]  ;;  %v1668_v7 = vadd.f32 %v1666_v41, %v1664_v17  ;;  %v1781_v57 = vmul.f32 0.027637592, %v4367_v52  ;;  %v4368_v6 = vld [vmem:[#allocation15_spill] sm:$0xff] }
 0x2b8   :  { %v3877_v59 = vadd.f32 %v1752_v29, %v1750_v22  ;;  %v1770_v53 = vadd.f32 %v1768_v58, %v1766_v1  ;;  %v1667_v29 = vadd.f32 %v1665_v34, %v1663_v40  ;;  %v1670_v50 = vmul.f32 0.02847393, %v4364_v14  ;;  %v4365_v22 = vld [vmem:[#allocation34_spill] sm:$0xff]  ;;  %v4372_v14 = vld [vmem:[#allocation20_spill] sm:$0xff] }
 0x2b9   :  { %v1673_v58 = vmul.f32 0.02751074, %v4360_v61  ;;  %v1674_v1 = vmul.f32 0.02751074, %v4365_v22  ;;  %v1783_v34 = vadd.f32 %v1781_v57, %v1779_v30  ;;  %v1822_v22 = vmul.f32 0.02886277, %v3604_v62 }
 0x2ba   :  { %v1672_v35 = vadd.f32 %v1670_v50, %v1668_v7  ;;  %v1821_v50 = vmul.f32 0.02886277, %v4372_v14  ;;  %v1789_v57 = vmul.f32 0.028733602, %v4372_v14 }
 0x2bc   :  { %v3880_v54 = vpop.permute.xlu1 %1743  ;;  %v1676_v17 = vadd.f32 %v1674_v1, %v1672_v35 }
 0x2bd   :  { %v1742_v31 = vpop.permute.xlu0 %1741  ;;  %v1772_v60 = vmul.f32 0.027941383, %v3880_v54  ;;  %v3883_v46 = vpop.permute.xlu2 %1837 }
 0x2be   :  { %v1755_v11 = vmul.f32 0.02847393, %v1742_v31  ;;  %v1771_v20 = vmul.f32 0.027941383, %v1742_v31  ;;  %v1812_v31 = vmul.f32 0.026929798, %v4368_v6  ;;  %v1724_v1 = vadd.f32 %v3866_v27, %v1676_v17 }
 0x2bf   :  { %v3887_v15 = vadd.f32 %v1772_v60, %v1770_v53  ;;  %v1811_v53 = vmul.f32 0.026929798, %v4366_v26  ;;  %v4369_v60 = vld [vmem:[#allocation23_spill] sm:$0xff]  ;;  %v1868_v41 = vmul.f32 0.028389689, %v3883_v46 }
 0x2c0   :  { %v1757_v48 = vadd.f32 %v1755_v11, %v1753_v12  ;;  %v1773_v42 = vadd.f32 %v1771_v20, %v1769_v51  ;;  %v1671_v51 = vadd.f32 %v1669_v4, %v1667_v29  ;;  %v1814_v12 = vmul.f32 0.027265936, %v4369_v60  ;;  %v4370_v11 = vld [vmem:[#allocation36_spill] sm:$0xff] }
 0x2c1   :  { %4361 = vst [vmem:[#allocation32_spill] sm:$0xff] %v3887_v15  ;;  %v1817_v20 = vmul.f32 0.02528952, %v4370_v11  ;;  %v1815_v3 = vadd.f32 %v1813_v0, %v1811_v53  ;;  %v1785_v4 = vmul.f32 0.026682295, %v4370_v11 }
 0x2c2   :  { %v3891_v32 = vadd.f32 %v1759_v13, %v1757_v48  ;;  %v3893_v43 = vadd.f32 %v1775_v19, %v1773_v42  ;;  %v4371_v13 = vld [vmem:[#allocation35_spill] sm:$0xff]  ;;  %v1675_v40 = vadd.f32 %v1673_v58, %v1671_v51  ;;  %v1816_v7 = vadd.f32 %v1814_v12, %v1812_v31 }
 0x2c3   :  { %v1818_v19 = vmul.f32 0.02528952, %v4371_v13  ;;  %v1819_v29 = vadd.f32 %v1817_v20, %v1815_v3  ;;  %v1845_v13 = vmul.f32 0.029374145, %v3874_v47  ;;  %v1787_v53 = vadd.f32 %v1785_v4, %v1783_v34 }
 0x2c4   :  { %4362 = vst [vmem:[#allocation13_spill] sm:$0xff] %v3891_v32  ;;  %v3896_v39 = vadd.f32 %v3891_v32, %v1661_v56  ;;  %v3898_v24 = vpop.permute.xlu1 %1829  ;;  %v1723_v51 = vadd.f32 %v3870_v45, %v1675_v40 }
 0x2c5   :  { %v1828_v38 = vpop.permute.xlu0 %1827  ;;  %v3907_v5 = vpop.permute.xlu2 %1885  ;;  %v1862_v48 = vmul.f32 0.027527992, %v3898_v24  ;;  %v1820_v30 = vadd.f32 %v1818_v19, %v1816_v7  ;;  %v1823_v35 = vadd.f32 %v1821_v50, %v1819_v29  ;;  %v3934_v19 = vadd.f32 %v1789_v57, %v1787_v53  ;;  %v2172_v50 = vld [vmem:[#allocation2 + $0x20] sm:$0xff] }
 0x2c6   :  { %v1861_v23 = vmul.f32 0.027527992, %v1828_v38  ;;  %v1648_v29 = vmul.f32 0.026142834, %v3901_v10  ;;  %v1650_v7 = vmul.f32 0.02732069, %v2172_v50 }
 0x2c7   :  { %v1824_v31 = vadd.f32 %v1822_v22, %v1820_v30  ;;  %v1825_v45 = vadd.f32 %v1823_v35, %v1723_v51  ;;  %v3961_v30 = vmul.f32 0.024880432, %v4366_v26  ;;  %v1780_v53 = vmul.f32 0.026424944, %v4368_v6 }
 0x2c8   :  { %v1865_v25 = vadd.f32 %v1863_v28, %v1861_v23  ;;  %v1843_v28 = vmul.f32 0.027785454, %v1828_v38  ;;  %v1796_v57 = vmul.f32 0.024880432, %v4368_v6  ;;  %v3966_v35 = vmul.f32 0.026051156, %v4367_v52 }
 0x2c9   :  { %v1826_v3 = vadd.f32 %v1824_v31, %v1724_v1  ;;  %v1933_v10 = vmul.f32 0.027527992, %v3685_v36  ;;  %v1844_v31 = vmul.f32 0.027785454, %v3898_v24  ;;  %v1798_v26 = vmul.f32 0.026051156, %v4369_v60 }
 0x2ca   :  { %v1847_v38 = vadd.f32 %v1845_v13, %v1843_v28  ;;  %v1934_v6 = vmul.f32 0.027527992, %v3680_v8  ;;  %v1756_v52 = vmul.f32 0.02847393, %v3880_v54  ;;  %v1953_v24 = vmul.f32 0.029374145, %v3728_v33 }
 0x2cb   :  { %v1939_v54 = vmul.f32 0.028389689, %v3758_v44 }
 0x2cc   :  { %v1836_v55 = vpop.permute.xlu1 %1835 }
 0x2cd   :  { %v1834_v61 = vpop.permute.xlu0 %1833  ;;  %v3922_v42 = vpop.permute.xlu2 %1891  ;;  %v1849_v32 = vmul.f32 0.029697677, %v1836_v55  ;;  %v1867_v15 = vmul.f32 0.028389689, %v1836_v55 }
 0x2ce   :  { %v1864_v56 = vmul.f32 0.027072676, %v1834_v61  ;;  %v1846_v51 = vmul.f32 0.029374145, %v1834_v61  ;;  %v2175_v61 = vld [vmem:[#allocation2 + $0x31] sm:$0xff] }
 0x2cf   :  { %v1851_v20 = vadd.f32 %v1849_v32, %v1847_v38 }
 0x2d0   :  { %v1866_v23 = vadd.f32 %v1864_v56, %v1862_v48  ;;  %v1869_v48 = vadd.f32 %v1867_v15, %v1865_v25 }
 0x2d2   :  { %v1870_v58 = vadd.f32 %v1868_v41, %v1866_v23  ;;  %v3942_v41 = vadd.f32 %v3934_v19, %v3896_v39  ;;  %v2173_v39 = vld [vmem:[#allocation2 + $0x38] sm:$0xff] }
 0x2d3   :  { %v1654_v22 = vmul.f32 0.027941383, %v2173_v39 }
 0x2d4   :  { %v1842_v0 = vpop.permute.xlu1 %1841 }
 0x2d5   :  { %v1840_v11 = vpop.permute.xlu0 %1839  ;;  %v1872_v12 = vmul.f32 0.029660596, %v1842_v0  ;;  %v3932_v47 = vpop.permute.xlu2 %1971 }
 0x2d6   :  { %v1853_v55 = vmul.f32 0.028045097, %v1840_v11  ;;  %v1871_v56 = vmul.f32 0.029660596, %v1840_v11  ;;  %v1935_v11 = vmul.f32 0.027072676, %v3728_v33  ;;  %v1758_v33 = vadd.f32 %v1756_v52, %v3877_v59 }
 0x2d7   :  { %v1874_v27 = vadd.f32 %v1872_v12, %v1870_v58  ;;  %v2174_v58 = vld [vmem:[#allocation2 + $0x50] sm:$0xff]  ;;  %v1652_v12 = vadd.f32 %v1650_v7, %v1648_v29  ;;  %v2176_v29 = vld [vmem:[#allocation2 + $0x39] sm:$0xff]  ;;  %v1954_v7 = vmul.f32 0.029374145, %v3721_v63  ;;  %v1943_v52 = vmul.f32 0.029660596, %v3810_v18 }
 0x2d8   :  { %v3936_v40 = vadd.f32 %v1853_v55, %v1851_v20  ;;  %v1873_v17 = vadd.f32 %v1871_v56, %v1869_v48  ;;  %v1658_v1 = vmul.f32 0.025739165, %v2174_v58  ;;  %v1782_v20 = vmul.f32 0.027637592, %v4369_v60 }
 0x2d9   :  { %v3938_v34 = vadd.f32 %v1874_v27, %v1826_v3  ;;  %v3973_v48 = vmul.f32 0.027590983, %v2175_v61  ;;  %v1951_v55 = vmul.f32 0.027785454, %v3685_v36  ;;  %v1848_v56 = vadd.f32 %v1846_v51, %v1844_v31 }
 0x2da   :  { %v1857_v15 = vadd.f32 %v3936_v40, %v3868_v37  ;;  %v3946_v32 = vadd.f32 %v1873_v17, %v1825_v45  ;;  %v1656_v3 = vadd.f32 %v1654_v22, %v1652_v12  ;;  %v1952_v27 = vmul.f32 0.027785454, %v3680_v8 }
 0x2db   :  { %v1936_v45 = vmul.f32 0.027072676, %v3721_v63  ;;  %v1937_v60 = vadd.f32 %v1935_v11, %v1933_v10  ;;  %v1786_v50 = vmul.f32 0.026682295, %v2176_v29  ;;  %v1854_v36 = vmul.f32 0.028045097, %v1842_v0 }
 0x2dc   :  { %v3949_v25 = vadd.f32 %v1857_v15, %v3942_v41  ;;  %v3951_v28 = vpop.permute.xlu1 %1889  ;;  %v1850_v15 = vmul.f32 0.029697677, %v3883_v46  ;;  %v3986_v39 = vadd.f32 %v1658_v1, %v1656_v3  ;;  %v1784_v22 = vadd.f32 %v1782_v20, %v1780_v53 }
 0x2dd   :  { %v3953_v23 = vpop.permute.xlu0 %1887  ;;  %v3955_v4 = vpop.permute.xlu2 %1893  ;;  %v1790_v58 = vmul.f32 0.028733602, %v3604_v62  ;;  %v1955_v11 = vadd.f32 %v1953_v24, %v1951_v55  ;;  %v1957_v0 = vmul.f32 0.029697677, %v3758_v44  ;;  %v1940_v63 = vmul.f32 0.028389689, %v3762_v16 }
 0x2de   :  { %v1852_v51 = vadd.f32 %v1850_v15, %v1848_v56  ;;  %v1958_v1 = vmul.f32 0.029697677, %v3762_v16  ;;  %v1662_v53 = vadd.f32 %v3986_v39, %v3857_v49  ;;  %v1788_v31 = vadd.f32 %v1786_v50, %v1784_v22 }
 0x2df   :  { %v1938_v20 = vadd.f32 %v1936_v45, %v1934_v6  ;;  %v1956_v61 = vadd.f32 %v1954_v7, %v1952_v27  ;;  %v1961_v55 = vmul.f32 0.028045097, %v3810_v18  ;;  %v1941_v56 = vadd.f32 %v1939_v54, %v1937_v60 }
 0x2e0   :  { %v4000_v12 = vadd.f32 %v1854_v36, %v1852_v51  ;;  %v4006_v44 = vadd.f32 %v1790_v58, %v1788_v31  ;;  %v1959_v24 = vadd.f32 %v1957_v0, %v1955_v11  ;;  %v1944_v49 = vmul.f32 0.029660596, %v3803_v9 }
 0x2e1   :  { %v4009_v15 = vadd.f32 %v1958_v1, %v1956_v61  ;;  %v1802_v50 = vmul.f32 0.027590983, %v2176_v29  ;;  %v4013_v36 = vmul.f32 0.028045097, %v3803_v9  ;;  %v1985_v6 = vmul.f32 0.02664409, %v3932_v47 }
 0x2e2   :  { %v1858_v18 = vadd.f32 %v4000_v12, %v3864_v2  ;;  %v4023_v45 = vadd.f32 %v1961_v55, %v1959_v24  ;;  %v1800_v7 = vadd.f32 %v1798_v26, %v1796_v57  ;;  %v4026_v54 = vmul.f32 0.028477976, %v3604_v62 }
 0x2e3   :  { %v1859_v9 = vadd.f32 %v3936_v40, %v3934_v19  ;;  %v1903_v51 = vmul.f32 0.027265936, %v3951_v28  ;;  %v1799_v57 = vadd.f32 %v3966_v35, %v3961_v30  ;;  %v1902_v62 = vmul.f32 0.026929798, %v3953_v23 }
 0x2e4   :  { %v3958_v13 = vpop.permute.xlu1 %1969  ;;  %v1804_v11 = vadd.f32 %v1802_v50, %v1800_v7  ;;  %v1805_v19 = vmul.f32 0.028477976, %v4372_v14  ;;  %v1901_v40 = vmul.f32 0.026929798, %v3907_v5  ;;  %v1917_v1 = vmul.f32 0.026424944, %v3907_v5 }
 0x2e5   :  { %v1968_v38 = vpop.permute.xlu0 %1967  ;;  %v3981_v17 = vpop.permute.xlu2 %1977  ;;  %v1942_v31 = vadd.f32 %v1940_v63, %v1938_v20  ;;  %v1904_v61 = vmul.f32 0.027265936, %v3922_v42  ;;  %v1707_v30 = vadd.f32 %v3868_v37, %v3885_v21  ;;  %v1920_v14 = vmul.f32 0.027637592, %v3922_v42 }
 0x2e6   :  { %v1983_v3 = vmul.f32 0.027638787, %v1968_v38  ;;  %v4021_v38 = vadd.f32 %v1943_v52, %v1941_v56  ;;  %v1905_v35 = vadd.f32 %v1903_v51, %v1901_v40  ;;  %v1918_v5 = vmul.f32 0.026424944, %v3953_v23  ;;  %v4374_v40 = vld [vmem:[#allocation13_spill] sm:$0xff] }
 0x2e7   :  { %v1907_v63 = vmul.f32 0.02528952, %v3955_v4  ;;  %v1923_v20 = vmul.f32 0.026682295, %v3955_v4 }
 0x2e8   :  { %v1987_v47 = vadd.f32 %v1985_v6, %v1983_v3  ;;  %v4046_v3 = vadd.f32 %v1944_v49, %v1942_v31 }
 0x2e9   :  { %v1909_v42 = vadd.f32 %v1907_v63, %v1905_v35  ;;  %v4084_v63 = vmul.f32 2.2568197, %v3946_v32 }
 0x2ec   :  { %v3988_v8 = vpop.permute.xlu1 %1747 }
 0x2ed   :  { %v3992_v10 = vpop.permute.xlu0 %1973  ;;  %v1760_v46 = vmul.f32 0.02751074, %v3988_v8  ;;  %v1980_v60 = vpop.permute.xlu2 %1979  ;;  %v1776_v24 = vmul.f32 0.025739165, %v3988_v8 }
 0x2ee   :  { %v1993_v26 = vmul.f32 0.027921, %v1980_v60  ;;  %v1986_v4 = vmul.f32 0.02664409, %v3992_v10  ;;  %v2023_v10 = vmul.f32 1.4991704, %v3949_v25 }
 0x2ef   :  { %v4002_v59 = vadd.f32 %v1760_v46, %v1758_v33  ;;  %v1919_v46 = vmul.f32 0.027637592, %v3951_v28  ;;  %v1949_v28 = vadd.f32 %v4021_v38, %v1859_v9  ;;  %v4057_v9 = vmul.f32 2.254072, %v3942_v41 }
 0x2f0   :  { %v1990_v25 = vmul.f32 0.027856383, %v3981_v17  ;;  %v1708_v17 = vadd.f32 %v3864_v2, %v3986_v39 }
 0x2f1   :  { %v1764_v16 = vadd.f32 %v4002_v59, %v1662_v53  ;;  %v1803_v53 = vadd.f32 %v3973_v48, %v1799_v57  ;;  %v1921_v56 = vadd.f32 %v1919_v46, %v1917_v1  ;;  %v1984_v57 = vmul.f32 0.027638787, %v3958_v13  ;;  %v4070_v13 = vld [vmem:[#allocation2 + $0x49] sm:$0xff] }
 0x2f2   :  { %v2075_v2 = vsub.f32 %v4084_v63, %v4070_v13 }
 0x2f3   :  { %v4019_v27 = vadd.f32 %v4006_v44, %v1764_v16  ;;  %v1906_v16 = vadd.f32 %v1904_v61, %v1902_v62  ;;  %v1807_v50 = vadd.f32 %v1805_v19, %v1803_v53  ;;  %v4373_v62 = vld [vmem:[#allocation32_spill] sm:$0xff] }
 0x2f4   :  { %v1976_v29 = vpop.permute.xlu1 %1975 }
 0x2f5   :  { %v4031_v22 = vadd.f32 %v1858_v18, %v4019_v27  ;;  %v1896_v33 = vpop.permute.xlu0 %1895  ;;  %v1989_v58 = vmul.f32 0.027856383, %v1976_v29  ;;  %v1925_v29 = vadd.f32 %v1923_v20, %v1921_v56  ;;  %v1809_v8 = vadd.f32 %v1807_v50, %v3893_v43 }
 0x2f6   :  { %v1908_v52 = vmul.f32 0.02528952, %v1896_v33  ;;  %v1924_v21 = vmul.f32 0.026682295, %v1896_v33  ;;  %v1808_v43 = vadd.f32 %v4026_v54, %v1804_v11  ;;  %v1860_v56 = vadd.f32 %v4000_v12, %v4006_v44 }
 0x2f7   :  { %v1991_v0 = vadd.f32 %v1989_v58, %v1987_v47  ;;  %v1922_v47 = vadd.f32 %v1920_v14, %v1918_v5 }
 0x2f8   :  { %v1910_v37 = vadd.f32 %v1908_v52, %v1906_v16  ;;  %v1964_v52 = vadd.f32 %v4013_v36, %v4009_v15 }
 0x2f9   :  { %v1995_v55 = vadd.f32 %v1993_v26, %v1991_v0  ;;  %v1778_v26 = vadd.f32 %v1776_v24, %v4373_v62  ;;  %v1926_v0 = vadd.f32 %v1924_v21, %v1922_v47 }
 0x2fb   :  { %v4050_v48 = vadd.f32 %v1995_v55, %v1949_v28  ;;  %v1988_v28 = vadd.f32 %v1986_v4, %v1984_v57  ;;  %v2051_v55 = vsub.f32 %v4057_v9, %v4070_v13  ;;  %v1810_v14 = vadd.f32 %v1808_v43, %v1778_v26 }
 0x2fc   :  { %v1900_v6 = vpop.permute.xlu1 %1899 }
 0x2fd   :  { %v2007_v49 = vadd.f32 %v4050_v48, %v1707_v30  ;;  %v1898_v18 = vpop.permute.xlu0 %1897  ;;  %v1912_v60 = vmul.f32 0.02886277, %v1900_v6  ;;  %v1928_v33 = vmul.f32 0.028733602, %v1900_v6  ;;  %v1992_v20 = vadd.f32 %v1990_v25, %v1988_v28 }
 0x2fe   :  { %v1911_v7 = vmul.f32 0.02886277, %v1898_v18  ;;  %v1927_v23 = vmul.f32 0.028733602, %v1898_v18  ;;  %v2053_v12 = vand.u32 2147483647, %v2051_v55 }
 0x2ff   :  { %v1914_v58 = vadd.f32 %v1912_v60, %v1910_v37  ;;  %v2009_v19 = vmul.f32 1.5023419, %v2007_v49  ;;  %v1950_v37 = vadd.f32 %v4046_v3, %v1860_v56 }
 0x300   :  { %v1913_v51 = vadd.f32 %v1911_v7, %v1909_v42  ;;  %v1929_v46 = vadd.f32 %v1927_v23, %v1925_v29  ;;  %v2024_v29 = vmul.f32 1.4991704, %v4031_v22  ;;  %v2050_v22 = vmul.f32 2.254072, %v4019_v27 }
 0x301   :  { %v1948_v61 = vadd.f32 %v4046_v3, %v1914_v58  ;;  %v2011_v54 = vsub.f32 %v2009_v19, %v4070_v13  ;;  %v1916_v39 = vadd.f32 %v1914_v58, %v4002_v59 }
 0x302   :  { %v1915_v1 = vadd.f32 %v1913_v51, %v4374_v40  ;;  %v1931_v53 = vadd.f32 %v1929_v46, %v1809_v8  ;;  %v1947_v31 = vadd.f32 %v4021_v38, %v1913_v51  ;;  %v1930_v38 = vadd.f32 %v1928_v33, %v1926_v0  ;;  %v2178_v33 = vld [vmem:[#allocation2 + $0x51] sm:$0xff] }
 0x303   :  { %v2000_v5 = vadd.f32 %v1948_v61, %v4019_v27  ;;  %v2013_v6 = vand.u32 2147483647, %v2011_v54  ;;  %v2026_v0 = vsub.f32 %v2024_v29, %v2178_v33 }
 0x304   :  { %v1999_v30 = vadd.f32 %v1947_v31, %v3942_v41  ;;  %v2035_v35 = vadd.f32 %v4050_v48, %v1915_v1  ;;  %v1965_v15 = vadd.f32 %v4023_v45, %v1931_v53  ;;  %v2025_v41 = vsub.f32 %v2023_v10, %v4070_v13 }
 0x305   :  { %v1982_v11 = vpop.permute.xlu0 %1981  ;;  %v1932_v50 = vadd.f32 %v1930_v38, %v1810_v14  ;;  %v4090_v45 = vmul.f32 2.2568197, %v3938_v34  ;;  %v2002_v60 = vmul.f32 1.5029395, %v2000_v5  ;;  %v2085_v34 = vmul.f32 2.2468686, %v4050_v48 }
 0x306   :  { %v2001_v36 = vmul.f32 1.5029395, %v1999_v30  ;;  %v2037_v16 = vmul.f32 1.5005071, %v2035_v35  ;;  %v1994_v24 = vmul.f32 0.027921, %v1982_v11  ;;  %v2052_v35 = vsub.f32 %v2050_v22, %v2178_v33 }
 0x307   :  { %v2061_v18 = vmul.f32 2.2564495, %v1965_v15  ;;  %v2027_v42 = vand.u32 2147483647, %v2025_v41  ;;  %v1966_v23 = vadd.f32 %v1964_v52, %v1932_v50  ;;  %v2004_v57 = vsub.f32 %v2002_v60, %v2178_v33 }
 0x308   :  { %v2003_v44 = vsub.f32 %v2001_v36, %v4070_v13  ;;  %v1996_v21 = vadd.f32 %v1994_v24, %v1992_v20  ;;  %v2039_v32 = vsub.f32 %v2037_v16, %v4070_v13  ;;  %v2087_v48 = vsub.f32 %v2085_v34, %v4070_v13 }
 0x309   :  { %v2063_v46 = vsub.f32 %v2061_v18, %v4070_v13  ;;  %v2062_v1 = vmul.f32 2.2564495, %v1966_v23  ;;  %v2077_v31 = vand.u32 2147483647, %v2075_v2  ;;  %v2006_v28 = vand.u32 2147483647, %v2004_v57 }
 0x30a   :  { %v2005_v49 = vand.u32 2147483647, %v2003_v44  ;;  %v1998_v7 = vadd.f32 %v1996_v21, %v1950_v37  ;;  %v2041_v51 = vand.u32 2147483647, %v2039_v32  ;;  %v2028_v30 = vand.u32 2147483647, %v2026_v0 }
 0x30b   :  { %v2065_v61 = vand.u32 2147483647, %v2063_v46  ;;  %v2089_v38 = vand.u32 2147483647, %v2087_v48  ;;  %v2064_v56 = vsub.f32 %v2062_v1, %v2178_v33  ;;  %v2076_v5 = vsub.f32 %v4090_v45, %v2178_v33 }
 0x30c   :  { %vm2015_vm12 = vcmp.lt.f32.partialorder %v2013_v6, %v2005_v49  ;;  %v2008_v4 = vadd.f32 %v1998_v7, %v1708_v17  ;;  %v2036_v8 = vadd.f32 %v1998_v7, %v1916_v39  ;;  %v2086_v54 = vmul.f32 2.2468686, %v1998_v7 }
 0x30d   :  { %v2017_v3 = vsel %vm2015_vm12, %v2009_v19, %v2001_v36  ;;  %v2019_v47 = vsel %vm2015_vm12, %v2013_v6, %v2005_v49  ;;  %v2054_v41 = vand.u32 2147483647, %v2052_v35 }
 0x30e   :  { %vm2029_vm13 = vcmp.lt.f32.partialorder %v2027_v42, %v2019_v47  ;;  %v2010_v59 = vmul.f32 1.5023419, %v2008_v4  ;;  %v2038_v58 = vmul.f32 1.5005071, %v2036_v8  ;;  %v2088_v44 = vsub.f32 %v2086_v54, %v2178_v33 }
 0x30f   :  { %v2031_v62 = vsel %vm2029_vm13, %v2023_v10, %v2017_v3  ;;  %v2033_v26 = vsel %vm2029_vm13, %v2027_v42, %v2019_v47 }
 0x310   :  { %vm2043_vm14 = vcmp.lt.f32.partialorder %v2041_v51, %v2033_v26  ;;  %v2012_v53 = vsub.f32 %v2010_v59, %v2178_v33  ;;  %v2040_v55 = vsub.f32 %v2038_v58, %v2178_v33  ;;  %v2090_v49 = vand.u32 2147483647, %v2088_v44 }
 0x311   :  { %v2045_v19 = vsel %vm2043_vm14, %v2037_v16, %v2031_v62  ;;  %v2047_v40 = vsel %vm2043_vm14, %v2041_v51, %v2033_v26 }
 0x312   :  { %vm2055_vm15 = vcmp.lt.f32.partialorder %v2053_v12, %v2047_v40  ;;  %v2014_v52 = vand.u32 2147483647, %v2012_v53 }
 0x313   :  { %v2057_v43 = vsel %vm2055_vm15, %v4057_v9, %v2045_v19  ;;  %v2059_v10 = vsel %vm2055_vm15, %v2053_v12, %v2047_v40  ;;  %v2042_v9 = vand.u32 2147483647, %v2040_v55  ;;  %v2066_v12 = vand.u32 2147483647, %v2064_v56 }
 0x314   :  { %vm2067_vm0 = vcmp.lt.f32.partialorder %v2065_v61, %v2059_v10  ;;  %vm2016_vm1 = vcmp.lt.f32.partialorder %v2014_v52, %v2006_v28 }
 0x315   :  { %v2069_v27 = vsel %vm2067_vm0, %v2061_v18, %v2057_v43  ;;  %v2071_v13 = vsel %vm2067_vm0, %v2065_v61, %v2059_v10  ;;  %v2018_v25 = vsel %vm2016_vm1, %v2010_v59, %v2002_v60  ;;  %v2020_v14 = vsel %vm2016_vm1, %v2014_v52, %v2006_v28 }
 0x316   :  { %vm2079_vm2 = vcmp.lt.f32.partialorder %v2077_v31, %v2071_v13  ;;  %vm2030_vm3 = vcmp.lt.f32.partialorder %v2028_v30, %v2020_v14 }
 0x317   :  { %v2081_v11 = vsel %vm2079_vm2, %v4084_v63, %v2069_v27  ;;  %v2083_v15 = vsel %vm2079_vm2, %v2077_v31, %v2071_v13  ;;  %v2032_v36 = vsel %vm2030_vm3, %v2024_v29, %v2018_v25  ;;  %v2034_v16 = vsel %vm2030_vm3, %v2028_v30, %v2020_v14 }
 0x318   :  { %vm2091_vm4 = vcmp.lt.f32.partialorder %v2089_v38, %v2083_v15  ;;  %vm2044_vm5 = vcmp.lt.f32.partialorder %v2042_v9, %v2034_v16  ;;  %v2078_v63 = vand.u32 2147483647, %v2076_v5 }
 0x319   :  { %v2093_v20 = vsel %vm2091_vm4, %v2085_v34, %v2081_v11  ;;  %v2046_v24 = vsel %vm2044_vm5, %v2038_v58, %v2032_v36  ;;  %v2048_v17 = vsel %vm2044_vm5, %v2042_v9, %v2034_v16 }
 0x31a   :  { %2096 = vst [vmem:[#allocation6 + $0x30] sm:$0xff] %v2093_v20  ;;  %vm2056_vm6 = vcmp.lt.f32.partialorder %v2054_v41, %v2048_v17 }
 0x31b   :  { %v2058_v50 = vsel %vm2056_vm6, %v2050_v22, %v2046_v24  ;;  %v2060_v6 = vsel %vm2056_vm6, %v2054_v41, %v2048_v17 }
 0x31c   :  { %vm2068_vm7 = vcmp.lt.f32.partialorder %v2066_v12, %v2060_v6 }
 0x31d   :  { %v2070_v37 = vsel %vm2068_vm7, %v2062_v1, %v2058_v50  ;;  %v2072_v21 = vsel %vm2068_vm7, %v2066_v12, %v2060_v6 }
 0x31e   :  { %vm2080_vm8 = vcmp.lt.f32.partialorder %v2078_v63, %v2072_v21 }
 0x31f   :  { %v2082_v32 = vsel %vm2080_vm8, %v4090_v45, %v2070_v37  ;;  %v2084_v18 = vsel %vm2080_vm8, %v2078_v63, %v2072_v21 }
 0x320   :  { %vm2092_vm9 = vcmp.lt.f32.partialorder %v2090_v49, %v2084_v18 }
 0x321   :  { %v2094_v60 = vsel %vm2092_vm9, %v2086_v54, %v2082_v32 }
 0x322   :  { %2097 = vst [vmem:[#allocation6 + $0x38] sm:$0xff] %v2094_v60 }
 0x323   :  { %2110 = dma.vmem_to_hbm [thread:$0]  %s2103_s16, 1024, %s2105_s19, [#allocation5], %s2232_s11, %s2232_s11, %s2233_s12  }
 0x324   :  { %2229 = dma.done.wait [#allocation5], 1024  }
 0x325   :  { %2230 = vsyncadd [#allocation5], 4294966272 }
 0x326   :  { %2115 = vsyncpa [#allocation4], 1 }
 0x327   :  { %2116 = vsyncpa [#allocation5], 1 }

</bundles_post_ra>
